<compile_context>
chip_gen: v7x
topology: tpu7x:2x2x1
jax: 0.10.0
libtpu: 0.0.40
codegen_flags: <defaults>
</compile_context>

<pallas_src>
import jax
import jax.numpy as jnp
from jax.experimental import pallas as pl
from jax.experimental.pallas import tpu as pltpu

HIDDEN = 1024


def critic_kernel(xu_ref, w1_ref, b1_ref, w2_ref, b2_ref, w3t_ref, b3_ref,
                  q_ref):
    """One grid step = (head h, batch tile b): full 3-layer MLP for one head."""
    # ---- layer 1 (l1 / l4) --------------------------------------------------
    h1 = jnp.dot(xu_ref[...], w1_ref[...],
                 preferred_element_type=jnp.float32) + b1_ref[...]
    h1 = jnp.maximum(h1, 0.0).astype(jnp.bfloat16)

    # ---- layer 2 (l2 / l5) --------------------------------------------------
    h2 = jnp.dot(h1, w2_ref[...],
                 preferred_element_type=jnp.float32) + b2_ref[...]
    h2 = jnp.maximum(h2, 0.0)

    # ---- layer 3 (l3 / l6): VPU multiply + lane reduction (no N=1 matmul) ---
    q = jnp.sum(h2 * w3t_ref[...].astype(jnp.float32),
                axis=-1, keepdims=True) + b3_ref[...]

    # The PyTorch module applies F.relu after l3/l6 -> keep it.
    q_ref[...] = jnp.maximum(q, 0.0)


def critic_forward(x, u, t, params, *, tile_b=128):
    """params: dict with w1..w6 stored (in, out) and b1..b6 stored (1, out)."""
    xu = jnp.concatenate([x, u, t], axis=1).astype(jnp.bfloat16)
    B, d_in = xu.shape
    H = params["w1"].shape[1]

    # Stack the two independent Q-heads on a leading (parallel) axis.
    w1 = jnp.stack([params["w1"], params["w4"]]).astype(jnp.bfloat16)   # (2,d,H)
    b1 = jnp.stack([params["b1"], params["b4"]])                        # (2,1,H)
    w2 = jnp.stack([params["w2"], params["w5"]]).astype(jnp.bfloat16)   # (2,H,H)
    b2 = jnp.stack([params["b2"], params["b5"]])                        # (2,1,H)
    # Layer-3 weights transposed to a lane-dense (1, H) row per head.
    w3t = jnp.stack([params["w3"].T, params["w6"].T]).astype(jnp.bfloat16)  # (2,1,H)
    b3 = jnp.stack([params["b3"], params["b6"]])                        # (2,1,1)

    tb = B if B <= tile_b else tile_b
    nb = pl.cdiv(B, tb)
    grid = (2, nb)  # head axis outermost -> cross-core split on v7x

    grid_spec = pltpu.PrefetchScalarGridSpec(
        num_scalar_prefetch=0,
        grid=grid,
        in_specs=[
            pl.BlockSpec((tb, d_in), lambda h, b: (b, 0)),          # xu
            pl.BlockSpec((None, d_in, H), lambda h, b: (h, 0, 0)),  # w1/w4
            pl.BlockSpec((None, 1, H), lambda h, b: (h, 0, 0)),     # b1/b4
            pl.BlockSpec((None, H, H), lambda h, b: (h, 0, 0)),     # w2/w5
            pl.BlockSpec((None, 1, H), lambda h, b: (h, 0, 0)),     # b2/b5
            pl.BlockSpec((None, 1, H), lambda h, b: (h, 0, 0)),     # w3t/w6t
            pl.BlockSpec((None, 1, 1), lambda h, b: (h, 0, 0)),     # b3/b6
        ],
        out_specs=pl.BlockSpec((None, tb, 1), lambda h, b: (h, b, 0)),
    )

    out = pl.pallas_call(
        critic_kernel,
        out_shape=jax.ShapeDtypeStruct((2, B, 1), jnp.float32),
        grid_spec=grid_spec,
        compiler_params=pltpu.CompilerParams(
            # Head axis parallel (megacore split on v7x); batch axis arbitrary
            # so the per-head weights stay resident across batch tiles.
            dimension_semantics=("parallel", "arbitrary"),
            vmem_limit_bytes=32 * 1024 * 1024,  # ~6 MiB actually used
        ),
    )(xu, w1, b1, w2, b2, w3t, b3)

    return out[0], out[1]


# ----------------------------- reference & init -----------------------------

def init_linear(key, fan_in, fan_out):
    # PyTorch nn.Linear default: U(-1/sqrt(fan_in), 1/sqrt(fan_in)) for W and b.
    kw, kb = jax.random.split(key)
    bound = 1.0 / jnp.sqrt(jnp.float32(fan_in))
    w = jax.random.uniform(kw, (fan_in, fan_out), jnp.float32, -bound, bound)
    b = jax.random.uniform(kb, (1, fan_out), jnp.float32, -bound, bound)
    return w, b


def init_params(key, state_dim, action_dim, hidden=HIDDEN):
    d_in = state_dim + action_dim
    keys = jax.random.split(key, 6)
    p = {}
    p["w1"], p["b1"] = init_linear(keys[0], d_in, hidden)
    p["w2"], p["b2"] = init_linear(keys[1], hidden, hidden)
    p["w3"], p["b3"] = init_linear(keys[2], hidden, 1)
    p["w4"], p["b4"] = init_linear(keys[3], d_in, hidden)
    p["w5"], p["b5"] = init_linear(keys[4], hidden, hidden)
    p["w6"], p["b6"] = init_linear(keys[5], hidden, 1)
    return p


def reference_forward(x, u, t, p):
    """Pure-JAX reference mirroring the kernel's bf16-weight / f32-accum math."""
    xu = jnp.concatenate([x, u, t], axis=1).astype(jnp.bfloat16)

    def head(wa, ba, wb, bb, wc, bc):
        h = jnp.dot(xu, wa.astype(jnp.bfloat16),
                    preferred_element_type=jnp.float32) + ba
        h = jnp.maximum(h, 0.0).astype(jnp.bfloat16)
        g = jnp.dot(h, wb.astype(jnp.bfloat16),
                    preferred_element_type=jnp.float32) + bb
        g = jnp.maximum(g, 0.0)
        q = jnp.dot(g, wc.astype(jnp.float32),
                    preferred_element_type=jnp.float32) + bc
        return jnp.maximum(q, 0.0)

    q1 = head(p["w1"], p["b1"], p["w2"], p["b2"], p["w3"], p["b3"])
    q2 = head(p["w4"], p["b4"], p["w5"], p["b5"], p["w6"], p["b6"])
    return q1, q2


if __name__ == "__main__":
    # state_dim counts [x, t] features, action_dim counts u features,
    # so dim(x) + dim(u) + dim(t) == state_dim + action_dim as l1/l4 expect.
    B = 2
    x_dim, u_dim, t_dim = 15, 8, 1
    state_dim, action_dim = x_dim + t_dim, u_dim  # 16 + 8 = 24 = l1 in_features

    key = jax.random.PRNGKey(0)
    kx, ku, kt, kp = jax.random.split(key, 4)
    x = jax.random.normal(kx, (B, x_dim), jnp.float32)
    u = jax.random.normal(ku, (B, u_dim), jnp.float32)
    t = jax.random.normal(kt, (B, t_dim), jnp.float32)

    params = init_params(kp, state_dim, action_dim)

    q1, q2 = critic_forward(x, u, t, params)
    jax.block_until_ready((q1, q2))

    r1, r2 = reference_forward(x, u, t, params)
    assert q1.shape == (B, 1) and q2.shape == (B, 1)
    assert jnp.allclose(q1, r1, atol=1e-2, rtol=1e-2)
    assert jnp.allclose(q2, r2, atol=1e-2, rtol=1e-2)

    print("KERNEL_OK")
</pallas_src>

<mosaic_0001>
module attributes {stable_mosaic.version = 11 : i64} {
  func.func @critic_kernel(%arg0: i32, %arg1: i32, %arg2: memref<2x24xbf16, #tpu.memory_space<vmem>>, %arg3: memref<1x24x1024xbf16, #tpu.memory_space<vmem>>, %arg4: memref<1x1x1024xf32, #tpu.memory_space<vmem>>, %arg5: memref<1x1024x1024xbf16, #tpu.memory_space<vmem>>, %arg6: memref<1x1x1024xf32, #tpu.memory_space<vmem>>, %arg7: memref<1x1x1024xbf16, #tpu.memory_space<vmem>>, %arg8: memref<1x1x1xf32, #tpu.memory_space<vmem>>, %arg9: memref<1x2x1xf32, #tpu.memory_space<vmem>>) attributes {dimension_semantics = [#tpu.dimension_semantics<parallel>, #tpu.dimension_semantics<arbitrary>], iteration_bounds = array<i64: 2, 1>, scalar_prefetch = 0 : i64, scratch_operands = 0 : i64, tpu.core_type = #tpu.core_type<tc>, window_params = [{transform_indices = @transform_0, window_bounds = array<i64: 2, 24>}, {transform_indices = @transform_1, window_bounds = array<i64: 1, 24, 1024>}, {transform_indices = @transform_2, window_bounds = array<i64: 1, 1, 1024>}, {transform_indices = @transform_3, window_bounds = array<i64: 1, 1024, 1024>}, {transform_indices = @transform_4, window_bounds = array<i64: 1, 1, 1024>}, {transform_indices = @transform_5, window_bounds = array<i64: 1, 1, 1024>}, {transform_indices = @transform_6, window_bounds = array<i64: 1, 1, 1>}, {transform_indices = @transform_7, window_bounds = array<i64: 1, 2, 1>}]} {
    %c0 = arith.constant 0 : index
    %c0_0 = arith.constant 0 : index
    %0 = vector.load %arg2[%c0, %c0_0] : memref<2x24xbf16, #tpu.memory_space<vmem>>, vector<2x24xbf16>
    %c0_1 = arith.constant 0 : index
    %c0_2 = arith.constant 0 : index
    %c0_3 = arith.constant 0 : index
    %1 = vector.load %arg3[%c0_1, %c0_2, %c0_3] : memref<1x24x1024xbf16, #tpu.memory_space<vmem>>, vector<1x24x1024xbf16>
    %2 = vector.shape_cast %1 : vector<1x24x1024xbf16> to vector<24x1024xbf16>
    %cst = arith.constant dense<0.000000e+00> : vector<2x1024xf32>
    %3 = tpu.matmul %0, %2, %cst {dimension_numbers = #tpu.dot_dimension_numbers<[1], [0], [0], [1], [0, 0, 1, 1], [], []>} : vector<2x24xbf16>, vector<24x1024xbf16>, vector<2x1024xf32> -> vector<2x1024xf32>
    %c0_4 = arith.constant 0 : index
    %c0_5 = arith.constant 0 : index
    %c0_6 = arith.constant 0 : index
    %4 = vector.load %arg4[%c0_4, %c0_5, %c0_6] : memref<1x1x1024xf32, #tpu.memory_space<vmem>>, vector<1x1x1024xf32>
    %5 = vector.shape_cast %4 : vector<1x1x1024xf32> to vector<1x1024xf32>
    %6 = vector.broadcast %5 : vector<1x1024xf32> to vector<2x1024xf32>
    %7 = arith.addf %3, %6 : vector<2x1024xf32>
    %cst_7 = arith.constant 0.000000e+00 : f32
    %8 = vector.broadcast %cst_7 : f32 to vector<2x1024xf32>
    %9 = arith.maximumf %7, %8 : vector<2x1024xf32>
    %10 = arith.truncf %9 : vector<2x1024xf32> to vector<2x1024xbf16>
    %c0_8 = arith.constant 0 : index
    %c0_9 = arith.constant 0 : index
    %c0_10 = arith.constant 0 : index
    %11 = vector.load %arg5[%c0_8, %c0_9, %c0_10] : memref<1x1024x1024xbf16, #tpu.memory_space<vmem>>, vector<1x1024x1024xbf16>
    %12 = vector.shape_cast %11 : vector<1x1024x1024xbf16> to vector<1024x1024xbf16>
    %cst_11 = arith.constant dense<0.000000e+00> : vector<2x1024xf32>
    %13 = tpu.matmul %10, %12, %cst_11 {dimension_numbers = #tpu.dot_dimension_numbers<[1], [0], [0], [1], [0, 0, 1, 1], [], []>} : vector<2x1024xbf16>, vector<1024x1024xbf16>, vector<2x1024xf32> -> vector<2x1024xf32>
    %c0_12 = arith.constant 0 : index
    %c0_13 = arith.constant 0 : index
    %c0_14 = arith.constant 0 : index
    %14 = vector.load %arg6[%c0_12, %c0_13, %c0_14] : memref<1x1x1024xf32, #tpu.memory_space<vmem>>, vector<1x1x1024xf32>
    %15 = vector.shape_cast %14 : vector<1x1x1024xf32> to vector<1x1024xf32>
    %16 = vector.broadcast %15 : vector<1x1024xf32> to vector<2x1024xf32>
    %17 = arith.addf %13, %16 : vector<2x1024xf32>
    %cst_15 = arith.constant 0.000000e+00 : f32
    %18 = vector.broadcast %cst_15 : f32 to vector<2x1024xf32>
    %19 = arith.maximumf %17, %18 : vector<2x1024xf32>
    %c0_16 = arith.constant 0 : index
    %c0_17 = arith.constant 0 : index
    %c0_18 = arith.constant 0 : index
    %20 = vector.load %arg7[%c0_16, %c0_17, %c0_18] : memref<1x1x1024xbf16, #tpu.memory_space<vmem>>, vector<1x1x1024xbf16>
    %21 = vector.shape_cast %20 : vector<1x1x1024xbf16> to vector<1x1024xbf16>
    %22 = arith.extf %21 : vector<1x1024xbf16> to vector<1x1024xf32>
    %23 = vector.broadcast %22 : vector<1x1024xf32> to vector<2x1024xf32>
    %24 = arith.mulf %19, %23 : vector<2x1024xf32>
    %cst_19 = arith.constant dense<0.000000e+00> : vector<2xf32>
    %25 = vector.multi_reduction <add>, %24, %cst_19 [1] : vector<2x1024xf32> to vector<2xf32>
    %26 = vector.shape_cast %25 : vector<2xf32> to vector<2x1xf32>
    %c0_20 = arith.constant 0 : index
    %c0_21 = arith.constant 0 : index
    %c0_22 = arith.constant 0 : index
    %27 = vector.load %arg8[%c0_20, %c0_21, %c0_22] : memref<1x1x1xf32, #tpu.memory_space<vmem>>, vector<1x1x1xf32>
    %28 = vector.shape_cast %27 : vector<1x1x1xf32> to vector<1x1xf32>
    %29 = vector.broadcast %28 : vector<1x1xf32> to vector<2x1xf32>
    %30 = arith.addf %26, %29 : vector<2x1xf32>
    %cst_23 = arith.constant 0.000000e+00 : f32
    %31 = vector.broadcast %cst_23 : f32 to vector<2x1xf32>
    %32 = arith.maximumf %30, %31 : vector<2x1xf32>
    %c0_24 = arith.constant 0 : index
    %c0_25 = arith.constant 0 : index
    %c0_26 = arith.constant 0 : index
    %33 = vector.load %arg9[%c0_24, %c0_25, %c0_26] : memref<1x2x1xf32, #tpu.memory_space<vmem>>, vector<1x2x1xf32>
    %34 = vector.shape_cast %33 : vector<1x2x1xf32> to vector<2x1xf32>
    %35 = vector.shape_cast %32 : vector<2x1xf32> to vector<1x2x1xf32>
    tpu.vector_store %arg9[%c0_24, %c0_25, %c0_26], %35 {strides = array<i32>} : memref<1x2x1xf32, #tpu.memory_space<vmem>>, vector<1x2x1xf32>,
    return
  }
  func.func @transform_0(%arg0: i32, %arg1: i32) -> (i32, i32) {
    %c0_i32 = arith.constant 0 : i32
    %c0_i32_0 = arith.constant 0 : i32
    return %arg1, %c0_i32 : i32, i32
  }
  func.func @transform_1(%arg0: i32, %arg1: i32) -> (i32, i32, i32) {
    %c0_i32 = arith.constant 0 : i32
    %c0_i32_0 = arith.constant 0 : i32
    %c0_i32_1 = arith.constant 0 : i32
    return %arg0, %c0_i32, %c0_i32_0 : i32, i32, i32
  }
  func.func @transform_2(%arg0: i32, %arg1: i32) -> (i32, i32, i32) {
    %c0_i32 = arith.constant 0 : i32
    %c0_i32_0 = arith.constant 0 : i32
    %c0_i32_1 = arith.constant 0 : i32
    return %arg0, %c0_i32, %c0_i32_0 : i32, i32, i32
  }
  func.func @transform_3(%arg0: i32, %arg1: i32) -> (i32, i32, i32) {
    %c0_i32 = arith.constant 0 : i32
    %c0_i32_0 = arith.constant 0 : i32
    %c0_i32_1 = arith.constant 0 : i32
    return %arg0, %c0_i32, %c0_i32_0 : i32, i32, i32
  }
  func.func @transform_4(%arg0: i32, %arg1: i32) -> (i32, i32, i32) {
    %c0_i32 = arith.constant 0 : i32
    %c0_i32_0 = arith.constant 0 : i32
    %c0_i32_1 = arith.constant 0 : i32
    return %arg0, %c0_i32, %c0_i32_0 : i32, i32, i32
  }
  func.func @transform_5(%arg0: i32, %arg1: i32) -> (i32, i32, i32) {
    %c0_i32 = arith.constant 0 : i32
    %c0_i32_0 = arith.constant 0 : i32
    %c0_i32_1 = arith.constant 0 : i32
    return %arg0, %c0_i32, %c0_i32_0 : i32, i32, i32
  }
  func.func @transform_6(%arg0: i32, %arg1: i32) -> (i32, i32, i32) {
    %c0_i32 = arith.constant 0 : i32
    %c0_i32_0 = arith.constant 0 : i32
    %c0_i32_1 = arith.constant 0 : i32
    return %arg0, %c0_i32, %c0_i32_0 : i32, i32, i32
  }
  func.func @transform_7(%arg0: i32, %arg1: i32) -> (i32, i32, i32) {
    %c0_i32 = arith.constant 0 : i32
    %c0_i32_0 = arith.constant 0 : i32
    return %arg0, %arg1, %c0_i32 : i32, i32, i32
  }
}

</mosaic_0001>

<bundles_post_ra>
// kernel: tpu_custom_call.1
= control target key start
LH: loop header
LB: loop body
LE: loop exit
PB: predicated region body
PF: predicated region fallthrough
CT: control target
= control target key end

     0   :  { %s6849_s0 = inlined_call_operand.hbm [shape: bf16[2,24], index: 0, kind: input, shape index: {}]   ;;  %s6850_s1 = inlined_call_operand.hbm [shape: bf16[2,24,1024], index: 1, kind: input, shape index: {}]   ;;  %s6851_s2 = inlined_call_operand.hbm [shape: f32[2,1,1024], index: 2, kind: input, shape index: {}]   ;;  %s6852_s3 = inlined_call_operand.hbm [shape: bf16[2,1024,1024], index: 3, kind: input, shape index: {}]   ;;  %s6853_s4 = inlined_call_operand.hbm [shape: f32[2,1,1024], index: 4, kind: input, shape index: {}]   ;;  %s6854_s5 = inlined_call_operand.vmem [shape: bf16[2,1,1024], index: 5, kind: input, shape index: {}]   ;;  %s6855_s6 = inlined_call_operand.vmem [shape: f32[2,1,1], index: 6, kind: input, shape index: {}]   ;;  %s6856_s7 = inlined_call_operand.vmem [shape: f32[2,2,1], index: 7, kind: output, shape index: {}]  }
   0x1   :  { %6871 = sst [smem:[#allocation17_spill]] %s6850_s1 }
   0x2   :  { %6872 = sst [smem:[#allocation18_spill]] %s6852_s3 }
   0x3   :  { %6873 = sst [smem:[#allocation19_spill]] %s6856_s7 }
   0x4   :  { %12 = vsyncpa [#allocation3], 0 }
   0x5   :  { %13 = vsyncpa [#allocation5], 0 }
   0x6   :  { %15 = vsyncpa [#allocation5 + $0x1], 0 }
   0x7   :  { %16 = vsyncpa [#allocation8], 0 }
   0x8   :  { %18 = vsyncpa [#allocation8 + $0x1], 0  ;;  %s5848_s24 = smov 0   ;;  %s5850_s25 = smov 0  }
   0x9   :  { %s5852_s26 = smov 0   ;;  %s5854_s27 = smov 0  }
   0xa   :  { %s5856_s28 = smov 0   ;;  %s5858_s29 = smov 0  }
   0xb LB: > { %6874 = sst [smem:[#allocation13_spill]] %s5786_s26  ;;  %s36_s30 = sadd.s32 1, %s5794_s28  ;;  %s5798_s29 = sphi %s5858_s29, %s24_s29   ;;  %s5794_s28 = sphi %s5856_s28, %s6899_s28   ;;  %s5790_s27 = sphi %s5854_s27, %s6898_s27   ;;  %s5786_s26 = sphi %s5852_s26, %s6897_s26   ;;  %s5782_s25 = sphi %s5850_s25, %s6901_s25   ;;  %s5778_s24 = sphi %s5848_s24, %s6900_s24  }
   0xc   : > { %6875 = sst [smem:[#allocation14_spill]] %s5794_s28  ;;  %s69_s8 = sadd.s32 1, %s5786_s26 }
   0xd   : > { %p38_p0 = scmp.ge.s32.totalorder %s36_s30, 2  ;;  %p76_p1 = scmp.ne.s32.totalorder %s5786_s26, %s5782_s25 }
   0xe   : > { %p77_p2 = scmp.eq.s32.totalorder %s5798_s29, 0  ;;  %p5529_p4 = scmp.lt.s32.totalorder %s5798_s29, 2 }
   0xf   : > { %s6903_s30 = smov (%p38_p0, %s36_s30), 0  ;;  %s6857_s10 = sand.u32 1, %s5798_s29  }
  0x10   : > { %6876 = sst [smem:[#allocation15_spill]] %s6903_s30  ;;  %p78_p3 = por %p77_p2, %p76_p1 }
  0x11   : > { %s66_s9 = ssub.s32 %s5794_s28, %s6903_s30  ;;  %s5890_s11 = sand.u32 1, %s5786_s26  }
  0x12   : > { %p67_p5 = scmp.eq.s32.totalorder %s66_s9, 0  ;;  %s5497_s12 = smul.u32 1536, %s5794_s28 }
  0x13   : > { %s5496_s14 = smul.u32 96, %s5890_s11  ;;  %s6878_s1 = sld [smem:[#allocation17_spill]] }
  0x14   : > { %s5894_s13 = scalar_select %p67_p5, %s5786_s26, %s69_s8  }
  0x15   : > { %p5902_p6 = pnand %p5529_p4, %p78_p3  ;;  %s281_s19 = scalar_lea.vmem [#allocation4], %s5496_s14 }
  0x16   : > { %6877 = sst [smem:[#allocation16_spill]] %s5894_s13  ;;  %s288_s20 = sshll.u32 %s281_s19, 4  ;;  %s5906_s20 = int_to_ptr.vmem [resolvable:$true] %s288_s20 }
  0x17   : > { %s6879_s18 = scalar_select %p5902_p6, 1, 0 }
  0x18   : > { %s5910_s21 = scalar_lea.sflag [#allocation5], %s6857_s10  ;;  %p5916_p8 = pneg %p5902_p6 }
  0x19   : > { %s5900_s17 = scalar_lea.hbm %s6878_s1, %s5497_s12  ;;  %s5597_s12 = scalar_lea.hbm %s6878_s1, 3072 }
  0x1a   : > { %s5592_s22 = scalar_lea.hbm %s5900_s17, 1536  ;;  %p5598_p11 = scmp.lt.u32.totalorder %s5900_s17, %s6878_s1 }
  0x1b   : > { %p5593_p7 = scmp.ne.s32.totalorder %s5900_s17, %s5592_s22  ;;  %p5599_p12 = scmp.lt.u32.totalorder %s5597_s12, %s5592_s22 }
  0x1c   : > { %s6880_s23 = scalar_select %p5916_p8, 1, 0 }
  0x1d   : > { %p5595_p9 = pnand %p5916_p8, %p5593_p7  ;;  %p5600_p13 = por %p5599_p12, %p5598_p11 }
  0x1e   : > { %p5601_p0 = scmp.lt.u32.totalorder %s5592_s22, %s5900_s17 }
  0x1f   : > { %p5596_p10 = pneg %p5595_p9 }
  0x20   : > { %p5602_p1 = por %p5601_p0, %p5600_p13 }
  0x22   : > { %p5603_p2 = pnand %p5602_p1, %p5596_p10 }
  0x24   : > { %5606 = shalt.err (!%p5603_p2)
}
  0x25   : > { %s5607_s16 = scalar_lea.vmem %s5906_s20, 1536  ;;  %s5800_s19 = smov [#allocation4]  }
  0x26   : > { %p5608_p3 = scmp.ne.s32.totalorder %s5906_s20, %s5607_s16  ;;  %s5612_s8 = sshll.u32 %s5800_s19, 4  ;;  %s5613_s8 = int_to_ptr.vmem [resolvable:$false] %s5612_s8 }
  0x27   : > { %s5614_s9 = scalar_lea.vmem %s5613_s8, 3072  ;;  %p5615_p7 = scmp.lt.s32.totalorder %s5906_s20, %s5613_s8 }
  0x28   : > { %p5610_p4 = pnand %p5608_p3, %p5916_p8  ;;  %p5616_p9 = scmp.lt.s32.totalorder %s5614_s9, %s5607_s16 }
  0x2a   : > { %p5611_p5 = pneg %p5610_p4  ;;  %p5617_p11 = por %p5616_p9, %p5615_p7 }
  0x2c   : > { %p5618_p12 = pnand %p5617_p11, %p5611_p5 }
  0x2e   : > { %5621 = shalt.err (!%p5618_p12)
}
  0x2f   : > { %s5801_s22 = smov 512   ;;  %s5802_s12 = smov 32  }
  0x30   : > { %5518 = dma.hbm_to_vmem [thread:$0]  (!%p5902_p6), %s5900_s17, 1536, %s5906_s20, %s5910_s21, %s5801_s22, %s5801_s22, %s5802_s12  }
  0x31   : > { %s4885_s14 = sshll.u32 %s5890_s11, 12  ;;  %s5438_s15 = sshll.u32 %s5794_s28, 16 }
  0x32   : > { %s6881_s3 = sld [smem:[#allocation18_spill]]  ;;  %s321_s9 = scalar_lea.vmem [#allocation7], %s4885_s14 }
  0x33   : > { %s328_s10 = sshll.u32 %s321_s9, 4  ;;  %s6882_s1 = sand.u32 1, %s5798_s29   ;;  %s5950_s10 = int_to_ptr.vmem [resolvable:$true] %s328_s10 }
  0x34   : > { %s5954_s30 = scalar_lea.sflag [#allocation8], %s6882_s1 }
  0x38   : > { %s5948_s8 = scalar_lea.hbm %s6881_s3, %s5438_s15  ;;  %s5627_s15 = scalar_lea.hbm %s6881_s3, 131072 }
  0x39   : > { %s5622_s13 = scalar_lea.hbm %s5948_s8, 65536  ;;  %p5628_p1 = scmp.lt.u32.totalorder %s5948_s8, %s6881_s3 }
  0x3a   : > { %p5623_p10 = scmp.ne.s32.totalorder %s5948_s8, %s5622_s13  ;;  %p5629_p2 = scmp.lt.u32.totalorder %s5627_s15, %s5622_s13 }
  0x3b   : > { %p5631_p4 = scmp.lt.u32.totalorder %s5622_s13, %s5948_s8 }
  0x3c   : > { %p5625_p13 = pnand %p5623_p10, %p5916_p8  ;;  %p5630_p3 = por %p5629_p2, %p5628_p1 }
  0x3e   : > { %p5626_p0 = pneg %p5625_p13  ;;  %p5632_p5 = por %p5631_p4, %p5630_p3 }
  0x40   : > { %p5633_p7 = pnand %p5632_p5, %p5626_p0 }
  0x42   : > { %5636 = shalt.err (!%p5633_p7)
}
  0x43   : > { %s5637_s1 = scalar_lea.vmem %s5950_s10, 65536  ;;  %s5803_s14 = smov [#allocation7]  }
  0x44   : > { %p5638_p9 = scmp.ne.s32.totalorder %s5950_s10, %s5637_s1  ;;  %s5642_s9 = sshll.u32 %s5803_s14, 4  ;;  %s5643_s9 = int_to_ptr.vmem [resolvable:$false] %s5642_s9 }
  0x45   : > { %s5644_s17 = scalar_lea.vmem %s5643_s9, 131072  ;;  %p5645_p10 = scmp.lt.s32.totalorder %s5950_s10, %s5643_s9 }
  0x46   : > { %p5640_p11 = pnand %p5638_p9, %p5916_p8  ;;  %p5646_p13 = scmp.lt.s32.totalorder %s5644_s17, %s5637_s1 }
  0x48   : > { %p5641_p12 = pneg %p5640_p11  ;;  %p5647_p1 = por %p5646_p13, %p5645_p10 }
  0x4a   : > { %p5648_p2 = pnand %p5647_p1, %p5641_p12 }
  0x4c   : > { %5651 = shalt.err (!%p5648_p2)
}
  0x4d   : > { %5524 = dma.hbm_to_vmem [thread:$0]  (!%p5902_p6), %s5948_s8, 65536, %s5950_s10, %s5954_s30, %s5801_s22, %s5801_s22, %s5802_s12  }
  0x4e   : > { %s6859_s13 = sadd.s32 4294967295, %s5798_s29   ;;  %p82_p0 = scmp.ne.s32.totalorder %s5782_s25, %s5778_s24 }
  0x4f   : > { %p5986_p3 = scmp.eq.s32.totalorder %s6859_s13, 0  ;;  %p4878_p4 = scmp.ge.s32.totalorder %s5798_s29, 1 }
  0x50   : > { %p251_p5 = scmp.lt.s32.totalorder %s5798_s29, 3  ;;  %s5804_s24 = smov [#allocation2]  }
  0x51   : > { %s6883_s20 = scalar_select %p5986_p3, 1, 0 }
  0x52   : > { %p5994_p7 = por %p5986_p3, %p82_p0  ;;  %p5998_p9 = pnand %p4878_p4, %p251_p5 }
  0x53   : > { %s266_s10 = sshll.u32 %s5804_s24, 4  ;;  %s6860_s22 = sshll.u32 %s5890_s11, 3  ;;  %s267_s10 = int_to_ptr.vmem [resolvable:$true] %s266_s10 }
  0x54   : > { %s6884_s15 = scalar_select %p5994_p7, 1, 0 }
  0x55   : > { %s6885_s16 = scalar_select %p5998_p9, 1, 0 }
  0x56   : > { %p5511_p11 = pneg %p5998_p9  ;;  %s5437_s12 = sshll.u32 %s5794_s28, 7 }
  0x57   : > { %s302_s8 = scalar_lea.vmem [#allocation6], %s6860_s22  ;;  %s6017_s17 = scalar_lea.hbm %s6851_s2, %s5437_s12 }
  0x58   : > { %s310_s19 = sshll.u32 %s302_s8, 4  ;;  %p6010_p12 = pnand %p5511_p11, %p5986_p3  ;;  %s6019_s19 = int_to_ptr.vmem [resolvable:$true] %s310_s19 }
  0x59   : > { %s6024_s3 = scalar_lea.hbm %s6853_s4, %s5437_s12  ;;  %s5652_s28 = scalar_lea.hbm %s6849_s0, 16 }
  0x5a   : > { %p5653_p10 = scmp.ne.s32.totalorder %s6849_s0, %s5652_s28  ;;  %p5654_p13 = pneg %p6010_p12 }
  0x5b   : > { %p5659_p0 = scmp.lt.u32.totalorder %s5652_s28, %s6849_s0 }
  0x5c   : > { %p5655_p1 = pnand %p5654_p13, %p5653_p10 }
  0x5e   : > { %p5656_p2 = pneg %p5655_p1 }
  0x60   : > { %p5661_p4 = pnand %p5659_p0, %p5656_p2 }
  0x62   : > { %5664 = shalt.err (!%p5661_p4)
}
  0x63   : > { %s5665_s13 = scalar_lea.vmem %s267_s10, 16  ;;  %s5672_s22 = scalar_lea.vmem %s267_s10, 32 }
  0x64   : > { %p5666_p5 = scmp.ne.s32.totalorder %s267_s10, %s5665_s13  ;;  %p5673_p3 = scmp.lt.s32.totalorder %s267_s10, %s267_s10 }
  0x65   : > { %p5674_p9 = scmp.lt.s32.totalorder %s5672_s22, %s5665_s13 }
  0x66   : > { %p5668_p11 = pnand %p5666_p5, %p5654_p13 }
  0x67   : > { %p5675_p6 = por %p5674_p9, %p5673_p3 }
  0x68   : > { %p5669_p7 = pneg %p5668_p11 }
  0x6a   : > { %p5676_p8 = pnand %p5675_p6, %p5669_p7 }
  0x6c   : > { %5679 = shalt.err (!%p5676_p8)
}
  0x6d   : > { %5514 = dma.hbm_to_vmem [thread:$0]  (!%p6010_p12), %s6849_s0, 16, %s267_s10, [#allocation3]  }
  0x6e   : > { %s5680_s28 = scalar_lea.hbm %s6017_s17, 128  ;;  %p6887_p13 = scmp.ne.s32.totalorder %s6880_s23, 0 }
  0x6f   : > { %p5681_p10 = scmp.ne.s32.totalorder %s6017_s17, %s5680_s28  ;;  %s5685_s8 = scalar_lea.hbm %s6851_s2, 256 }
  0x70   : > { %p5686_p6 = scmp.lt.u32.totalorder %s6017_s17, %s6851_s2  ;;  %p5687_p8 = scmp.lt.u32.totalorder %s5685_s8, %s5680_s28 }
  0x71   : > { %p5683_p1 = pnand %p5681_p10, %p6887_p13  ;;  %p5689_p7 = scmp.lt.u32.totalorder %s5680_s28, %s6017_s17 }
  0x72   : > { %p5688_p3 = por %p5687_p8, %p5686_p6 }
  0x73   : > { %p5684_p2 = pneg %p5683_p1 }
  0x74   : > { %p5690_p9 = por %p5689_p7, %p5688_p3 }
  0x76   : > { %p5691_p0 = pnand %p5690_p9, %p5684_p2 }
  0x78   : > { %5694 = shalt.err (!%p5691_p0)
}
  0x79   : > { %s5695_s10 = scalar_lea.vmem %s6019_s19, 128  ;;  %s5805_s9 = smov [#allocation6]  }
  0x7a   : > { %p5696_p12 = scmp.ne.s32.totalorder %s6019_s19, %s5695_s10  ;;  %s5700_s13 = sshll.u32 %s5805_s9, 4  ;;  %s5701_s13 = int_to_ptr.vmem [resolvable:$false] %s5700_s13 }
  0x7b   : > { %s5702_s22 = scalar_lea.vmem %s5701_s13, 256  ;;  %p5703_p11 = scmp.lt.s32.totalorder %s6019_s19, %s5701_s13 }
  0x7c   : > { %p5698_p4 = pnand %p5696_p12, %p6887_p13  ;;  %p5704_p10 = scmp.lt.s32.totalorder %s5702_s22, %s5695_s10 }
  0x7e   : > { %p5699_p5 = pneg %p5698_p4  ;;  %p5705_p1 = por %p5704_p10, %p5703_p11 }
  0x80   : > { %p5706_p6 = pnand %p5705_p1, %p5699_p5 }
  0x82   : > { %5709 = shalt.err (!%p5706_p6)
}
  0x83   : > { %p6888_p2 = scmp.ne.s32.totalorder %s6879_s18, 0  ;;  %s6889_s7 = sshll.u32 %s5890_s11, 3 }
  0x84   : > { %s342_s26 = scalar_lea.vmem [#allocation9], %s6889_s7  ;;  %s5710_s12 = scalar_lea.hbm %s6024_s3, 128 }
  0x85   : > { %5521 = dma.hbm_to_vmem [thread:$0]  (!%p6888_p2), %s6017_s17, 128, %s6019_s19, %s5910_s21  }
  0x86   : > { %s350_s28 = sshll.u32 %s342_s26, 4  ;;  %p5711_p8 = scmp.ne.s32.totalorder %s6024_s3, %s5710_s12  ;;  %s351_s28 = int_to_ptr.vmem [resolvable:$true] %s350_s28 }
  0x87   : > { %s5715_s14 = scalar_lea.hbm %s6853_s4, 256  ;;  %p5716_p9 = scmp.lt.u32.totalorder %s6024_s3, %s6853_s4 }
  0x88   : > { %p5713_p3 = pnand %p5711_p8, %p6887_p13  ;;  %p5717_p0 = scmp.lt.u32.totalorder %s5715_s14, %s5710_s12 }
  0x89   : > { %p5719_p4 = scmp.lt.u32.totalorder %s5710_s12, %s6024_s3 }
  0x8a   : > { %p5714_p7 = pneg %p5713_p3  ;;  %p5718_p12 = por %p5717_p0, %p5716_p9 }
  0x8c   : > { %p5720_p5 = por %p5719_p4, %p5718_p12 }
  0x8e   : > { %p5721_p11 = pnand %p5720_p5, %p5714_p7 }
  0x90   : > { %5724 = shalt.err (!%p5721_p11)
}
  0x91   : > { %s5725_s11 = scalar_lea.vmem %s351_s28, 128  ;;  %s5806_s21 = smov [#allocation9]  }
  0x92   : > { %p5726_p10 = scmp.ne.s32.totalorder %s351_s28, %s5725_s11  ;;  %s5730_s19 = sshll.u32 %s5806_s21, 4  ;;  %s5731_s19 = int_to_ptr.vmem [resolvable:$false] %s5730_s19 }
  0x93   : > { %s5732_s17 = scalar_lea.vmem %s5731_s19, 256  ;;  %p5733_p8 = scmp.lt.s32.totalorder %s351_s28, %s5731_s19 }
  0x94   : > { %p5728_p1 = pnand %p5726_p10, %p6887_p13  ;;  %p5734_p3 = scmp.lt.s32.totalorder %s5732_s17, %s5725_s11 }
  0x96   : > { %p5729_p6 = pneg %p5728_p1  ;;  %p5735_p2 = por %p5734_p3, %p5733_p8 }
  0x98   : > { %p5736_p0 = pnand %p5735_p2, %p5729_p6 }
  0x9a   : > { %5739 = shalt.err (!%p5736_p0)
}
  0x9b   : > { %p6890_p9 = scmp.ne.s32.totalorder %s6879_s18, 0  ;;  %p6891_p7 = scmp.ne.s32.totalorder %s6885_s16, 0 }
  0x9c   : > { %p6892_p13 = scmp.ne.s32.totalorder (!%p6891_p7), %s6883_s20, 0 }
  0x9d   : > { %5527 = dma.hbm_to_vmem [thread:$0]  (!%p6890_p9), %s6024_s3, 128, %s351_s28, %s5954_s30  }
  0x9e   : > { %372 = sbr.rel (%p6891_p7) target bundleno = 1229 (0x4cd), region = 48 }
  0xa5   : > { %5765 = dma.done.wait (%p6892_p13), [#allocation3], 16  }
  0xa6   : > { %5767 = vsyncadd (%p6892_p13), [#allocation3], 4294967280  ;;  %s6893_s23 = sadd.s32 4294967295, %s5798_s29   ;;  %s6093_s13 = sand.u32 1, %s5782_s25  }
  0xa7   : > { %s378_s9 = sand.u32 1, %s6893_s23   ;;  %s5498_s18 = smul.u32 96, %s6093_s13 }
  0xa8   : > { %s379_s22 = scalar_lea.sflag [#allocation5], %s378_s9  ;;  %p6894_p2 = scmp.ne.s32.totalorder %s6884_s15, 0 }
  0xa9   : > { %s6096_s3 = scalar_lea.vmem [#allocation4], %s5498_s18 }
  0xaa   : > { %5769 = dma.done.wait (%p6894_p2), %s379_s22, 1664  }
  0xab   : > { %5771 = vsyncadd (%p6894_p2), %s379_s22, 4294965632  ;;  %s4893_s30 = sshll.u32 %s6093_s13, 3  ;;  %s4894_s20 = sshll.u32 %s6093_s13, 12 }
  0xac   : > { %s6106_s16 = scalar_lea.vmem [#allocation6], %s4893_s30  ;;  %s397_s7 = scalar_lea.sflag [#allocation8], %s378_s9 }
  0xad   : > { %s6108_s26 = scalar_lea.vmem [#allocation7], %s4894_s20 }
  0xae   : > { %5773 = dma.done.wait (%p6894_p2), %s397_s7, 65664  }
  0xaf   : > { %5775 = vsyncadd (%p6894_p2), %s397_s7, 4294901632  ;;  %v5807_v0 = vmov 0   ;;  %v480_v1 = vld [vmem:[%s6096_s3] sm:$0xff]  ;;  %v481_v8 = vld [vmem:[%s6096_s3 + $0x8] sm:$0xff]  ;;  %vm598_vm0 = vcmask 1043456   ;;  %vm594_vm1 = vcmask 195584  }
  0xb0   : > { %655 = vmatprep.mubr.bf16.mxu0 %v5807_v0  ;;  %696 = vmatprep.mubr.bf16.mxu1 %v5807_v0  ;;  %v484_v2 = vld [vmem:[%s6096_s3 + $0x20] sm:$0xff]  ;;  %v485_v9 = vld [vmem:[%s6096_s3 + $0x28] sm:$0xff]  ;;  %v482_v13 = vld [vmem:[%s6096_s3 + $0x10] sm:$0xff]  ;;  %p464_p12 = scmp.lt.s32.totalorder %s5790_s27, 1  ;;  %s409_s8 = scalar_lea.vmem [#allocation9], %s4893_s30  ;;  %vm4666_vm2 = vcmask 1041408  }
  0xb1   : > { %v488_v3 = vld [vmem:[%s6096_s3 + $0x40] sm:$0xff]  ;;  %v4899_v4 = vcombine.high %v480_v1, %v484_v2  ;;  %v4898_v5 = vcombine.low %v480_v1, %v484_v2  ;;  %v4901_v10 = vcombine.high %v481_v8, %v485_v9  ;;  %v4900_v11 = vcombine.low %v481_v8, %v485_v9  ;;  %v489_v12 = vld [vmem:[%s6096_s3 + $0x48] sm:$0xff]  ;;  %v486_v14 = vld [vmem:[%s6096_s3 + $0x30] sm:$0xff]  ;;  %s6895_s17 = sld [smem:[#allocation19_spill]] }
  0xb2   : > { %v4907_v6 = vcombine.high %v488_v3, %v488_v3  ;;  %v4906_v7 = vcombine.low %v488_v3, %v488_v3  ;;  %v4909_v15 = vcombine.high %v489_v12, %v489_v12  ;;  %v4908_v16 = vcombine.low %v489_v12, %v489_v12  ;;  %v483_v17 = vld [vmem:[%s6096_s3 + $0x18] sm:$0xff]  ;;  %v490_v22 = vld [vmem:[%s6096_s3 + $0x50] sm:$0xff]  ;;  %s6905_s27 = smov (!%p464_p12, %s5790_s27), 1 }
  0xb3   : > { %623 = vmatprep.subr.bf16.mxu0 %v4899_v4  ;;  %v487_v18 = vld [vmem:[%s6096_s3 + $0x38] sm:$0xff]  ;;  %664 = vmatprep.subr.bf16.mxu1 %v4901_v10  ;;  %v4903_v20 = vcombine.high %v482_v13, %v486_v14  ;;  %v4902_v25 = vcombine.low %v482_v13, %v486_v14  ;;  %v4911_v27 = vcombine.high %v490_v22, %v490_v22  ;;  %v803_v30 = vld [vmem:[%s6108_s26] sm:$0xff]  ;;  %s4896_s15 = sshll.u32 %s6905_s27, 3  ;;  %s470_s10 = scalar_lea.vmem %s6855_s6, %s6905_s27  ;;  %vm4693_vm3 = vcmask 1024  }
  0xb4   : > { %624 = vmatpush1.bf16.msra.mxu0 %v4898_v5  ;;  %v600_v19 = vsel %vm598_vm0, %v4906_v7, 0  ;;  %665 = vmatpush1.bf16.msra.mxu1 %v4900_v11  ;;  %v606_v21 = vsel %vm598_vm0, %v4908_v16, 0  ;;  %v4905_v23 = vcombine.high %v483_v17, %v487_v18  ;;  %v479_v24 = vld [vmem:[#allocation2] sm:$0x1]  ;;  %v4910_v28 = vcombine.low %v490_v22, %v490_v22  ;;  %v807_v31 = vld [vmem:[%s6108_s26 + $0x20] sm:$0xff]  ;;  %s467_s24 = scalar_lea.vmem %s6854_s5, %s4896_s15  ;;  %s4897_s11 = sshll.u32 %s6905_s27, 1 }
  0xb5   : > { %4914 = vmatprep.subr.msk.bf16.mxu0 %vm598_vm0, %v4907_v6  ;;  %4916 = vmatprep.subr.msk.bf16.mxu1 %vm598_vm0, %v4909_v15  ;;  %v491_v26 = vld [vmem:[%s6096_s3 + $0x58] sm:$0xff]  ;;  %v4904_v29 = vcombine.low %v483_v17, %v487_v18  ;;  %v4923_v37 = vcombine.high %v803_v30, %v807_v31  ;;  %v811_v38 = vld [vmem:[%s6108_s26 + $0x40] sm:$0xff]  ;;  %v4922_v42 = vcombine.low %v803_v30, %v807_v31 }
  0xb6   : > { %v4913_v32 = vcombine.high %v491_v26, %v491_v26  ;;  %v4912_v33 = vcombine.low %v491_v26, %v491_v26  ;;  %v804_v34 = vld [vmem:[%s6108_s26 + $0x8] sm:$0xff]  ;;  %v612_v36 = vsel %vm598_vm0, %v4910_v28, 0  ;;  %v815_v39 = vld [vmem:[%s6108_s26 + $0x60] sm:$0xff] }
  0xb7   : > { %v808_v35 = vld [vmem:[%s6108_s26 + $0x28] sm:$0xff]  ;;  %v4931_v45 = vcombine.high %v811_v38, %v815_v39  ;;  %v819_v47 = vld [vmem:[%s6108_s26 + $0x80] sm:$0xff]  ;;  %v4930_v50 = vcombine.low %v811_v38, %v815_v39  ;;  %s477_s23 = scalar_lea.vmem %s6895_s17, %s4897_s11 }
  0xb8   : > { %626 = vmatpush1.bf16.msra.mxu0 %v600_v19  ;;  %667 = vmatpush1.bf16.msra.mxu1 %v606_v21  ;;  %v618_v40 = vsel %vm598_vm0, %v4912_v33, 0  ;;  %v4925_v41 = vcombine.high %v804_v34, %v808_v35  ;;  %v812_v43 = vld [vmem:[%s6108_s26 + $0x48] sm:$0xff]  ;;  %v4924_v46 = vcombine.low %v804_v34, %v808_v35  ;;  %v823_v48 = vld [vmem:[%s6108_s26 + $0xa0] sm:$0xff] }
  0xb9   : > { %705 = vmatprep.subr.bf16.mxu0 %v4903_v20  ;;  %746 = vmatprep.subr.bf16.mxu1 %v4905_v23  ;;  %v816_v44 = vld [vmem:[%s6108_s26 + $0x68] sm:$0xff]  ;;  %v4939_v53 = vcombine.high %v819_v47, %v823_v48  ;;  %v827_v55 = vld [vmem:[%s6108_s26 + $0xc0] sm:$0xff]  ;;  %v4938_v58 = vcombine.low %v819_v47, %v823_v48 }
  0xba   : > { %v4933_v49 = vcombine.high %v812_v43, %v816_v44  ;;  %v820_v51 = vld [vmem:[%s6108_s26 + $0x88] sm:$0xff]  ;;  %v4932_v54 = vcombine.low %v812_v43, %v816_v44  ;;  %v831_v56 = vld [vmem:[%s6108_s26 + $0xe0] sm:$0xff] }
  0xbb   : > { %4915 = vmatmul.mubr.msk.bf16.vlgmr.msra.gmra.mrb[0].mxu0 %vm594_vm1, %v479_v24  ;;  %4917 = vmatmul.mubr.msk.bf16.vlgmr.msra.gmra.mrb[0].mxu1 %vm594_vm1, %v479_v24  ;;  %v824_v52 = vld [vmem:[%s6108_s26 + $0xa8] sm:$0xff]  ;;  %v4947_v61 = vcombine.high %v827_v55, %v831_v56  ;;  %v835_v63 = vld [vmem:[%s6108_s26 + $0x100] sm:$0xff]  ;;  %v4946_v2 = vcombine.low %v827_v55, %v831_v56 }
  0xbc   : > { %706 = vmatpush1.bf16.msra.mxu0 %v4902_v25  ;;  %737 = vmatprep.mubr.bf16.mxu0 %v5807_v0  ;;  %v4941_v57 = vcombine.high %v820_v51, %v824_v52  ;;  %v828_v59 = vld [vmem:[%s6108_s26 + $0xc8] sm:$0xff]  ;;  %v4940_v62 = vcombine.low %v820_v51, %v824_v52  ;;  %v843_v7 = vld [vmem:[%s6108_s26 + $0x140] sm:$0xff] }
  0xbd   : > { %4918 = vmatprep.subr.msk.bf16.mxu0 %vm598_vm0, %v4911_v27  ;;  %747 = vmatpush1.bf16.msra.mxu1 %v4904_v29  ;;  %v832_v60 = vld [vmem:[%s6108_s26 + $0xe8] sm:$0xff]  ;;  %v847_v8 = vld [vmem:[%s6108_s26 + $0x160] sm:$0xff] }
  0xbe   : > { %778 = vmatprep.mubr.bf16.mxu1 %v5807_v0  ;;  %4920 = vmatprep.subr.msk.bf16.mxu1 %vm598_vm0, %v4913_v32  ;;  %v839_v0 = vld [vmem:[%s6108_s26 + $0x120] sm:$0xff]  ;;  %v4949_v1 = vcombine.high %v828_v59, %v832_v60  ;;  %v836_v3 = vld [vmem:[%s6108_s26 + $0x108] sm:$0xff]  ;;  %v4948_v6 = vcombine.low %v828_v59, %v832_v60  ;;  %v4963_v13 = vcombine.high %v843_v7, %v847_v8 }
  0xbf   : > { %v840_v4 = vld [vmem:[%s6108_s26 + $0x128] sm:$0xff]  ;;  %v4955_v5 = vcombine.high %v835_v63, %v839_v0  ;;  %v4954_v10 = vcombine.low %v835_v63, %v839_v0  ;;  %v851_v15 = vld [vmem:[%s6108_s26 + $0x180] sm:$0xff]  ;;  %v4962_v18 = vcombine.low %v843_v7, %v847_v8 }
  0xc0   : > { %708 = vmatpush1.bf16.msra.mxu0 %v612_v36  ;;  %v4957_v9 = vcombine.high %v836_v3, %v840_v4  ;;  %v844_v11 = vld [vmem:[%s6108_s26 + $0x148] sm:$0xff]  ;;  %v4956_v14 = vcombine.low %v836_v3, %v840_v4  ;;  %v855_v16 = vld [vmem:[%s6108_s26 + $0x1a0] sm:$0xff] }
  0xc1   : > { %3917 = vmatprep.subr.bf16.mxu0 %v4923_v37  ;;  %749 = vmatpush1.bf16.msra.mxu1 %v618_v40  ;;  %v848_v12 = vld [vmem:[%s6108_s26 + $0x168] sm:$0xff]  ;;  %v4971_v21 = vcombine.high %v851_v15, %v855_v16  ;;  %v859_v23 = vld [vmem:[%s6108_s26 + $0x1c0] sm:$0xff]  ;;  %v4970_v26 = vcombine.low %v851_v15, %v855_v16 }
  0xc2   : > { %4081 = vmatprep.subr.bf16.mxu1 %v4925_v41  ;;  %v4965_v17 = vcombine.high %v844_v11, %v848_v12  ;;  %v852_v19 = vld [vmem:[%s6108_s26 + $0x188] sm:$0xff]  ;;  %v4964_v22 = vcombine.low %v844_v11, %v848_v12  ;;  %v867_v31 = vld [vmem:[%s6108_s26 + $0x200] sm:$0xff] }
  0xc3   : > { %4919 = vmatmul.mubr.msk.bf16.vlgmr.msra.gmra.mrb[4].mxu0 %vm594_vm1, %v479_v24  ;;  %v856_v20 = vld [vmem:[%s6108_s26 + $0x1a8] sm:$0xff]  ;;  %v871_v32 = vld [vmem:[%s6108_s26 + $0x220] sm:$0xff] }
  0xc4   : > { %3918 = vmatpush1.bf16.msra.mxu0 %v4922_v42  ;;  %4921 = vmatmul.mubr.msk.bf16.vlgmr.msra.gmra.mrb[4].mxu1 %vm594_vm1, %v479_v24  ;;  %v863_v24 = vld [vmem:[%s6108_s26 + $0x1e0] sm:$0xff]  ;;  %v4973_v25 = vcombine.high %v852_v19, %v856_v20  ;;  %v860_v27 = vld [vmem:[%s6108_s26 + $0x1c8] sm:$0xff]  ;;  %v4972_v30 = vcombine.low %v852_v19, %v856_v20  ;;  %v4987_v37 = vcombine.high %v867_v31, %v871_v32 }
  0xc5   : > { %3919 = vmatprep.subr.bf16.mxu0 %v4931_v45  ;;  %4082 = vmatpush1.bf16.msra.mxu1 %v4924_v46  ;;  %v864_v28 = vld [vmem:[%s6108_s26 + $0x1e8] sm:$0xff]  ;;  %v4979_v29 = vcombine.high %v859_v23, %v863_v24  ;;  %v4978_v34 = vcombine.low %v859_v23, %v863_v24  ;;  %v875_v39 = vld [vmem:[%s6108_s26 + $0x240] sm:$0xff]  ;;  %v4986_v42 = vcombine.low %v867_v31, %v871_v32 }
  0xc6   : > { %4083 = vmatprep.subr.bf16.mxu1 %v4933_v49  ;;  %v4981_v33 = vcombine.high %v860_v27, %v864_v28  ;;  %v868_v35 = vld [vmem:[%s6108_s26 + $0x208] sm:$0xff]  ;;  %v4980_v38 = vcombine.low %v860_v27, %v864_v28  ;;  %v879_v40 = vld [vmem:[%s6108_s26 + $0x260] sm:$0xff] }
  0xc7   : > { %v872_v36 = vld [vmem:[%s6108_s26 + $0x228] sm:$0xff]  ;;  %v4995_v45 = vcombine.high %v875_v39, %v879_v40  ;;  %v883_v47 = vld [vmem:[%s6108_s26 + $0x280] sm:$0xff] }
  0xc8   : > { %3920 = vmatpush1.bf16.msra.mxu0 %v4930_v50  ;;  %v4989_v41 = vcombine.high %v868_v35, %v872_v36  ;;  %v876_v43 = vld [vmem:[%s6108_s26 + $0x248] sm:$0xff]  ;;  %v4988_v46 = vcombine.low %v868_v35, %v872_v36  ;;  %v887_v48 = vld [vmem:[%s6108_s26 + $0x2a0] sm:$0xff]  ;;  %v4994_v50 = vcombine.low %v875_v39, %v879_v40 }
  0xc9   : > { %3921 = vmatprep.subr.bf16.mxu0 %v4939_v53  ;;  %4084 = vmatpush1.bf16.msra.mxu1 %v4932_v54  ;;  %v880_v44 = vld [vmem:[%s6108_s26 + $0x268] sm:$0xff]  ;;  %v5003_v53 = vcombine.high %v883_v47, %v887_v48  ;;  %v891_v55 = vld [vmem:[%s6108_s26 + $0x2c0] sm:$0xff] }
  0xca   : > { %4085 = vmatprep.subr.bf16.mxu1 %v4941_v57  ;;  %v4997_v49 = vcombine.high %v876_v43, %v880_v44  ;;  %v884_v51 = vld [vmem:[%s6108_s26 + $0x288] sm:$0xff]  ;;  %v4996_v54 = vcombine.low %v876_v43, %v880_v44  ;;  %v895_v56 = vld [vmem:[%s6108_s26 + $0x2e0] sm:$0xff] }
  0xcb   : > { %v888_v52 = vld [vmem:[%s6108_s26 + $0x2a8] sm:$0xff]  ;;  %v899_v63 = vld [vmem:[%s6108_s26 + $0x300] sm:$0xff] }
  0xcc   : > { %3922 = vmatpush1.bf16.msra.mxu0 %v4938_v58  ;;  %v5005_v57 = vcombine.high %v884_v51, %v888_v52  ;;  %v5002_v58 = vcombine.low %v883_v47, %v887_v48  ;;  %v892_v59 = vld [vmem:[%s6108_s26 + $0x2c8] sm:$0xff]  ;;  %v903_v0 = vld [vmem:[%s6108_s26 + $0x320] sm:$0xff] }
  0xcd   : > { %3923 = vmatprep.subr.bf16.mxu0 %v4947_v61  ;;  %4086 = vmatpush1.bf16.msra.mxu1 %v4940_v62  ;;  %v896_v60 = vld [vmem:[%s6108_s26 + $0x2e8] sm:$0xff]  ;;  %v5011_v61 = vcombine.high %v891_v55, %v895_v56  ;;  %v5004_v62 = vcombine.low %v884_v51, %v888_v52  ;;  %v907_v7 = vld [vmem:[%s6108_s26 + $0x340] sm:$0xff] }
  0xce   : > { %4087 = vmatprep.subr.bf16.mxu1 %v4949_v1  ;;  %v5013_v1 = vcombine.high %v892_v59, %v896_v60  ;;  %v900_v3 = vld [vmem:[%s6108_s26 + $0x308] sm:$0xff]  ;;  %v911_v8 = vld [vmem:[%s6108_s26 + $0x360] sm:$0xff] }
  0xcf   : > { %v904_v4 = vld [vmem:[%s6108_s26 + $0x328] sm:$0xff]  ;;  %v5026_v16 = vcombine.low %v907_v7, %v911_v8  ;;  %v919_v19 = vld [vmem:[%s6108_s26 + $0x3a0] sm:$0xff] }
  0xd0   : > { %3924 = vmatpush1.bf16.msra.mxu0 %v4946_v2  ;;  %v5010_v2 = vcombine.low %v891_v55, %v895_v56  ;;  %v908_v11 = vld [vmem:[%s6108_s26 + $0x348] sm:$0xff]  ;;  %v927_v27 = vld [vmem:[%s6108_s26 + $0x3e0] sm:$0xff] }
  0xd1   : > { %3925 = vmatprep.subr.bf16.mxu0 %v4955_v5  ;;  %4088 = vmatpush1.bf16.msra.mxu1 %v4948_v6  ;;  %v5019_v5 = vcombine.high %v899_v63, %v903_v0  ;;  %v5012_v6 = vcombine.low %v892_v59, %v896_v60  ;;  %v912_v12 = vld [vmem:[%s6108_s26 + $0x368] sm:$0xff]  ;;  %v935_v35 = vld [vmem:[%s6108_s26 + $0x420] sm:$0xff] }
  0xd2   : > { %4089 = vmatprep.subr.bf16.mxu1 %v4957_v9  ;;  %v5021_v9 = vcombine.high %v900_v3, %v904_v4  ;;  %v5029_v15 = vcombine.high %v908_v11, %v912_v12  ;;  %v916_v20 = vld [vmem:[%s6108_s26 + $0x388] sm:$0xff]  ;;  %v939_v60 = vld [vmem:[%s6108_s26 + $0x440] sm:$0xff] }
  0xd3   : > { %v924_v28 = vld [vmem:[%s6108_s26 + $0x3c8] sm:$0xff] }
  0xd4   : > { %3926 = vmatpush1.bf16.msra.mxu0 %v4954_v10  ;;  %v5018_v10 = vcombine.low %v899_v63, %v903_v0  ;;  %v932_v36 = vld [vmem:[%s6108_s26 + $0x408] sm:$0xff]  ;;  %v943_v0 = vld [vmem:[%s6108_s26 + $0x460] sm:$0xff] }
  0xd5   : > { %3927 = vmatprep.subr.bf16.mxu0 %v4963_v13  ;;  %4090 = vmatpush1.bf16.msra.mxu1 %v4956_v14  ;;  %v5027_v13 = vcombine.high %v907_v7, %v911_v8  ;;  %v5020_v14 = vcombine.low %v900_v3, %v904_v4  ;;  %v5059_v7 = vcombine.high %v939_v60, %v943_v0 }
  0xd6   : > { %4091 = vmatprep.subr.bf16.mxu1 %v4965_v17  ;;  %v5028_v17 = vcombine.low %v908_v11, %v912_v12  ;;  %v948_v11 = vld [vmem:[%s6108_s26 + $0x488] sm:$0xff] }
  0xd7   : > { %v952_v12 = vld [vmem:[%s6108_s26 + $0x4a8] sm:$0xff] }
  0xd8   : > { %3928 = vmatpush1.bf16.msra.mxu0 %v4962_v18  ;;  %v915_v18 = vld [vmem:[%s6108_s26 + $0x380] sm:$0xff] }
  0xd9   : > { %3929 = vmatprep.subr.bf16.mxu0 %v4971_v21  ;;  %4092 = vmatpush1.bf16.msra.mxu1 %v4964_v22  ;;  %v5035_v21 = vcombine.high %v915_v18, %v919_v19  ;;  %v920_v22 = vld [vmem:[%s6108_s26 + $0x3a8] sm:$0xff]  ;;  %v5034_v23 = vcombine.low %v915_v18, %v919_v19 }
  0xda   : > { %4093 = vmatprep.subr.bf16.mxu1 %v4973_v25  ;;  %v5036_v24 = vcombine.low %v916_v20, %v920_v22  ;;  %v5037_v25 = vcombine.high %v916_v20, %v920_v22  ;;  %v5069_v20 = vcombine.high %v948_v11, %v952_v12 }
  0xdc   : > { %3930 = vmatpush1.bf16.msra.mxu0 %v4970_v26  ;;  %v923_v26 = vld [vmem:[%s6108_s26 + $0x3c0] sm:$0xff] }
  0xdd   : > { %3931 = vmatprep.subr.bf16.mxu0 %v4979_v29  ;;  %4094 = vmatpush1.bf16.msra.mxu1 %v4972_v30  ;;  %v5043_v29 = vcombine.high %v923_v26, %v927_v27  ;;  %v928_v30 = vld [vmem:[%s6108_s26 + $0x3e8] sm:$0xff]  ;;  %v5042_v31 = vcombine.low %v923_v26, %v927_v27  ;;  %v5068_v27 = vcombine.low %v948_v11, %v952_v12 }
  0xde   : > { %4095 = vmatprep.subr.bf16.mxu1 %v4981_v33  ;;  %v5044_v32 = vcombine.low %v924_v28, %v928_v30  ;;  %v5045_v33 = vcombine.high %v924_v28, %v928_v30  ;;  %v963_v30 = vld [vmem:[%s6108_s26 + $0x500] sm:$0xff]  ;;  %v996_v11 = vld [vmem:[%s6108_s26 + $0x608] sm:$0xff] }
  0xdf   : > { %v1000_v12 = vld [vmem:[%s6108_s26 + $0x628] sm:$0xff] }
  0xe0   : > { %3932 = vmatpush1.bf16.msra.mxu0 %v4978_v34  ;;  %v931_v34 = vld [vmem:[%s6108_s26 + $0x400] sm:$0xff] }
  0xe1   : > { %3933 = vmatprep.subr.bf16.mxu0 %v4987_v37  ;;  %4096 = vmatpush1.bf16.msra.mxu1 %v4980_v38  ;;  %v5051_v37 = vcombine.high %v931_v34, %v935_v35  ;;  %v936_v38 = vld [vmem:[%s6108_s26 + $0x428] sm:$0xff]  ;;  %v5050_v39 = vcombine.low %v931_v34, %v935_v35 }
  0xe2   : > { %4097 = vmatprep.subr.bf16.mxu1 %v4989_v41  ;;  %v5052_v40 = vcombine.low %v932_v36, %v936_v38  ;;  %v5053_v41 = vcombine.high %v932_v36, %v936_v38  ;;  %v971_v38 = vld [vmem:[%s6108_s26 + $0x540] sm:$0xff] }
  0xe4   : > { %3934 = vmatpush1.bf16.msra.mxu0 %v4986_v42  ;;  %v494_v42 = vlaneseq }
  0xe5   : > { %3935 = vmatprep.subr.bf16.mxu0 %v4995_v45  ;;  %4098 = vmatpush1.bf16.msra.mxu1 %v4988_v46  ;;  %v6212_v45 = vld [vmem:[%s6106_s16] sm:$0xff] }
  0xe6   : > { %4099 = vmatprep.subr.bf16.mxu1 %v4997_v49  ;;  %v6206_v43 = vshrl.u32 %v494_v42, 7 }
  0xe8   : > { %3936 = vmatpush1.bf16.msra.mxu0 %v4994_v50  ;;  %v6209_v44 = vsub.s32 0, %v6206_v43  ;;  %v500_v46 = vsub.s32 1, %v6206_v43  ;;  %v508_v47 = vsub.s32 3, %v6206_v43 }
  0xe9   : > { %3937 = vmatprep.subr.bf16.mxu0 %v5003_v53  ;;  %4100 = vmatpush1.bf16.msra.mxu1 %v4996_v54 }
  0xea   : > { %4101 = vmatprep.subr.bf16.mxu1 %v5005_v57  ;;  %v497_v48 = vrot.slane %v6212_v45, %v6209_v44  ;;  %v501_v49 = vrot.slane %v6212_v45, %v500_v46  ;;  %v509_v50 = vrot.slane %v6212_v45, %v508_v47 }
  0xec   : > { %3938 = vmatpush1.bf16.msra.mxu0 %v5002_v58 }
  0xed   : > { %3939 = vmatprep.subr.bf16.mxu0 %v5011_v61  ;;  %4102 = vmatpush1.bf16.msra.mxu1 %v5004_v62 }
  0xee   : > { %4103 = vmatprep.subr.bf16.mxu1 %v5013_v1  ;;  %v940_v1 = vld [vmem:[%s6108_s26 + $0x448] sm:$0xff] }
  0xf0   : > { %3940 = vmatpush1.bf16.msra.mxu0 %v5010_v2  ;;  %v944_v2 = vld [vmem:[%s6108_s26 + $0x468] sm:$0xff] }
  0xf1   : > { %3941 = vmatprep.subr.bf16.mxu0 %v5019_v5  ;;  %4104 = vmatpush1.bf16.msra.mxu1 %v5012_v6  ;;  %v5061_v8 = vcombine.high %v940_v1, %v944_v2 }
  0xf2   : > { %4105 = vmatprep.subr.bf16.mxu1 %v5021_v9  ;;  %v947_v9 = vld [vmem:[%s6108_s26 + $0x480] sm:$0xff] }
  0xf4   : > { %3942 = vmatpush1.bf16.msra.mxu0 %v5018_v10  ;;  %v951_v10 = vld [vmem:[%s6108_s26 + $0x4a0] sm:$0xff] }
  0xf5   : > { %3943 = vmatprep.subr.bf16.mxu0 %v5027_v13  ;;  %4106 = vmatpush1.bf16.msra.mxu1 %v5020_v14  ;;  %v5067_v19 = vcombine.high %v947_v9, %v951_v10  ;;  %v5066_v26 = vcombine.low %v947_v9, %v951_v10  ;;  %v999_v10 = vld [vmem:[%s6108_s26 + $0x620] sm:$0xff] }
  0xf6   : > { %4107 = vmatprep.subr.bf16.mxu1 %v5029_v15 }
  0xf8   : > { %3944 = vmatpush1.bf16.msra.mxu0 %v5026_v16  ;;  %v5058_v16 = vcombine.low %v939_v60, %v943_v0  ;;  %v987_v60 = vld [vmem:[%s6108_s26 + $0x5c0] sm:$0xff]  ;;  %v992_v0 = vld [vmem:[%s6108_s26 + $0x5e8] sm:$0xff] }
  0xf9   : > { %4108 = vmatpush1.bf16.msra.mxu1 %v5028_v17  ;;  %3945 = vmatprep.subr.bf16.mxu0 %v5035_v21  ;;  %v5060_v17 = vcombine.low %v940_v1, %v944_v2  ;;  %v955_v21 = vld [vmem:[%s6108_s26 + $0x4c0] sm:$0xff] }
  0xfa   : > { %4109 = vmatprep.subr.bf16.mxu1 %v5037_v25  ;;  %v960_v25 = vld [vmem:[%s6108_s26 + $0x4e8] sm:$0xff] }
  0xfc   : > { %3946 = vmatpush1.bf16.msra.mxu0 %v5034_v23  ;;  %v959_v23 = vld [vmem:[%s6108_s26 + $0x4e0] sm:$0xff] }
  0xfd   : > { %4110 = vmatpush1.bf16.msra.mxu1 %v5036_v24  ;;  %3947 = vmatprep.subr.bf16.mxu0 %v5043_v29  ;;  %v956_v24 = vld [vmem:[%s6108_s26 + $0x4c8] sm:$0xff]  ;;  %v5075_v28 = vcombine.high %v955_v21, %v959_v23  ;;  %v5074_v34 = vcombine.low %v955_v21, %v959_v23  ;;  %v1003_v21 = vld [vmem:[%s6108_s26 + $0x640] sm:$0xff] }
  0xfe   : > { %4111 = vmatprep.subr.bf16.mxu1 %v5045_v33  ;;  %v5077_v29 = vcombine.high %v956_v24, %v960_v25  ;;  %v968_v33 = vld [vmem:[%s6108_s26 + $0x528] sm:$0xff]  ;;  %v5076_v35 = vcombine.low %v956_v24, %v960_v25 }
  0xff   : > { %v1004_v23 = vld [vmem:[%s6108_s26 + $0x648] sm:$0xff] }
 0x100   : > { %3948 = vmatpush1.bf16.msra.mxu0 %v5042_v31  ;;  %v967_v31 = vld [vmem:[%s6108_s26 + $0x520] sm:$0xff]  ;;  %v1008_v24 = vld [vmem:[%s6108_s26 + $0x668] sm:$0xff] }
 0x101   : > { %4112 = vmatpush1.bf16.msra.mxu1 %v5044_v32  ;;  %3958 = vmatprep.subr.bf16.mxu0 %v5051_v37  ;;  %v964_v32 = vld [vmem:[%s6108_s26 + $0x508] sm:$0xff]  ;;  %v5083_v36 = vcombine.high %v963_v30, %v967_v31  ;;  %v5082_v42 = vcombine.low %v963_v30, %v967_v31  ;;  %v1015_v30 = vld [vmem:[%s6108_s26 + $0x6a0] sm:$0xff] }
 0x102   : > { %4122 = vmatprep.subr.bf16.mxu1 %v5053_v41  ;;  %v5085_v37 = vcombine.high %v964_v32, %v968_v33  ;;  %v976_v41 = vld [vmem:[%s6108_s26 + $0x568] sm:$0xff] }
 0x103   : > { %v1012_v31 = vld [vmem:[%s6108_s26 + $0x688] sm:$0xff] }
 0x18e   : > { %v657_v51 = vpop.f32.mrb[0].mxu0  ;;  %v6224_v54 = vpop.f32.mrb[0].mxu1 }
 0x18f   : > { %v658_v52 = vadd.f32 %v657_v51, %v497_v48  ;;  %v659_v53 = vpop.f32.mrb[1].mxu0  ;;  %v700_v57 = vpop.f32.mrb[1].mxu1  ;;  %v5084_v48 = vcombine.low %v964_v32, %v968_v33  ;;  %v979_v51 = vld [vmem:[%s6108_s26 + $0x580] sm:$0xff]  ;;  %v1016_v32 = vld [vmem:[%s6108_s26 + $0x6a8] sm:$0xff] }
 0x190   : > { %v660_v55 = vadd.f32 %v659_v53, %v501_v49  ;;  %v661_v56 = vpop.f32.mrb[2].mxu0  ;;  %v701_v61 = vadd.f32 %v700_v57, %v509_v50  ;;  %v702_v62 = vpop.f32.mrb[2].mxu1  ;;  %v980_v53 = vld [vmem:[%s6108_s26 + $0x588] sm:$0xff] }
 0x191   : > { %v787_v58 = vmax.f32 %v658_v52, 0.0  ;;  %v662_v59 = vpop.f32.mrb[3].mxu0  ;;  %v703_v3 = vpop.f32.mrb[3].mxu1  ;;  %v983_v52 = vld [vmem:[%s6108_s26 + $0x5a0] sm:$0xff] }
 0x192   : > { %v788_v63 = vmax.f32 %v660_v55, 0.0  ;;  %v790_v4 = vmax.f32 %v701_v61, 0.0  ;;  %v984_v55 = vld [vmem:[%s6108_s26 + $0x5a8] sm:$0xff]  ;;  %v991_v62 = vld [vmem:[%s6108_s26 + $0x5e0] sm:$0xff]  ;;  %v5098_v1 = vcombine.low %v979_v51, %v983_v52 }
 0x193   : > { %v6232_v6 = vpack.c.bf16 %v787_v58, %v787_v58  ;;  %v5099_v58 = vcombine.high %v979_v51, %v983_v52  ;;  %v5101_v59 = vcombine.high %v980_v53, %v984_v55  ;;  %v5100_v2 = vcombine.low %v980_v53, %v984_v55  ;;  %v1031_v51 = vld [vmem:[%s6108_s26 + $0x720] sm:$0xff]  ;;  %v1028_v52 = vld [vmem:[%s6108_s26 + $0x708] sm:$0xff] }
 0x194   : > { %v6230_v5 = vpack.c.bf16 %v788_v63, %v788_v63  ;;  %v6240_v13 = vpack.c.bf16 %v790_v4, %v790_v4  ;;  %v988_v63 = vld [vmem:[%s6108_s26 + $0x5c8] sm:$0xff]  ;;  %v5107_v4 = vcombine.high %v987_v60, %v991_v62 }
 0x195   : > { %v1032_v53 = vld [vmem:[%s6108_s26 + $0x728] sm:$0xff] }
 0x196   : > { %3949 = vmatprep.mubr.bf16.mxu0 %v6230_v5  ;;  %4113 = vmatprep.mubr.bf16.mxu1 %v6230_v5  ;;  %v6242_v14 = vpop.f32.mrb[4].mxu0 }
 0x197   : > { %3950 = vmatmul.mubr.bf16.vlgmr.msra.gmra.mrb[8].mxu0 %v6232_v6  ;;  %4114 = vmatmul.mubr.bf16.vlgmr.msra.gmra.mrb[8].mxu1 %v6232_v6  ;;  %v6246_v15 = vpop.f32.mrb[5].mxu0  ;;  %v6267_v61 = vpop.f32.mrb[4].mxu1 }
 0x198   : > { %3959 = vmatpush1.bf16.msra.mxu0 %v5050_v39  ;;  %4123 = vmatpush1.bf16.msra.mxu1 %v5052_v40  ;;  %v743_v18 = vpop.f32.mrb[6].mxu0  ;;  %v975_v39 = vld [vmem:[%s6108_s26 + $0x560] sm:$0xff]  ;;  %v972_v40 = vld [vmem:[%s6108_s26 + $0x548] sm:$0xff]  ;;  %v6272_v3 = vpop.f32.mrb[5].mxu1 }
 0x199   : > { %3960 = vmatprep.subr.bf16.mxu0 %v5059_v7  ;;  %4124 = vmatprep.subr.bf16.mxu1 %v5061_v8  ;;  %v744_v22 = vpop.f32.mrb[7].mxu0  ;;  %v5091_v49 = vcombine.high %v971_v38, %v975_v39  ;;  %v5093_v50 = vcombine.high %v972_v40, %v976_v41  ;;  %v5090_v56 = vcombine.low %v971_v38, %v975_v39  ;;  %v995_v8 = vld [vmem:[%s6108_s26 + $0x600] sm:$0xff]  ;;  %v784_v9 = vpop.f32.mrb[6].mxu1  ;;  %v1020_v39 = vld [vmem:[%s6108_s26 + $0x6c8] sm:$0xff] }
 0x19a   : > { %3990 = vmatprep.mubr.bf16.mxu0 %v6240_v13  ;;  %4154 = vmatprep.mubr.bf16.mxu1 %v6240_v13  ;;  %v5092_v57 = vcombine.low %v972_v40, %v976_v41  ;;  %v5109_v7 = vcombine.high %v988_v63, %v992_v0  ;;  %v5108_v18 = vcombine.low %v988_v63, %v992_v0  ;;  %v1007_v22 = vld [vmem:[%s6108_s26 + $0x660] sm:$0xff]  ;;  %v1024_v40 = vld [vmem:[%s6108_s26 + $0x6e8] sm:$0xff]  ;;  %v6299_v0 = vsub.s32 2, %v6206_v43 }
 0x19b   : > { %v5114_v25 = vcombine.low %v995_v8, %v999_v10  ;;  %v5122_v33 = vcombine.low %v1003_v21, %v1007_v22  ;;  %v1023_v38 = vld [vmem:[%s6108_s26 + $0x6e0] sm:$0xff]  ;;  %v1040_v63 = vld [vmem:[%s6108_s26 + $0x768] sm:$0xff] }
 0x19c   : > { %3961 = vmatpush1.bf16.msra.mxu0 %v5058_v16  ;;  %4125 = vmatpush1.bf16.msra.mxu1 %v5060_v17  ;;  %v785_v16 = vpop.f32.mrb[7].mxu1  ;;  %v5106_v17 = vcombine.low %v987_v60, %v991_v62  ;;  %v1039_v60 = vld [vmem:[%s6108_s26 + $0x760] sm:$0xff]  ;;  %v1036_v62 = vld [vmem:[%s6108_s26 + $0x748] sm:$0xff] }
 0x19d   : > { %3962 = vmatprep.subr.bf16.mxu0 %v5067_v19  ;;  %4126 = vmatprep.subr.bf16.mxu1 %v5069_v20  ;;  %v5115_v19 = vcombine.high %v995_v8, %v999_v10  ;;  %v5117_v20 = vcombine.high %v996_v11, %v1000_v12  ;;  %v1043_v8 = vld [vmem:[%s6108_s26 + $0x780] sm:$0xff]  ;;  %v1044_v10 = vld [vmem:[%s6108_s26 + $0x788] sm:$0xff]  ;;  %v505_v16 = vrot.slane %v6212_v45, %v6299_v0 }
 0x19e   : > { %v1047_v9 = vld [vmem:[%s6108_s26 + $0x7a0] sm:$0xff] }
 0x1a0   : > { %3963 = vmatpush1.bf16.msra.mxu0 %v5066_v26  ;;  %4127 = vmatpush1.bf16.msra.mxu1 %v5068_v27  ;;  %v5116_v26 = vcombine.low %v996_v11, %v1000_v12  ;;  %v5123_v27 = vcombine.high %v1003_v21, %v1007_v22  ;;  %v1048_v11 = vld [vmem:[%s6108_s26 + $0x7a8] sm:$0xff]  ;;  %v516_v12 = vsub.s32 5, %v6206_v43  ;;  %v1051_v21 = vld [vmem:[%s6108_s26 + $0x7c0] sm:$0xff] }
 0x1a1   : > { %3964 = vmatprep.subr.bf16.mxu0 %v5075_v28  ;;  %4128 = vmatprep.subr.bf16.mxu1 %v5077_v29  ;;  %v5125_v28 = vcombine.high %v1004_v23, %v1008_v24  ;;  %v1011_v29 = vld [vmem:[%s6108_s26 + $0x680] sm:$0xff] }
 0x1a2   : > { %v5130_v41 = vcombine.low %v1011_v29, %v1015_v30  ;;  %v1055_v22 = vld [vmem:[%s6108_s26 + $0x7e0] sm:$0xff] }
 0x1a4   : > { %3965 = vmatpush1.bf16.msra.mxu0 %v5074_v34  ;;  %4129 = vmatpush1.bf16.msra.mxu1 %v5076_v35  ;;  %v5124_v34 = vcombine.low %v1004_v23, %v1008_v24  ;;  %v5131_v35 = vcombine.high %v1011_v29, %v1015_v30  ;;  %v1052_v23 = vld [vmem:[%s6108_s26 + $0x7c8] sm:$0xff]  ;;  %v5171_v29 = vcombine.high %v1051_v21, %v1055_v22 }
 0x1a5   : > { %3966 = vmatprep.subr.bf16.mxu0 %v5083_v36  ;;  %4130 = vmatprep.subr.bf16.mxu1 %v5085_v37  ;;  %v5133_v36 = vcombine.high %v1012_v31, %v1016_v32  ;;  %v1019_v37 = vld [vmem:[%s6108_s26 + $0x6c0] sm:$0xff]  ;;  %v1056_v24 = vld [vmem:[%s6108_s26 + $0x7e8] sm:$0xff] }
 0x1a6   : > { %v5138_v55 = vcombine.low %v1019_v37, %v1023_v38  ;;  %v5173_v30 = vcombine.high %v1052_v23, %v1056_v24 }
 0x1a8   : > { %3967 = vmatpush1.bf16.msra.mxu0 %v5082_v42  ;;  %4131 = vmatpush1.bf16.msra.mxu1 %v5084_v48  ;;  %v5132_v42 = vcombine.low %v1012_v31, %v1016_v32  ;;  %v5139_v48 = vcombine.high %v1019_v37, %v1023_v38  ;;  %v1059_v31 = vld [vmem:[%s6108_s26 + $0x800] sm:$0xff]  ;;  %v5172_v37 = vcombine.low %v1052_v23, %v1056_v24 }
 0x1a9   : > { %3968 = vmatprep.subr.bf16.mxu0 %v5091_v49  ;;  %4132 = vmatprep.subr.bf16.mxu1 %v5093_v50  ;;  %v5141_v49 = vcombine.high %v1020_v39, %v1024_v40  ;;  %v1027_v50 = vld [vmem:[%s6108_s26 + $0x700] sm:$0xff] }
 0x1aa   : > { %v1063_v32 = vld [vmem:[%s6108_s26 + $0x820] sm:$0xff] }
 0x1ab   : > { %v5179_v38 = vcombine.high %v1059_v31, %v1063_v32 }
 0x1ac   : > { %3969 = vmatpush1.bf16.msra.mxu0 %v5090_v56  ;;  %4133 = vmatpush1.bf16.msra.mxu1 %v5092_v57  ;;  %v5140_v56 = vcombine.low %v1020_v39, %v1024_v40  ;;  %v5147_v57 = vcombine.high %v1027_v50, %v1031_v51  ;;  %v1067_v40 = vld [vmem:[%s6108_s26 + $0x840] sm:$0xff] }
 0x1ad   : > { %3970 = vmatprep.subr.bf16.mxu0 %v5099_v58  ;;  %4134 = vmatprep.subr.bf16.mxu1 %v5101_v59  ;;  %v5149_v58 = vcombine.high %v1028_v52, %v1032_v53  ;;  %v1035_v59 = vld [vmem:[%s6108_s26 + $0x740] sm:$0xff] }
 0x1b0   : > { %3971 = vmatpush1.bf16.msra.mxu0 %v5098_v1  ;;  %4135 = vmatpush1.bf16.msra.mxu1 %v5100_v2  ;;  %v5146_v1 = vcombine.low %v1027_v50, %v1031_v51  ;;  %v5148_v2 = vcombine.low %v1028_v52, %v1032_v53 }
 0x1b1   : > { %3972 = vmatprep.subr.bf16.mxu0 %v5107_v4  ;;  %4136 = vmatprep.subr.bf16.mxu1 %v5109_v7  ;;  %v5155_v4 = vcombine.high %v1035_v59, %v1039_v60  ;;  %v5157_v7 = vcombine.high %v1036_v62, %v1040_v63 }
 0x1b4   : > { %3973 = vmatpush1.bf16.msra.mxu0 %v5106_v17  ;;  %4137 = vmatpush1.bf16.msra.mxu1 %v5108_v18  ;;  %v5154_v17 = vcombine.low %v1035_v59, %v1039_v60  ;;  %v5156_v18 = vcombine.low %v1036_v62, %v1040_v63 }
 0x1b5   : > { %3974 = vmatprep.subr.bf16.mxu0 %v5115_v19  ;;  %4138 = vmatprep.subr.bf16.mxu1 %v5117_v20  ;;  %v5163_v19 = vcombine.high %v1043_v8, %v1047_v9  ;;  %v5165_v20 = vcombine.high %v1044_v10, %v1048_v11 }
 0x1b8   : > { %3975 = vmatpush1.bf16.msra.mxu0 %v5114_v25  ;;  %4139 = vmatpush1.bf16.msra.mxu1 %v5116_v26  ;;  %v517_v25 = vrot.slane %v6212_v45, %v516_v12  ;;  %v699_v26 = vadd.f32 %v6224_v54, %v505_v16  ;;  %v5170_v54 = vcombine.low %v1051_v21, %v1055_v22 }
 0x1b9   : > { %3976 = vmatprep.subr.bf16.mxu0 %v5123_v27  ;;  %4140 = vmatprep.subr.bf16.mxu1 %v5125_v28  ;;  %v5162_v27 = vcombine.low %v1043_v8, %v1047_v9  ;;  %v5164_v28 = vcombine.low %v1044_v10, %v1048_v11  ;;  %v1088_v8 = vld [vmem:[%s6108_s26 + $0x8e8] sm:$0xff] }
 0x1bc   : > { %3977 = vmatpush1.bf16.msra.mxu0 %v5122_v33  ;;  %4141 = vmatpush1.bf16.msra.mxu1 %v5124_v34  ;;  %v1060_v33 = vld [vmem:[%s6108_s26 + $0x808] sm:$0xff] }
 0x1bd   : > { %3978 = vmatprep.subr.bf16.mxu0 %v5131_v35  ;;  %4142 = vmatprep.subr.bf16.mxu1 %v5133_v36  ;;  %v1064_v34 = vld [vmem:[%s6108_s26 + $0x828] sm:$0xff]  ;;  %v742_v35 = vadd.f32 %v6246_v15, %v517_v25  ;;  %v789_v36 = vmax.f32 %v699_v26, 0.0  ;;  %v5178_v15 = vcombine.low %v1059_v31, %v1063_v32  ;;  %v1099_v25 = vld [vmem:[%s6108_s26 + $0x940] sm:$0xff] }
 0x1be   : > { %v5181_v39 = vcombine.high %v1060_v33, %v1064_v34  ;;  %v5180_v51 = vcombine.low %v1060_v33, %v1064_v34  ;;  %v1103_v26 = vld [vmem:[%s6108_s26 + $0x960] sm:$0xff] }
 0x1bf   : > { %v6325_v50 = vpack.c.bf16 %v789_v36, %v789_v36  ;;  %v5219_v31 = vcombine.high %v1099_v25, %v1103_v26  ;;  %v1107_v33 = vld [vmem:[%s6108_s26 + $0x980] sm:$0xff]  ;;  %v1112_v36 = vld [vmem:[%s6108_s26 + $0x9a8] sm:$0xff] }
 0x1c0   : > { %3979 = vmatpush1.bf16.msra.mxu0 %v5130_v41  ;;  %4143 = vmatpush1.bf16.msra.mxu1 %v5132_v42  ;;  %v1071_v41 = vld [vmem:[%s6108_s26 + $0x860] sm:$0xff]  ;;  %v1068_v42 = vld [vmem:[%s6108_s26 + $0x848] sm:$0xff] }
 0x1c1   : > { %3980 = vmatprep.subr.bf16.mxu0 %v5139_v48  ;;  %4144 = vmatprep.subr.bf16.mxu1 %v5141_v49  ;;  %v1072_v48 = vld [vmem:[%s6108_s26 + $0x868] sm:$0xff]  ;;  %v792_v49 = vmax.f32 %v742_v35, 0.0  ;;  %v5187_v52 = vcombine.high %v1067_v40, %v1071_v41  ;;  %v5186_v60 = vcombine.low %v1067_v40, %v1071_v41  ;;  %v1111_v34 = vld [vmem:[%s6108_s26 + $0x9a0] sm:$0xff] }
 0x1c2   : > { %v5189_v53 = vcombine.high %v1068_v42, %v1072_v48  ;;  %v5188_v62 = vcombine.low %v1068_v42, %v1072_v48  ;;  %v1108_v35 = vld [vmem:[%s6108_s26 + $0x988] sm:$0xff]  ;;  %v1115_v40 = vld [vmem:[%s6108_s26 + $0x9c0] sm:$0xff] }
 0x1c3   : > { %v6331_v59 = vpack.c.bf16 %v792_v49, %v792_v49  ;;  %v1119_v41 = vld [vmem:[%s6108_s26 + $0x9e0] sm:$0xff]  ;;  %v1116_v42 = vld [vmem:[%s6108_s26 + $0x9c8] sm:$0xff]  ;;  %v5226_v49 = vcombine.low %v1107_v33, %v1111_v34 }
 0x1c4   : > { %3981 = vmatpush1.bf16.msra.mxu0 %v5138_v55  ;;  %4145 = vmatpush1.bf16.msra.mxu1 %v5140_v56  ;;  %v1075_v55 = vld [vmem:[%s6108_s26 + $0x880] sm:$0xff]  ;;  %v1120_v48 = vld [vmem:[%s6108_s26 + $0x9e8] sm:$0xff] }
 0x1c5   : > { %3982 = vmatprep.subr.bf16.mxu0 %v5147_v57  ;;  %4146 = vmatprep.subr.bf16.mxu1 %v5149_v58  ;;  %v1079_v56 = vld [vmem:[%s6108_s26 + $0x8a0] sm:$0xff]  ;;  %v1076_v57 = vld [vmem:[%s6108_s26 + $0x888] sm:$0xff] }
 0x1c6   : > { %v1080_v58 = vld [vmem:[%s6108_s26 + $0x8a8] sm:$0xff]  ;;  %v5195_v63 = vcombine.high %v1075_v55, %v1079_v56  ;;  %v5194_v9 = vcombine.low %v1075_v55, %v1079_v56  ;;  %v1127_v55 = vld [vmem:[%s6108_s26 + $0xa20] sm:$0xff] }
 0x1c7   : > { %v5196_v10 = vcombine.low %v1076_v57, %v1080_v58  ;;  %v1124_v56 = vld [vmem:[%s6108_s26 + $0xa08] sm:$0xff] }
 0x1c8   : > { %3983 = vmatpush1.bf16.msra.mxu0 %v5146_v1  ;;  %4147 = vmatpush1.bf16.msra.mxu1 %v5148_v2  ;;  %v5197_v1 = vcombine.high %v1076_v57, %v1080_v58  ;;  %v1083_v2 = vld [vmem:[%s6108_s26 + $0x8c0] sm:$0xff]  ;;  %v1128_v57 = vld [vmem:[%s6108_s26 + $0xa28] sm:$0xff]  ;;  %v5234_v58 = vcombine.low %v1115_v40, %v1119_v41 }
 0x1c9   : > { %3984 = vmatprep.subr.bf16.mxu0 %v5155_v4  ;;  %4148 = vmatprep.subr.bf16.mxu1 %v5157_v7  ;;  %v1087_v4 = vld [vmem:[%s6108_s26 + $0x8e0] sm:$0xff]  ;;  %v1084_v7 = vld [vmem:[%s6108_s26 + $0x8c8] sm:$0xff] }
 0x1ca   : > { %v5203_v11 = vcombine.high %v1083_v2, %v1087_v4  ;;  %v5205_v16 = vcombine.high %v1084_v7, %v1088_v8  ;;  %v5202_v21 = vcombine.low %v1083_v2, %v1087_v4  ;;  %v5204_v22 = vcombine.low %v1084_v7, %v1088_v8  ;;  %v1135_v2 = vld [vmem:[%s6108_s26 + $0xa60] sm:$0xff]  ;;  %v1132_v4 = vld [vmem:[%s6108_s26 + $0xa48] sm:$0xff] }
 0x1cb   : > { %v1136_v7 = vld [vmem:[%s6108_s26 + $0xa68] sm:$0xff] }
 0x1cc   : > { %3985 = vmatpush1.bf16.msra.mxu0 %v5154_v17  ;;  %4149 = vmatpush1.bf16.msra.mxu1 %v5156_v18  ;;  %v1091_v17 = vld [vmem:[%s6108_s26 + $0x900] sm:$0xff] }
 0x1cd   : > { %3986 = vmatprep.subr.bf16.mxu0 %v5163_v19  ;;  %4150 = vmatprep.subr.bf16.mxu1 %v5165_v20  ;;  %v1095_v18 = vld [vmem:[%s6108_s26 + $0x920] sm:$0xff]  ;;  %v1092_v19 = vld [vmem:[%s6108_s26 + $0x908] sm:$0xff] }
 0x1ce   : > { %v1096_v20 = vld [vmem:[%s6108_s26 + $0x928] sm:$0xff]  ;;  %v5211_v23 = vcombine.high %v1091_v17, %v1095_v18 }
 0x1cf   : > { %v5213_v24 = vcombine.high %v1092_v19, %v1096_v20 }
 0x1d0   : > { %3987 = vmatpush1.bf16.msra.mxu0 %v5162_v27  ;;  %4151 = vmatpush1.bf16.msra.mxu1 %v5164_v28  ;;  %v1100_v27 = vld [vmem:[%s6108_s26 + $0x948] sm:$0xff] }
 0x1d1   : > { %3988 = vmatprep.subr.bf16.mxu0 %v5171_v29  ;;  %4152 = vmatprep.subr.bf16.mxu1 %v5173_v30  ;;  %v1104_v28 = vld [vmem:[%s6108_s26 + $0x968] sm:$0xff]  ;;  %v5210_v29 = vcombine.low %v1091_v17, %v1095_v18  ;;  %v5212_v30 = vcombine.low %v1092_v19, %v1096_v20  ;;  %v1143_v17 = vld [vmem:[%s6108_s26 + $0xaa0] sm:$0xff] }
 0x1d2   : > { %v5221_v32 = vcombine.high %v1100_v27, %v1104_v28  ;;  %v1140_v18 = vld [vmem:[%s6108_s26 + $0xa88] sm:$0xff] }
 0x1d3   : > { %v1144_v19 = vld [vmem:[%s6108_s26 + $0xaa8] sm:$0xff] }
 0x1d4   : > { %3989 = vmatpush1.bf16.msra.mxu0 %v5170_v54  ;;  %4153 = vmatpush1.bf16.msra.mxu1 %v5172_v37  ;;  %v5218_v54 = vcombine.low %v1099_v25, %v1103_v26  ;;  %v5220_v37 = vcombine.low %v1100_v27, %v1104_v28  ;;  %v1151_v25 = vld [vmem:[%s6108_s26 + $0xae0] sm:$0xff]  ;;  %v1148_v26 = vld [vmem:[%s6108_s26 + $0xac8] sm:$0xff] }
 0x1d5   : > { %3999 = vmatprep.subr.bf16.mxu0 %v5179_v38  ;;  %4163 = vmatprep.subr.bf16.mxu1 %v5181_v39  ;;  %v5227_v38 = vcombine.high %v1107_v33, %v1111_v34  ;;  %v5229_v39 = vcombine.high %v1108_v35, %v1112_v36  ;;  %v1152_v27 = vld [vmem:[%s6108_s26 + $0xae8] sm:$0xff]  ;;  %v1159_v33 = vld [vmem:[%s6108_s26 + $0xb20] sm:$0xff] }
 0x1d6   : > { %v1156_v34 = vld [vmem:[%s6108_s26 + $0xb08] sm:$0xff] }
 0x1d7   : > { %3991 = vmatmul.mubr.bf16.vlgmr.msra.gmra.mrb[8].mxu0 %v6325_v50  ;;  %4155 = vmatmul.mubr.bf16.vlgmr.msra.gmra.mrb[8].mxu1 %v6325_v50 }
 0x1d8   : > { %4000 = vmatpush1.bf16.msra.mxu0 %v5178_v15  ;;  %4164 = vmatpush1.bf16.msra.mxu1 %v5180_v51  ;;  %v5228_v15 = vcombine.low %v1108_v35, %v1112_v36  ;;  %v5235_v51 = vcombine.high %v1115_v40, %v1119_v41  ;;  %v1160_v35 = vld [vmem:[%s6108_s26 + $0xb28] sm:$0xff]  ;;  %v1167_v40 = vld [vmem:[%s6108_s26 + $0xb60] sm:$0xff] }
 0x1d9   : > { %4001 = vmatprep.subr.bf16.mxu0 %v5187_v52  ;;  %4165 = vmatprep.subr.bf16.mxu1 %v5189_v53  ;;  %v5237_v52 = vcombine.high %v1116_v42, %v1120_v48  ;;  %v1123_v53 = vld [vmem:[%s6108_s26 + $0xa00] sm:$0xff]  ;;  %v1164_v41 = vld [vmem:[%s6108_s26 + $0xb48] sm:$0xff] }
 0x1da   : > { %4031 = vmatprep.mubr.bf16.mxu0 %v6331_v59  ;;  %4195 = vmatprep.mubr.bf16.mxu1 %v6331_v59  ;;  %v5242_v8 = vcombine.low %v1123_v53, %v1127_v55 }
 0x1dc   : > { %4002 = vmatpush1.bf16.msra.mxu0 %v5186_v60  ;;  %4166 = vmatpush1.bf16.msra.mxu1 %v5188_v62  ;;  %v5236_v60 = vcombine.low %v1116_v42, %v1120_v48  ;;  %v5243_v62 = vcombine.high %v1123_v53, %v1127_v55  ;;  %v1168_v42 = vld [vmem:[%s6108_s26 + $0xb68] sm:$0xff]  ;;  %v6382_v48 = vsub.s32 4, %v6206_v43  ;;  %v1171_v53 = vld [vmem:[%s6108_s26 + $0xb80] sm:$0xff] }
 0x1dd   : > { %4003 = vmatprep.subr.bf16.mxu0 %v5195_v63  ;;  %4167 = vmatprep.subr.bf16.mxu1 %v5197_v1  ;;  %v5245_v63 = vcombine.high %v1124_v56, %v1128_v57  ;;  %v1131_v1 = vld [vmem:[%s6108_s26 + $0xa40] sm:$0xff] }
 0x1de   : > { %v5250_v20 = vcombine.low %v1131_v1, %v1135_v2  ;;  %v1175_v55 = vld [vmem:[%s6108_s26 + $0xba0] sm:$0xff] }
 0x1e0   : > { %4004 = vmatpush1.bf16.msra.mxu0 %v5194_v9  ;;  %4168 = vmatpush1.bf16.msra.mxu1 %v5196_v10  ;;  %v5244_v9 = vcombine.low %v1124_v56, %v1128_v57  ;;  %v5251_v10 = vcombine.high %v1131_v1, %v1135_v2  ;;  %v1172_v56 = vld [vmem:[%s6108_s26 + $0xb88] sm:$0xff]  ;;  %v5291_v1 = vcombine.high %v1171_v53, %v1175_v55 }
 0x1e1   : > { %4005 = vmatprep.subr.bf16.mxu0 %v5203_v11  ;;  %4169 = vmatprep.subr.bf16.mxu1 %v5205_v16  ;;  %v5253_v11 = vcombine.high %v1132_v4, %v1136_v7  ;;  %v1139_v16 = vld [vmem:[%s6108_s26 + $0xa80] sm:$0xff]  ;;  %v1176_v57 = vld [vmem:[%s6108_s26 + $0xba8] sm:$0xff] }
 0x1e2   : > { %v5258_v28 = vcombine.low %v1139_v16, %v1143_v17  ;;  %v5293_v2 = vcombine.high %v1172_v56, %v1176_v57 }
 0x1e4   : > { %4006 = vmatpush1.bf16.msra.mxu0 %v5202_v21  ;;  %4170 = vmatpush1.bf16.msra.mxu1 %v5204_v22  ;;  %v5252_v21 = vcombine.low %v1132_v4, %v1136_v7  ;;  %v5259_v22 = vcombine.high %v1139_v16, %v1143_v17  ;;  %v1179_v4 = vld [vmem:[%s6108_s26 + $0xbc0] sm:$0xff]  ;;  %v5290_v16 = vcombine.low %v1171_v53, %v1175_v55  ;;  %v1212_v53 = vld [vmem:[%s6108_s26 + $0xcc8] sm:$0xff] }
 0x1e5   : > { %4007 = vmatprep.subr.bf16.mxu0 %v5211_v23  ;;  %4171 = vmatprep.subr.bf16.mxu1 %v5213_v24  ;;  %v5261_v23 = vcombine.high %v1140_v18, %v1144_v19  ;;  %v1147_v24 = vld [vmem:[%s6108_s26 + $0xac0] sm:$0xff]  ;;  %v5292_v17 = vcombine.low %v1172_v56, %v1176_v57  ;;  %v1216_v55 = vld [vmem:[%s6108_s26 + $0xce8] sm:$0xff] }
 0x1e6   : > { %v5266_v36 = vcombine.low %v1147_v24, %v1151_v25  ;;  %v1183_v7 = vld [vmem:[%s6108_s26 + $0xbe0] sm:$0xff] }
 0x1e8   : > { %4008 = vmatpush1.bf16.msra.mxu0 %v5210_v29  ;;  %4172 = vmatpush1.bf16.msra.mxu1 %v5212_v30  ;;  %v5260_v29 = vcombine.low %v1140_v18, %v1144_v19  ;;  %v5267_v30 = vcombine.high %v1147_v24, %v1151_v25  ;;  %v5299_v18 = vcombine.high %v1179_v4, %v1183_v7 }
 0x1e9   : > { %4009 = vmatprep.subr.bf16.mxu0 %v5219_v31  ;;  %4173 = vmatprep.subr.bf16.mxu1 %v5221_v32  ;;  %v5269_v31 = vcombine.high %v1148_v26, %v1152_v27  ;;  %v1155_v32 = vld [vmem:[%s6108_s26 + $0xb00] sm:$0xff] }
 0x1ec   : > { %4010 = vmatpush1.bf16.msra.mxu0 %v5218_v54  ;;  %4174 = vmatpush1.bf16.msra.mxu1 %v5220_v37  ;;  %v5268_v54 = vcombine.low %v1148_v26, %v1152_v27  ;;  %v5275_v37 = vcombine.high %v1155_v32, %v1159_v33 }
 0x1ed   : > { %4011 = vmatprep.subr.bf16.mxu0 %v5227_v38  ;;  %4175 = vmatprep.subr.bf16.mxu1 %v5229_v39  ;;  %v5277_v38 = vcombine.high %v1156_v34, %v1160_v35  ;;  %v1163_v39 = vld [vmem:[%s6108_s26 + $0xb40] sm:$0xff] }
 0x1f0   : > { %4012 = vmatpush1.bf16.msra.mxu0 %v5226_v49  ;;  %4176 = vmatpush1.bf16.msra.mxu1 %v5228_v15  ;;  %v5274_v49 = vcombine.low %v1155_v32, %v1159_v33  ;;  %v5276_v15 = vcombine.low %v1156_v34, %v1160_v35 }
 0x1f1   : > { %4013 = vmatprep.subr.bf16.mxu0 %v5235_v51  ;;  %4177 = vmatprep.subr.bf16.mxu1 %v5237_v52  ;;  %v5283_v51 = vcombine.high %v1163_v39, %v1167_v40  ;;  %v5285_v52 = vcombine.high %v1164_v41, %v1168_v42 }
 0x1f4   : > { %4014 = vmatpush1.bf16.msra.mxu0 %v5234_v58  ;;  %4178 = vmatpush1.bf16.msra.mxu1 %v5236_v60  ;;  %v524_v58 = vsub.s32 7, %v6206_v43  ;;  %v513_v60 = vrot.slane %v6212_v45, %v6382_v48 }
 0x1f5   : > { %4015 = vmatprep.subr.bf16.mxu0 %v5243_v62  ;;  %4179 = vmatprep.subr.bf16.mxu1 %v5245_v63  ;;  %v5282_v62 = vcombine.low %v1163_v39, %v1167_v40  ;;  %v5284_v63 = vcombine.low %v1164_v41, %v1168_v42  ;;  %v1208_v39 = vld [vmem:[%s6108_s26 + $0xca8] sm:$0xff] }
 0x1f8   : > { %4016 = vmatpush1.bf16.msra.mxu0 %v5242_v8  ;;  %4180 = vmatpush1.bf16.msra.mxu1 %v5244_v9  ;;  %v1180_v8 = vld [vmem:[%s6108_s26 + $0xbc8] sm:$0xff] }
 0x1f9   : > { %4017 = vmatprep.subr.bf16.mxu0 %v5251_v10  ;;  %4181 = vmatprep.subr.bf16.mxu1 %v5253_v11  ;;  %v1184_v9 = vld [vmem:[%s6108_s26 + $0xbe8] sm:$0xff]  ;;  %v525_v10 = vrot.slane %v6212_v45, %v524_v58  ;;  %v740_v11 = vadd.f32 %v6242_v14, %v513_v60  ;;  %v5298_v14 = vcombine.low %v1179_v4, %v1183_v7 }
 0x1fa   : > { %v5301_v19 = vcombine.high %v1180_v8, %v1184_v9  ;;  %v5300_v25 = vcombine.low %v1180_v8, %v1184_v9  ;;  %v1224_v4 = vld [vmem:[%s6108_s26 + $0xd28] sm:$0xff]  ;;  %v5332_v8 = vcombine.low %v1212_v53, %v1216_v55 }
 0x1fb   : > { %v783_v45 = vadd.f32 %v6272_v3, %v525_v10  ;;  %v791_v24 = vmax.f32 %v740_v11, 0.0  ;;  %v1227_v11 = vld [vmem:[%s6108_s26 + $0xd40] sm:$0xff] }
 0x1fc   : > { %4018 = vmatpush1.bf16.msra.mxu0 %v5250_v20  ;;  %4182 = vmatpush1.bf16.msra.mxu1 %v5252_v21  ;;  %v1187_v20 = vld [vmem:[%s6108_s26 + $0xc00] sm:$0xff] }
 0x1fd   : > { %4019 = vmatprep.subr.bf16.mxu0 %v5259_v22  ;;  %4183 = vmatprep.subr.bf16.mxu1 %v5261_v23  ;;  %v1191_v21 = vld [vmem:[%s6108_s26 + $0xc20] sm:$0xff]  ;;  %v1188_v22 = vld [vmem:[%s6108_s26 + $0xc08] sm:$0xff]  ;;  %v794_v32 = vmax.f32 %v783_v45, 0.0  ;;  %v6408_v33 = vpack.c.bf16 %v791_v24, %v791_v24 }
 0x1fe   : > { %v1192_v23 = vld [vmem:[%s6108_s26 + $0xc28] sm:$0xff]  ;;  %v5307_v26 = vcombine.high %v1187_v20, %v1191_v21  ;;  %v5306_v3 = vcombine.low %v1187_v20, %v1191_v21  ;;  %v1239_v45 = vld [vmem:[%s6108_s26 + $0xda0] sm:$0xff] }
 0x1ff   : > { %v5309_v27 = vcombine.high %v1188_v22, %v1192_v23  ;;  %v5308_v34 = vcombine.low %v1188_v22, %v1192_v23  ;;  %v6414_v40 = vpack.c.bf16 %v794_v32, %v794_v32  ;;  %v1235_v23 = vld [vmem:[%s6108_s26 + $0xd80] sm:$0xff]  ;;  %v1236_v24 = vld [vmem:[%s6108_s26 + $0xd88] sm:$0xff] }
 0x200   : > { %4020 = vmatpush1.bf16.msra.mxu0 %v5258_v28  ;;  %4184 = vmatpush1.bf16.msra.mxu1 %v5260_v29  ;;  %v1195_v28 = vld [vmem:[%s6108_s26 + $0xc40] sm:$0xff]  ;;  %v1248_v32 = vld [vmem:[%s6108_s26 + $0xde8] sm:$0xff] }
 0x201   : > { %4021 = vmatprep.subr.bf16.mxu0 %v5267_v30  ;;  %4185 = vmatprep.subr.bf16.mxu1 %v5269_v31  ;;  %v1199_v29 = vld [vmem:[%s6108_s26 + $0xc60] sm:$0xff]  ;;  %v1196_v30 = vld [vmem:[%s6108_s26 + $0xc48] sm:$0xff] }
 0x202   : > { %v1200_v31 = vld [vmem:[%s6108_s26 + $0xc68] sm:$0xff]  ;;  %v5315_v35 = vcombine.high %v1195_v28, %v1199_v29  ;;  %v5314_v41 = vcombine.low %v1195_v28, %v1199_v29  ;;  %v1243_v29 = vld [vmem:[%s6108_s26 + $0xdc0] sm:$0xff] }
 0x203   : > { %v5316_v42 = vcombine.low %v1196_v30, %v1200_v31 }
 0x204   : > { %4022 = vmatpush1.bf16.msra.mxu0 %v5266_v36  ;;  %4186 = vmatpush1.bf16.msra.mxu1 %v5268_v54  ;;  %v5317_v36 = vcombine.high %v1196_v30, %v1200_v31  ;;  %v1203_v54 = vld [vmem:[%s6108_s26 + $0xc80] sm:$0xff]  ;;  %v1244_v31 = vld [vmem:[%s6108_s26 + $0xdc8] sm:$0xff] }
 0x205   : > { %4023 = vmatprep.subr.bf16.mxu0 %v5275_v37  ;;  %4187 = vmatprep.subr.bf16.mxu1 %v5277_v38  ;;  %v1207_v37 = vld [vmem:[%s6108_s26 + $0xca0] sm:$0xff]  ;;  %v1204_v38 = vld [vmem:[%s6108_s26 + $0xc88] sm:$0xff] }
 0x206   : > { %v5322_v56 = vcombine.low %v1203_v54, %v1207_v37  ;;  %v5324_v57 = vcombine.low %v1204_v38, %v1208_v39  ;;  %v1247_v30 = vld [vmem:[%s6108_s26 + $0xde0] sm:$0xff] }
 0x208   : > { %4024 = vmatpush1.bf16.msra.mxu0 %v5274_v49  ;;  %4188 = vmatpush1.bf16.msra.mxu1 %v5276_v15  ;;  %v5323_v49 = vcombine.high %v1203_v54, %v1207_v37  ;;  %v5325_v15 = vcombine.high %v1204_v38, %v1208_v39  ;;  %v1251_v54 = vld [vmem:[%s6108_s26 + $0xe00] sm:$0xff]  ;;  %v1252_v38 = vld [vmem:[%s6108_s26 + $0xe08] sm:$0xff] }
 0x209   : > { %4025 = vmatprep.subr.bf16.mxu0 %v5283_v51  ;;  %4189 = vmatprep.subr.bf16.mxu1 %v5285_v52  ;;  %v1211_v51 = vld [vmem:[%s6108_s26 + $0xcc0] sm:$0xff]  ;;  %v1256_v39 = vld [vmem:[%s6108_s26 + $0xe28] sm:$0xff] }
 0x20a   : > { %v1215_v52 = vld [vmem:[%s6108_s26 + $0xce0] sm:$0xff] }
 0x20b   : > { %v5331_v60 = vcombine.high %v1211_v51, %v1215_v52  ;;  %v5330_v7 = vcombine.low %v1211_v51, %v1215_v52  ;;  %v1255_v37 = vld [vmem:[%s6108_s26 + $0xe20] sm:$0xff] }
 0x20c   : > { %4026 = vmatpush1.bf16.msra.mxu0 %v5282_v62  ;;  %4190 = vmatpush1.bf16.msra.mxu1 %v5284_v63  ;;  %v5333_v62 = vcombine.high %v1212_v53, %v1216_v55  ;;  %v1219_v63 = vld [vmem:[%s6108_s26 + $0xd00] sm:$0xff]  ;;  %v1260_v53 = vld [vmem:[%s6108_s26 + $0xe48] sm:$0xff] }
 0x20d   : > { %4027 = vmatprep.subr.bf16.mxu0 %v5291_v1  ;;  %4191 = vmatprep.subr.bf16.mxu1 %v5293_v2  ;;  %v1223_v1 = vld [vmem:[%s6108_s26 + $0xd20] sm:$0xff]  ;;  %v1220_v2 = vld [vmem:[%s6108_s26 + $0xd08] sm:$0xff] }
 0x20e   : > { %v5339_v9 = vcombine.high %v1219_v63, %v1223_v1  ;;  %v5341_v10 = vcombine.high %v1220_v2, %v1224_v4  ;;  %v5340_v20 = vcombine.low %v1220_v2, %v1224_v4  ;;  %v1259_v51 = vld [vmem:[%s6108_s26 + $0xe40] sm:$0xff]  ;;  %v1264_v55 = vld [vmem:[%s6108_s26 + $0xe68] sm:$0xff] }
 0x20f   : > { %v1263_v52 = vld [vmem:[%s6108_s26 + $0xe60] sm:$0xff]  ;;  %v1268_v2 = vld [vmem:[%s6108_s26 + $0xe88] sm:$0xff] }
 0x210   : > { %4028 = vmatpush1.bf16.msra.mxu0 %v5290_v16  ;;  %4192 = vmatpush1.bf16.msra.mxu1 %v5292_v17  ;;  %v1231_v16 = vld [vmem:[%s6108_s26 + $0xd60] sm:$0xff]  ;;  %v1228_v17 = vld [vmem:[%s6108_s26 + $0xd48] sm:$0xff] }
 0x211   : > { %4029 = vmatprep.subr.bf16.mxu0 %v5299_v18  ;;  %4193 = vmatprep.subr.bf16.mxu1 %v5301_v19  ;;  %v1232_v18 = vld [vmem:[%s6108_s26 + $0xd68] sm:$0xff]  ;;  %v5338_v19 = vcombine.low %v1219_v63, %v1223_v1  ;;  %v5347_v21 = vcombine.high %v1227_v11, %v1231_v16  ;;  %v1267_v63 = vld [vmem:[%s6108_s26 + $0xe80] sm:$0xff] }
 0x212   : > { %v5349_v22 = vcombine.high %v1228_v17, %v1232_v18  ;;  %v1271_v1 = vld [vmem:[%s6108_s26 + $0xea0] sm:$0xff]  ;;  %v1272_v4 = vld [vmem:[%s6108_s26 + $0xea8] sm:$0xff] }
 0x214   : > { %4030 = vmatpush1.bf16.msra.mxu0 %v5298_v14  ;;  %4194 = vmatpush1.bf16.msra.mxu1 %v5300_v25  ;;  %v1240_v14 = vld [vmem:[%s6108_s26 + $0xda8] sm:$0xff]  ;;  %v5346_v25 = vcombine.low %v1227_v11, %v1231_v16  ;;  %v1275_v11 = vld [vmem:[%s6108_s26 + $0xec0] sm:$0xff] }
 0x215   : > { %4040 = vmatprep.subr.bf16.mxu0 %v5307_v26  ;;  %4204 = vmatprep.subr.bf16.mxu1 %v5309_v27  ;;  %v5348_v26 = vcombine.low %v1228_v17, %v1232_v18  ;;  %v5355_v27 = vcombine.high %v1235_v23, %v1239_v45  ;;  %v5357_v28 = vcombine.high %v1236_v24, %v1240_v14  ;;  %v1279_v16 = vld [vmem:[%s6108_s26 + $0xee0] sm:$0xff]  ;;  %v1276_v17 = vld [vmem:[%s6108_s26 + $0xec8] sm:$0xff] }
 0x216   : > { %v1280_v18 = vld [vmem:[%s6108_s26 + $0xee8] sm:$0xff] }
 0x217   : > { %4032 = vmatmul.mubr.bf16.vlgmr.msra.gmra.mrb[8].mxu0 %v6408_v33  ;;  %4196 = vmatmul.mubr.bf16.vlgmr.msra.gmra.mrb[8].mxu1 %v6408_v33 }
 0x218   : > { %4041 = vmatpush1.bf16.msra.mxu0 %v5306_v3  ;;  %4205 = vmatpush1.bf16.msra.mxu1 %v5308_v34  ;;  %v5354_v3 = vcombine.low %v1235_v23, %v1239_v45  ;;  %v5356_v34 = vcombine.low %v1236_v24, %v1240_v14  ;;  %v1283_v23 = vld [vmem:[%s6108_s26 + $0xf00] sm:$0xff]  ;;  %v1284_v24 = vld [vmem:[%s6108_s26 + $0xf08] sm:$0xff] }
 0x219   : > { %4042 = vmatprep.subr.bf16.mxu0 %v5315_v35  ;;  %4206 = vmatprep.subr.bf16.mxu1 %v5317_v36  ;;  %v5363_v35 = vcombine.high %v1243_v29, %v1247_v30  ;;  %v5365_v36 = vcombine.high %v1244_v31, %v1248_v32  ;;  %v1287_v45 = vld [vmem:[%s6108_s26 + $0xf20] sm:$0xff]  ;;  %v1288_v14 = vld [vmem:[%s6108_s26 + $0xf28] sm:$0xff] }
 0x21a   : > { %4072 = vmatprep.mubr.bf16.mxu0 %v6414_v40  ;;  %4236 = vmatprep.mubr.bf16.mxu1 %v6414_v40 }
 0x21c   : > { %4043 = vmatpush1.bf16.msra.mxu0 %v5314_v41  ;;  %4207 = vmatpush1.bf16.msra.mxu1 %v5316_v42  ;;  %v5362_v41 = vcombine.low %v1243_v29, %v1247_v30  ;;  %v5364_v42 = vcombine.low %v1244_v31, %v1248_v32  ;;  %v1291_v29 = vld [vmem:[%s6108_s26 + $0xf40] sm:$0xff]  ;;  %v1292_v31 = vld [vmem:[%s6108_s26 + $0xf48] sm:$0xff] }
 0x21d   : > { %4044 = vmatprep.subr.bf16.mxu0 %v5323_v49  ;;  %4208 = vmatprep.subr.bf16.mxu1 %v5325_v15  ;;  %v5371_v49 = vcombine.high %v1251_v54, %v1255_v37  ;;  %v5373_v15 = vcombine.high %v1252_v38, %v1256_v39  ;;  %v1295_v30 = vld [vmem:[%s6108_s26 + $0xf60] sm:$0xff]  ;;  %v1296_v32 = vld [vmem:[%s6108_s26 + $0xf68] sm:$0xff] }
 0x220   : > { %4045 = vmatpush1.bf16.msra.mxu0 %v5322_v56  ;;  %4209 = vmatpush1.bf16.msra.mxu1 %v5324_v57  ;;  %v5370_v56 = vcombine.low %v1251_v54, %v1255_v37  ;;  %v5372_v57 = vcombine.low %v1252_v38, %v1256_v39  ;;  %v5413_v54 = vcombine.high %v1292_v31, %v1296_v32  ;;  %v1299_v37 = vld [vmem:[%s6108_s26 + $0xf80] sm:$0xff]  ;;  %v1300_v39 = vld [vmem:[%s6108_s26 + $0xf88] sm:$0xff] }
 0x221   : > { %4046 = vmatprep.subr.bf16.mxu0 %v5331_v60  ;;  %4210 = vmatprep.subr.bf16.mxu1 %v5333_v62  ;;  %v5379_v60 = vcombine.high %v1259_v51, %v1263_v52  ;;  %v5381_v62 = vcombine.high %v1260_v53, %v1264_v55  ;;  %v1303_v38 = vld [vmem:[%s6108_s26 + $0xfa0] sm:$0xff] }
 0x224   : > { %4047 = vmatpush1.bf16.msra.mxu0 %v5330_v7  ;;  %4211 = vmatpush1.bf16.msra.mxu1 %v5332_v8  ;;  %v5378_v7 = vcombine.low %v1259_v51, %v1263_v52  ;;  %v5380_v8 = vcombine.low %v1260_v53, %v1264_v55  ;;  %v5419_v52 = vcombine.high %v1299_v37, %v1303_v38  ;;  %v1307_v55 = vld [vmem:[%s6108_s26 + $0xfc0] sm:$0xff] }
 0x225   : > { %4048 = vmatprep.subr.bf16.mxu0 %v5339_v9  ;;  %4212 = vmatprep.subr.bf16.mxu1 %v5341_v10  ;;  %v5387_v9 = vcombine.high %v1267_v63, %v1271_v1  ;;  %v5389_v10 = vcombine.high %v1268_v2, %v1272_v4 }
 0x228   : > { %4049 = vmatpush1.bf16.msra.mxu0 %v5338_v19  ;;  %4213 = vmatpush1.bf16.msra.mxu1 %v5340_v20  ;;  %v5386_v19 = vcombine.low %v1267_v63, %v1271_v1  ;;  %v5388_v20 = vcombine.low %v1268_v2, %v1272_v4 }
 0x229   : > { %4050 = vmatprep.subr.bf16.mxu0 %v5347_v21  ;;  %4214 = vmatprep.subr.bf16.mxu1 %v5349_v22  ;;  %v5395_v21 = vcombine.high %v1275_v11, %v1279_v16  ;;  %v5397_v22 = vcombine.high %v1276_v17, %v1280_v18 }
 0x22c   : > { %4051 = vmatpush1.bf16.msra.mxu0 %v5346_v25  ;;  %4215 = vmatpush1.bf16.msra.mxu1 %v5348_v26  ;;  %v5394_v25 = vcombine.low %v1275_v11, %v1279_v16  ;;  %v5396_v26 = vcombine.low %v1276_v17, %v1280_v18 }
 0x22d   : > { %4052 = vmatprep.subr.bf16.mxu0 %v5355_v27  ;;  %4216 = vmatprep.subr.bf16.mxu1 %v5357_v28  ;;  %v5403_v27 = vcombine.high %v1283_v23, %v1287_v45  ;;  %v5405_v28 = vcombine.high %v1284_v24, %v1288_v14 }
 0x230   : > { %4053 = vmatpush1.bf16.msra.mxu0 %v5354_v3  ;;  %4217 = vmatpush1.bf16.msra.mxu1 %v5356_v34  ;;  %v5402_v3 = vcombine.low %v1283_v23, %v1287_v45  ;;  %v5404_v34 = vcombine.low %v1284_v24, %v1288_v14 }
 0x231   : > { %4054 = vmatprep.subr.bf16.mxu0 %v5363_v35  ;;  %4218 = vmatprep.subr.bf16.mxu1 %v5365_v36  ;;  %v6465_v35 = vsub.s32 6, %v6206_v43  ;;  %v5411_v36 = vcombine.high %v1291_v29, %v1295_v30 }
 0x234   : > { %4055 = vmatpush1.bf16.msra.mxu0 %v5362_v41  ;;  %4219 = vmatpush1.bf16.msra.mxu1 %v5364_v42  ;;  %v1304_v41 = vld [vmem:[%s6108_s26 + $0xfa8] sm:$0xff]  ;;  %v5410_v42 = vcombine.low %v1291_v29, %v1295_v30  ;;  %v826_v29 = vld [vmem:[%s6108_s26 + $0xb8] sm:$0xff] }
 0x235   : > { %4056 = vmatprep.subr.bf16.mxu0 %v5371_v49  ;;  %4220 = vmatprep.subr.bf16.mxu1 %v5373_v15  ;;  %v5412_v49 = vcombine.low %v1292_v31, %v1296_v32  ;;  %v5591_v15 = vld [vmem:[%s6106_s16] sm:$0xff]  ;;  %v5421_v53 = vcombine.high %v1300_v39, %v1304_v41  ;;  %v5420_v63 = vcombine.low %v1300_v39, %v1304_v41 }
 0x236   : > { %v521_v51 = vrot.slane %v5591_v15, %v6465_v35  ;;  %v838_v15 = vld [vmem:[%s6108_s26 + $0x118] sm:$0xff] }
 0x238   : > { %4057 = vmatpush1.bf16.msra.mxu0 %v5370_v56  ;;  %4221 = vmatpush1.bf16.msra.mxu1 %v5372_v57  ;;  %v1311_v56 = vld [vmem:[%s6108_s26 + $0xfe0] sm:$0xff]  ;;  %v1308_v57 = vld [vmem:[%s6108_s26 + $0xfc8] sm:$0xff]  ;;  %v781_v1 = vadd.f32 %v6267_v61, %v521_v51  ;;  %v842_v51 = vld [vmem:[%s6108_s26 + $0x138] sm:$0xff] }
 0x239   : > { %4058 = vmatprep.subr.bf16.mxu0 %v5379_v60  ;;  %4222 = vmatprep.subr.bf16.mxu1 %v5381_v62  ;;  %v1312_v60 = vld [vmem:[%s6108_s26 + $0xfe8] sm:$0xff]  ;;  %v5418_v62 = vcombine.low %v1299_v37, %v1303_v38  ;;  %v5427_v2 = vcombine.high %v1307_v55, %v1311_v56  ;;  %v5426_v11 = vcombine.low %v1307_v55, %v1311_v56  ;;  %v834_v37 = vld [vmem:[%s6108_s26 + $0xf8] sm:$0xff] }
 0x23a   : > { %v5429_v4 = vcombine.high %v1308_v57, %v1312_v60  ;;  %v5428_v16 = vcombine.low %v1308_v57, %v1312_v60  ;;  %v793_v17 = vmax.f32 %v781_v1, 0.0  ;;  %v4961_v56 = vcombine.high %v838_v15, %v842_v51  ;;  %v845_v57 = vld [vmem:[%s6108_s26 + $0x150] sm:$0xff] }
 0x23b   : > { %v849_v60 = vld [vmem:[%s6108_s26 + $0x170] sm:$0xff] }
 0x23c   : > { %4059 = vmatpush1.bf16.msra.mxu0 %v5378_v7  ;;  %4223 = vmatpush1.bf16.msra.mxu1 %v5380_v8  ;;  %v805_v7 = vld [vmem:[%s6108_s26 + $0x10] sm:$0xff]  ;;  %v6486_v45 = vpack.c.bf16 %v793_v17, %v793_v17 }
 0x23d   : > { %4060 = vmatprep.subr.bf16.mxu0 %v5387_v9  ;;  %4224 = vmatprep.subr.bf16.mxu1 %v5389_v10  ;;  %v809_v8 = vld [vmem:[%s6108_s26 + $0x30] sm:$0xff]  ;;  %v806_v9 = vld [vmem:[%s6108_s26 + $0x18] sm:$0xff] }
 0x23e   : > { %v810_v10 = vld [vmem:[%s6108_s26 + $0x38] sm:$0xff]  ;;  %v4927_v61 = vcombine.high %v805_v7, %v809_v8  ;;  %v4926_v23 = vcombine.low %v805_v7, %v809_v8  ;;  %v853_v8 = vld [vmem:[%s6108_s26 + $0x190] sm:$0xff] }
 0x23f   : > { %v4929_v18 = vcombine.high %v806_v9, %v810_v10  ;;  %v4928_v24 = vcombine.low %v806_v9, %v810_v10  ;;  %v857_v9 = vld [vmem:[%s6108_s26 + $0x1b0] sm:$0xff]  ;;  %v854_v10 = vld [vmem:[%s6108_s26 + $0x198] sm:$0xff] }
 0x240   : > { %4061 = vmatpush1.bf16.msra.mxu0 %v5386_v19  ;;  %4225 = vmatpush1.bf16.msra.mxu1 %v5388_v20  ;;  %v813_v19 = vld [vmem:[%s6108_s26 + $0x50] sm:$0xff] }
 0x241   : > { %4062 = vmatprep.subr.bf16.mxu0 %v5395_v21  ;;  %4226 = vmatprep.subr.bf16.mxu1 %v5397_v22  ;;  %v817_v20 = vld [vmem:[%s6108_s26 + $0x70] sm:$0xff]  ;;  %v814_v21 = vld [vmem:[%s6108_s26 + $0x58] sm:$0xff] }
 0x242   : > { %v818_v22 = vld [vmem:[%s6108_s26 + $0x78] sm:$0xff]  ;;  %v4935_v14 = vcombine.high %v813_v19, %v817_v20  ;;  %v4934_v30 = vcombine.low %v813_v19, %v817_v20  ;;  %v861_v19 = vld [vmem:[%s6108_s26 + $0x1d0] sm:$0xff] }
 0x243   : > { %v4936_v31 = vcombine.low %v814_v21, %v818_v22  ;;  %v865_v20 = vld [vmem:[%s6108_s26 + $0x1f0] sm:$0xff] }
 0x244   : > { %4063 = vmatpush1.bf16.msra.mxu0 %v5394_v25  ;;  %4227 = vmatpush1.bf16.msra.mxu1 %v5396_v26  ;;  %v4937_v25 = vcombine.high %v814_v21, %v818_v22  ;;  %v821_v26 = vld [vmem:[%s6108_s26 + $0x90] sm:$0xff]  ;;  %v862_v21 = vld [vmem:[%s6108_s26 + $0x1d8] sm:$0xff] }
 0x245   : > { %4064 = vmatprep.subr.bf16.mxu0 %v5403_v27  ;;  %4228 = vmatprep.subr.bf16.mxu1 %v5405_v28  ;;  %v825_v27 = vld [vmem:[%s6108_s26 + $0xb0] sm:$0xff]  ;;  %v822_v28 = vld [vmem:[%s6108_s26 + $0x98] sm:$0xff] }
 0x246   : > { %v4943_v32 = vcombine.high %v821_v26, %v825_v27  ;;  %v4942_v38 = vcombine.low %v821_v26, %v825_v27  ;;  %v4944_v39 = vcombine.low %v822_v28, %v826_v29  ;;  %v866_v22 = vld [vmem:[%s6108_s26 + $0x1f8] sm:$0xff]  ;;  %v869_v26 = vld [vmem:[%s6108_s26 + $0x210] sm:$0xff] }
 0x247   : > { %v873_v27 = vld [vmem:[%s6108_s26 + $0x230] sm:$0xff] }
 0x248   : > { %4065 = vmatpush1.bf16.msra.mxu0 %v5402_v3  ;;  %4229 = vmatpush1.bf16.msra.mxu1 %v5404_v34  ;;  %v4945_v3 = vcombine.high %v822_v28, %v826_v29  ;;  %v829_v34 = vld [vmem:[%s6108_s26 + $0xd0] sm:$0xff]  ;;  %v870_v28 = vld [vmem:[%s6108_s26 + $0x218] sm:$0xff] }
 0x249   : > { %4066 = vmatprep.subr.bf16.mxu0 %v5411_v36  ;;  %4230 = vmatprep.subr.bf16.mxu1 %v5413_v54  ;;  %v833_v36 = vld [vmem:[%s6108_s26 + $0xf0] sm:$0xff]  ;;  %v830_v54 = vld [vmem:[%s6108_s26 + $0xd8] sm:$0xff] }
 0x24a   : > { %v4953_v41 = vcombine.high %v830_v54, %v834_v37  ;;  %v874_v29 = vld [vmem:[%s6108_s26 + $0x238] sm:$0xff] }
 0x24c   : > { %4067 = vmatpush1.bf16.msra.mxu0 %v5410_v42  ;;  %4231 = vmatpush1.bf16.msra.mxu1 %v5412_v49  ;;  %v837_v42 = vld [vmem:[%s6108_s26 + $0x110] sm:$0xff] }
 0x24d   : > { %4068 = vmatprep.subr.bf16.mxu0 %v5419_v52  ;;  %4232 = vmatprep.subr.bf16.mxu1 %v5421_v53  ;;  %v841_v49 = vld [vmem:[%s6108_s26 + $0x130] sm:$0xff]  ;;  %v4950_v52 = vcombine.low %v829_v34, %v833_v36  ;;  %v4952_v53 = vcombine.low %v830_v54, %v834_v37  ;;  %v878_v54 = vld [vmem:[%s6108_s26 + $0x258] sm:$0xff] }
 0x24e   : > { %v4959_v55 = vcombine.high %v837_v42, %v841_v49  ;;  %v4958_v1 = vcombine.low %v837_v42, %v841_v49  ;;  %v882_v37 = vld [vmem:[%s6108_s26 + $0x278] sm:$0xff]  ;;  %v885_v42 = vld [vmem:[%s6108_s26 + $0x290] sm:$0xff] }
 0x24f   : > { %v889_v49 = vld [vmem:[%s6108_s26 + $0x2b0] sm:$0xff] }
 0x250   : > { %4069 = vmatpush1.bf16.msra.mxu0 %v5418_v62  ;;  %4233 = vmatpush1.bf16.msra.mxu1 %v5420_v63  ;;  %v846_v62 = vld [vmem:[%s6108_s26 + $0x158] sm:$0xff] }
 0x251   : > { %4070 = vmatprep.subr.bf16.mxu0 %v5427_v2  ;;  %4234 = vmatprep.subr.bf16.mxu1 %v5429_v4  ;;  %v850_v63 = vld [vmem:[%s6108_s26 + $0x178] sm:$0xff]  ;;  %v4960_v2 = vcombine.low %v838_v15, %v842_v51  ;;  %v4967_v4 = vcombine.high %v845_v57, %v849_v60 }
 0x252   : > { %v4969_v7 = vcombine.high %v846_v62, %v850_v63  ;;  %v4968_v17 = vcombine.low %v846_v62, %v850_v63  ;;  %v886_v15 = vld [vmem:[%s6108_s26 + $0x298] sm:$0xff] }
 0x253   : > { %v890_v51 = vld [vmem:[%s6108_s26 + $0x2b8] sm:$0xff] }
 0x254   : > { %4071 = vmatpush1.bf16.msra.mxu0 %v5426_v11  ;;  %4235 = vmatpush1.bf16.msra.mxu1 %v5428_v16  ;;  %v858_v11 = vld [vmem:[%s6108_s26 + $0x1b8] sm:$0xff]  ;;  %v4966_v16 = vcombine.low %v845_v57, %v849_v60  ;;  %v893_v57 = vld [vmem:[%s6108_s26 + $0x2d0] sm:$0xff] }
 0x255   : > { %4245 = vmatprep.subr.bf16.mxu0 %v4927_v61  ;;  %4409 = vmatprep.subr.bf16.mxu1 %v4929_v18  ;;  %v4975_v61 = vcombine.high %v853_v8, %v857_v9  ;;  %v4977_v18 = vcombine.high %v854_v10, %v858_v11  ;;  %v897_v60 = vld [vmem:[%s6108_s26 + $0x2f0] sm:$0xff]  ;;  %v894_v62 = vld [vmem:[%s6108_s26 + $0x2d8] sm:$0xff] }
 0x256   : > { %v898_v63 = vld [vmem:[%s6108_s26 + $0x2f8] sm:$0xff] }
 0x257   : > { %4073 = vmatmul.mubr.bf16.vlgmr.msra.gmra.mrb[8].mxu0 %v6486_v45  ;;  %4237 = vmatmul.mubr.bf16.vlgmr.msra.gmra.mrb[8].mxu1 %v6486_v45 }
 0x258   : > { %4246 = vmatpush1.bf16.msra.mxu0 %v4926_v23  ;;  %4277 = vmatprep.mubr.bf16.mxu0 %v6230_v5  ;;  %v4974_v23 = vcombine.low %v853_v8, %v857_v9  ;;  %v901_v8 = vld [vmem:[%s6108_s26 + $0x310] sm:$0xff] }
 0x259   : > { %4410 = vmatpush1.bf16.msra.mxu1 %v4928_v24  ;;  %4441 = vmatprep.mubr.bf16.mxu1 %v6230_v5  ;;  %v4951_v5 = vcombine.high %v829_v34, %v833_v36  ;;  %v4976_v24 = vcombine.low %v854_v10, %v858_v11  ;;  %v877_v34 = vld [vmem:[%s6108_s26 + $0x250] sm:$0xff]  ;;  %v902_v10 = vld [vmem:[%s6108_s26 + $0x318] sm:$0xff] }
 0x25a   : > { %4247 = vmatprep.subr.bf16.mxu0 %v4935_v14  ;;  %4411 = vmatprep.subr.bf16.mxu1 %v4937_v25  ;;  %v4983_v14 = vcombine.high %v861_v19, %v865_v20  ;;  %v4985_v25 = vcombine.high %v862_v21, %v866_v22  ;;  %v881_v36 = vld [vmem:[%s6108_s26 + $0x270] sm:$0xff]  ;;  %v906_v11 = vld [vmem:[%s6108_s26 + $0x338] sm:$0xff] }
 0x25b   : > { %v905_v9 = vld [vmem:[%s6108_s26 + $0x330] sm:$0xff] }
 0x25c   : > { %4248 = vmatpush1.bf16.msra.mxu0 %v4934_v30  ;;  %v4982_v30 = vcombine.low %v861_v19, %v865_v20  ;;  %v909_v19 = vld [vmem:[%s6108_s26 + $0x350] sm:$0xff] }
 0x25d   : > { %4412 = vmatpush1.bf16.msra.mxu1 %v4936_v31  ;;  %4249 = vmatprep.subr.bf16.mxu0 %v4943_v32  ;;  %v4984_v31 = vcombine.low %v862_v21, %v866_v22  ;;  %v4991_v32 = vcombine.high %v869_v26, %v873_v27  ;;  %v913_v20 = vld [vmem:[%s6108_s26 + $0x370] sm:$0xff]  ;;  %v910_v21 = vld [vmem:[%s6108_s26 + $0x358] sm:$0xff] }
 0x25e   : > { %4413 = vmatprep.subr.bf16.mxu1 %v4945_v3  ;;  %v4993_v3 = vcombine.high %v870_v28, %v874_v29  ;;  %v914_v22 = vld [vmem:[%s6108_s26 + $0x378] sm:$0xff] }
 0x260   : > { %4250 = vmatpush1.bf16.msra.mxu0 %v4942_v38  ;;  %v4990_v38 = vcombine.low %v869_v26, %v873_v27  ;;  %v917_v26 = vld [vmem:[%s6108_s26 + $0x390] sm:$0xff] }
 0x261   : > { %4414 = vmatpush1.bf16.msra.mxu1 %v4944_v39  ;;  %4251 = vmatprep.subr.bf16.mxu0 %v4951_v5  ;;  %v4992_v39 = vcombine.low %v870_v28, %v874_v29  ;;  %v4999_v5 = vcombine.high %v877_v34, %v881_v36  ;;  %v921_v27 = vld [vmem:[%s6108_s26 + $0x3b0] sm:$0xff]  ;;  %v918_v28 = vld [vmem:[%s6108_s26 + $0x398] sm:$0xff] }
 0x262   : > { %4415 = vmatprep.subr.bf16.mxu1 %v4953_v41  ;;  %v5001_v41 = vcombine.high %v878_v54, %v882_v37  ;;  %v922_v29 = vld [vmem:[%s6108_s26 + $0x3b8] sm:$0xff] }
 0x264   : > { %4252 = vmatpush1.bf16.msra.mxu0 %v4950_v52  ;;  %v4998_v52 = vcombine.low %v877_v34, %v881_v36  ;;  %v925_v34 = vld [vmem:[%s6108_s26 + $0x3d0] sm:$0xff] }
 0x265   : > { %4416 = vmatpush1.bf16.msra.mxu1 %v4952_v53  ;;  %4253 = vmatprep.subr.bf16.mxu0 %v4959_v55  ;;  %v5000_v53 = vcombine.low %v878_v54, %v882_v37  ;;  %v5007_v55 = vcombine.high %v885_v42, %v889_v49  ;;  %v929_v36 = vld [vmem:[%s6108_s26 + $0x3f0] sm:$0xff]  ;;  %v926_v54 = vld [vmem:[%s6108_s26 + $0x3d8] sm:$0xff] }
 0x266   : > { %4417 = vmatprep.subr.bf16.mxu1 %v4961_v56  ;;  %v5009_v56 = vcombine.high %v886_v15, %v890_v51  ;;  %v930_v37 = vld [vmem:[%s6108_s26 + $0x3f8] sm:$0xff] }
 0x268   : > { %4254 = vmatpush1.bf16.msra.mxu0 %v4958_v1  ;;  %v5006_v1 = vcombine.low %v885_v42, %v889_v49  ;;  %v933_v42 = vld [vmem:[%s6108_s26 + $0x410] sm:$0xff] }
 0x269   : > { %4418 = vmatpush1.bf16.msra.mxu1 %v4960_v2  ;;  %4255 = vmatprep.subr.bf16.mxu0 %v4967_v4  ;;  %v5008_v2 = vcombine.low %v886_v15, %v890_v51  ;;  %v5015_v4 = vcombine.high %v893_v57, %v897_v60  ;;  %v937_v49 = vld [vmem:[%s6108_s26 + $0x430] sm:$0xff]  ;;  %v934_v15 = vld [vmem:[%s6108_s26 + $0x418] sm:$0xff] }
 0x26a   : > { %4419 = vmatprep.subr.bf16.mxu1 %v4969_v7  ;;  %v5017_v7 = vcombine.high %v894_v62, %v898_v63  ;;  %v938_v51 = vld [vmem:[%s6108_s26 + $0x438] sm:$0xff] }
 0x26c   : > { %4256 = vmatpush1.bf16.msra.mxu0 %v4966_v16  ;;  %v5014_v16 = vcombine.low %v893_v57, %v897_v60  ;;  %v941_v57 = vld [vmem:[%s6108_s26 + $0x450] sm:$0xff] }
 0x26d   : > { %4420 = vmatpush1.bf16.msra.mxu1 %v4968_v17  ;;  %4257 = vmatprep.subr.bf16.mxu0 %v4975_v61  ;;  %v5016_v17 = vcombine.low %v894_v62, %v898_v63  ;;  %v5023_v61 = vcombine.high %v901_v8, %v905_v9  ;;  %v945_v60 = vld [vmem:[%s6108_s26 + $0x470] sm:$0xff]  ;;  %v5054_v62 = vcombine.low %v933_v42, %v937_v49  ;;  %v942_v63 = vld [vmem:[%s6108_s26 + $0x458] sm:$0xff] }
 0x26e   : > { %4421 = vmatprep.subr.bf16.mxu1 %v4977_v18  ;;  %v5025_v18 = vcombine.high %v902_v10, %v906_v11 }
 0x270   : > { %4258 = vmatpush1.bf16.msra.mxu0 %v4974_v23  ;;  %v5022_v23 = vcombine.low %v901_v8, %v905_v9  ;;  %v953_v8 = vld [vmem:[%s6108_s26 + $0x4b0] sm:$0xff] }
 0x271   : > { %4422 = vmatpush1.bf16.msra.mxu1 %v4976_v24  ;;  %4259 = vmatprep.subr.bf16.mxu0 %v4983_v14  ;;  %v5024_v24 = vcombine.low %v902_v10, %v906_v11  ;;  %v5031_v14 = vcombine.high %v909_v19, %v913_v20  ;;  %v950_v10 = vld [vmem:[%s6108_s26 + $0x498] sm:$0xff] }
 0x272   : > { %4423 = vmatprep.subr.bf16.mxu1 %v4985_v25  ;;  %v5033_v25 = vcombine.high %v910_v21, %v914_v22  ;;  %v954_v11 = vld [vmem:[%s6108_s26 + $0x4b8] sm:$0xff] }
 0x274   : > { %4260 = vmatpush1.bf16.msra.mxu0 %v4982_v30  ;;  %v5030_v30 = vcombine.low %v909_v19, %v913_v20  ;;  %v957_v19 = vld [vmem:[%s6108_s26 + $0x4d0] sm:$0xff] }
 0x275   : > { %4424 = vmatpush1.bf16.msra.mxu1 %v4984_v31  ;;  %4261 = vmatprep.subr.bf16.mxu0 %v4991_v32  ;;  %v5032_v31 = vcombine.low %v910_v21, %v914_v22  ;;  %v5039_v32 = vcombine.high %v917_v26, %v921_v27  ;;  %v961_v20 = vld [vmem:[%s6108_s26 + $0x4f0] sm:$0xff]  ;;  %v958_v21 = vld [vmem:[%s6108_s26 + $0x4d8] sm:$0xff] }
 0x276   : > { %4425 = vmatprep.subr.bf16.mxu1 %v4993_v3  ;;  %v5041_v3 = vcombine.high %v918_v28, %v922_v29 }
 0x278   : > { %4262 = vmatpush1.bf16.msra.mxu0 %v4990_v38  ;;  %v5038_v38 = vcombine.low %v917_v26, %v921_v27  ;;  %v966_v26 = vld [vmem:[%s6108_s26 + $0x518] sm:$0xff] }
 0x279   : > { %4426 = vmatpush1.bf16.msra.mxu1 %v4992_v39  ;;  %4263 = vmatprep.subr.bf16.mxu0 %v4999_v5  ;;  %v5040_v39 = vcombine.low %v918_v28, %v922_v29  ;;  %v5047_v5 = vcombine.high %v925_v34, %v929_v36  ;;  %v970_v27 = vld [vmem:[%s6108_s26 + $0x538] sm:$0xff]  ;;  %v5078_v28 = vcombine.low %v957_v19, %v961_v20 }
 0x27a   : > { %4427 = vmatprep.subr.bf16.mxu1 %v5001_v41  ;;  %v5049_v41 = vcombine.high %v926_v54, %v930_v37 }
 0x27c   : > { %4264 = vmatpush1.bf16.msra.mxu0 %v4998_v52  ;;  %v5046_v52 = vcombine.low %v925_v34, %v929_v36  ;;  %v974_v34 = vld [vmem:[%s6108_s26 + $0x558] sm:$0xff] }
 0x27d   : > { %4428 = vmatpush1.bf16.msra.mxu1 %v5000_v53  ;;  %4265 = vmatprep.subr.bf16.mxu0 %v5007_v55  ;;  %v5048_v53 = vcombine.low %v926_v54, %v930_v37  ;;  %v5055_v55 = vcombine.high %v933_v42, %v937_v49  ;;  %v978_v36 = vld [vmem:[%s6108_s26 + $0x578] sm:$0xff]  ;;  %v5088_v37 = vcombine.low %v966_v26, %v970_v27 }
 0x27e   : > { %4429 = vmatprep.subr.bf16.mxu1 %v5009_v56  ;;  %v5057_v56 = vcombine.high %v934_v15, %v938_v51  ;;  %v982_v42 = vld [vmem:[%s6108_s26 + $0x598] sm:$0xff] }
 0x27f   : > { %v986_v49 = vld [vmem:[%s6108_s26 + $0x5b8] sm:$0xff] }
 0x280   : > { %4266 = vmatpush1.bf16.msra.mxu0 %v5006_v1  ;;  %v946_v1 = vld [vmem:[%s6108_s26 + $0x478] sm:$0xff] }
 0x281   : > { %4430 = vmatpush1.bf16.msra.mxu1 %v5008_v2  ;;  %4267 = vmatprep.subr.bf16.mxu0 %v5015_v4  ;;  %v5056_v2 = vcombine.low %v934_v15, %v938_v51  ;;  %v5063_v4 = vcombine.high %v941_v57, %v945_v60  ;;  %v5065_v9 = vcombine.high %v942_v63, %v946_v1 }
 0x282   : > { %4431 = vmatprep.subr.bf16.mxu1 %v5017_v7  ;;  %v949_v7 = vld [vmem:[%s6108_s26 + $0x490] sm:$0xff]  ;;  %v5096_v51 = vcombine.low %v974_v34, %v978_v36 }
 0x283   : > { %v5070_v22 = vcombine.low %v949_v7, %v953_v8 }
 0x284   : > { %4268 = vmatpush1.bf16.msra.mxu0 %v5014_v16  ;;  %v5062_v16 = vcombine.low %v941_v57, %v945_v60  ;;  %v990_v57 = vld [vmem:[%s6108_s26 + $0x5d8] sm:$0xff] }
 0x285   : > { %4432 = vmatpush1.bf16.msra.mxu1 %v5016_v17  ;;  %4269 = vmatprep.subr.bf16.mxu0 %v5023_v61  ;;  %v5064_v17 = vcombine.low %v942_v63, %v946_v1  ;;  %v5071_v61 = vcombine.high %v949_v7, %v953_v8  ;;  %v994_v60 = vld [vmem:[%s6108_s26 + $0x5f8] sm:$0xff]  ;;  %v5104_v63 = vcombine.low %v982_v42, %v986_v49  ;;  %v1001_v7 = vld [vmem:[%s6108_s26 + $0x630] sm:$0xff] }
 0x286   : > { %4433 = vmatprep.subr.bf16.mxu1 %v5025_v18  ;;  %v5073_v18 = vcombine.high %v950_v10, %v954_v11  ;;  %v998_v8 = vld [vmem:[%s6108_s26 + $0x618] sm:$0xff] }
 0x288   : > { %4270 = vmatpush1.bf16.msra.mxu0 %v5022_v23  ;;  %v5072_v23 = vcombine.low %v950_v10, %v954_v11  ;;  %v5112_v11 = vcombine.low %v990_v57, %v994_v60 }
 0x289   : > { %4434 = vmatpush1.bf16.msra.mxu1 %v5024_v24  ;;  %4271 = vmatprep.subr.bf16.mxu0 %v5031_v14  ;;  %v5079_v24 = vcombine.high %v957_v19, %v961_v20  ;;  %v965_v14 = vld [vmem:[%s6108_s26 + $0x510] sm:$0xff]  ;;  %v1006_v19 = vld [vmem:[%s6108_s26 + $0x658] sm:$0xff] }
 0x28a   : > { %4435 = vmatprep.subr.bf16.mxu1 %v5033_v25  ;;  %v969_v25 = vld [vmem:[%s6108_s26 + $0x530] sm:$0xff]  ;;  %v1010_v20 = vld [vmem:[%s6108_s26 + $0x678] sm:$0xff] }
 0x28b   : > { %v5086_v54 = vcombine.low %v965_v14, %v969_v25 }
 0x28c   : > { %4272 = vmatpush1.bf16.msra.mxu0 %v5030_v30  ;;  %v5087_v30 = vcombine.high %v965_v14, %v969_v25  ;;  %v1014_v14 = vld [vmem:[%s6108_s26 + $0x698] sm:$0xff] }
 0x28d   : > { %4436 = vmatpush1.bf16.msra.mxu1 %v5032_v31  ;;  %4273 = vmatprep.subr.bf16.mxu0 %v5039_v32  ;;  %v5089_v31 = vcombine.high %v966_v26, %v970_v27  ;;  %v973_v32 = vld [vmem:[%s6108_s26 + $0x550] sm:$0xff]  ;;  %v1018_v25 = vld [vmem:[%s6108_s26 + $0x6b8] sm:$0xff]  ;;  %v5128_v27 = vcombine.low %v1006_v19, %v1010_v20 }
 0x28e   : > { %4437 = vmatprep.subr.bf16.mxu1 %v5041_v3  ;;  %v977_v3 = vld [vmem:[%s6108_s26 + $0x570] sm:$0xff] }
 0x28f   : > { %v5094_v15 = vcombine.low %v973_v32, %v977_v3 }
 0x290   : > { %4274 = vmatpush1.bf16.msra.mxu0 %v5038_v38  ;;  %v5095_v38 = vcombine.high %v973_v32, %v977_v3  ;;  %v1022_v32 = vld [vmem:[%s6108_s26 + $0x6d8] sm:$0xff] }
 0x291   : > { %4438 = vmatpush1.bf16.msra.mxu1 %v5040_v39  ;;  %4275 = vmatprep.subr.bf16.mxu0 %v5047_v5  ;;  %v5097_v39 = vcombine.high %v974_v34, %v978_v36  ;;  %v981_v5 = vld [vmem:[%s6108_s26 + $0x590] sm:$0xff]  ;;  %v1026_v3 = vld [vmem:[%s6108_s26 + $0x6f8] sm:$0xff]  ;;  %v5136_v36 = vcombine.low %v1014_v14, %v1018_v25 }
 0x292   : > { %4439 = vmatprep.subr.bf16.mxu1 %v5049_v41  ;;  %v985_v41 = vld [vmem:[%s6108_s26 + $0x5b0] sm:$0xff] }
 0x294   : > { %4276 = vmatpush1.bf16.msra.mxu0 %v5046_v52  ;;  %v5103_v52 = vcombine.high %v981_v5, %v985_v41 }
 0x295   : > { %4440 = vmatpush1.bf16.msra.mxu1 %v5048_v53  ;;  %4286 = vmatprep.subr.bf16.mxu0 %v5055_v55  ;;  %v5105_v53 = vcombine.high %v982_v42, %v986_v49  ;;  %v989_v55 = vld [vmem:[%s6108_s26 + $0x5d0] sm:$0xff]  ;;  %v5144_v49 = vcombine.low %v1022_v32, %v1026_v3 }
 0x296   : > { %4450 = vmatprep.subr.bf16.mxu1 %v5057_v56  ;;  %v993_v56 = vld [vmem:[%s6108_s26 + $0x5f0] sm:$0xff] }
 0x297   : > { %4278 = vmatmul.mubr.bf16.vlgmr.msra.gmra.mrb[12].mxu0 %v6232_v6  ;;  %v5111_v1 = vcombine.high %v989_v55, %v993_v56  ;;  %v5110_v10 = vcombine.low %v989_v55, %v993_v56  ;;  %v1038_v55 = vld [vmem:[%s6108_s26 + $0x758] sm:$0xff] }
 0x298   : > { %4442 = vmatmul.mubr.bf16.vlgmr.msra.gmra.mrb[12].mxu1 %v6232_v6  ;;  %4287 = vmatpush1.bf16.msra.mxu0 %v5054_v62  ;;  %v962_v6 = vld [vmem:[%s6108_s26 + $0x4f8] sm:$0xff]  ;;  %v5102_v62 = vcombine.low %v981_v5, %v985_v41 }
 0x299   : > { %4318 = vmatprep.mubr.bf16.mxu0 %v6240_v13  ;;  %4451 = vmatpush1.bf16.msra.mxu1 %v5056_v2  ;;  %v5080_v29 = vcombine.low %v958_v21, %v962_v6  ;;  %v5113_v2 = vcombine.high %v990_v57, %v994_v60  ;;  %v1030_v5 = vld [vmem:[%s6108_s26 + $0x718] sm:$0xff] }
 0x29a   : > { %4482 = vmatprep.mubr.bf16.mxu1 %v6240_v13  ;;  %4288 = vmatprep.subr.bf16.mxu0 %v5063_v4  ;;  %v5081_v13 = vcombine.high %v958_v21, %v962_v6  ;;  %v997_v4 = vld [vmem:[%s6108_s26 + $0x610] sm:$0xff]  ;;  %v1034_v41 = vld [vmem:[%s6108_s26 + $0x738] sm:$0xff] }
 0x29b   : > { %4452 = vmatprep.subr.bf16.mxu1 %v5065_v9  ;;  %v1002_v9 = vld [vmem:[%s6108_s26 + $0x638] sm:$0xff]  ;;  %v5118_v21 = vcombine.low %v997_v4, %v1001_v7  ;;  %v5152_v60 = vcombine.low %v1030_v5, %v1034_v41 }
 0x29c   : > { %4289 = vmatpush1.bf16.msra.mxu0 %v5062_v16  ;;  %v5119_v16 = vcombine.high %v997_v4, %v1001_v7  ;;  %v5120_v6 = vcombine.low %v998_v8, %v1002_v9  ;;  %v1042_v56 = vld [vmem:[%s6108_s26 + $0x778] sm:$0xff] }
 0x29d   : > { %4453 = vmatpush1.bf16.msra.mxu1 %v5064_v17  ;;  %4290 = vmatprep.subr.bf16.mxu0 %v5071_v61  ;;  %v5121_v17 = vcombine.high %v998_v8, %v1002_v9  ;;  %v1005_v61 = vld [vmem:[%s6108_s26 + $0x650] sm:$0xff]  ;;  %v1046_v4 = vld [vmem:[%s6108_s26 + $0x798] sm:$0xff]  ;;  %v5160_v9 = vcombine.low %v1038_v55, %v1042_v56 }
 0x29e   : > { %4454 = vmatprep.subr.bf16.mxu1 %v5073_v18  ;;  %v1009_v18 = vld [vmem:[%s6108_s26 + $0x670] sm:$0xff]  ;;  %v1050_v7 = vld [vmem:[%s6108_s26 + $0x7b8] sm:$0xff] }
 0x29f   : > { %v5126_v26 = vcombine.low %v1005_v61, %v1009_v18 }
 0x2a0   : > { %4291 = vmatpush1.bf16.msra.mxu0 %v5070_v22  ;;  %v5127_v22 = vcombine.high %v1005_v61, %v1009_v18  ;;  %v1054_v61 = vld [vmem:[%s6108_s26 + $0x7d8] sm:$0xff] }
 0x2a1   : > { %4455 = vmatpush1.bf16.msra.mxu1 %v5072_v23  ;;  %4292 = vmatprep.subr.bf16.mxu0 %v5079_v24  ;;  %v5129_v23 = vcombine.high %v1006_v19, %v1010_v20  ;;  %v1013_v24 = vld [vmem:[%s6108_s26 + $0x690] sm:$0xff]  ;;  %v1058_v18 = vld [vmem:[%s6108_s26 + $0x7f8] sm:$0xff]  ;;  %v5168_v20 = vcombine.low %v1046_v4, %v1050_v7 }
 0x2a2   : > { %4456 = vmatprep.subr.bf16.mxu1 %v5081_v13  ;;  %v1017_v13 = vld [vmem:[%s6108_s26 + $0x6b0] sm:$0xff] }
 0x2a3   : > { %v5134_v34 = vcombine.low %v1013_v24, %v1017_v13 }
 0x2a4   : > { %4293 = vmatpush1.bf16.msra.mxu0 %v5078_v28  ;;  %v5135_v28 = vcombine.high %v1013_v24, %v1017_v13  ;;  %v1062_v24 = vld [vmem:[%s6108_s26 + $0x818] sm:$0xff] }
 0x2a5   : > { %4457 = vmatpush1.bf16.msra.mxu1 %v5080_v29  ;;  %4294 = vmatprep.subr.bf16.mxu0 %v5087_v30  ;;  %v5137_v29 = vcombine.high %v1014_v14, %v1018_v25  ;;  %v1021_v30 = vld [vmem:[%s6108_s26 + $0x6d0] sm:$0xff]  ;;  %v1066_v13 = vld [vmem:[%s6108_s26 + $0x838] sm:$0xff]  ;;  %v5176_v25 = vcombine.low %v1054_v61, %v1058_v18 }
 0x2a6   : > { %4458 = vmatprep.subr.bf16.mxu1 %v5089_v31  ;;  %v1025_v31 = vld [vmem:[%s6108_s26 + $0x6f0] sm:$0xff] }
 0x2a7   : > { %v5142_v42 = vcombine.low %v1021_v30, %v1025_v31 }
 0x2a8   : > { %4295 = vmatpush1.bf16.msra.mxu0 %v5086_v54  ;;  %v5143_v54 = vcombine.high %v1021_v30, %v1025_v31  ;;  %v1070_v31 = vld [vmem:[%s6108_s26 + $0x858] sm:$0xff] }
 0x2a9   : > { %4459 = vmatpush1.bf16.msra.mxu1 %v5088_v37  ;;  %4296 = vmatprep.subr.bf16.mxu0 %v5095_v38  ;;  %v5145_v37 = vcombine.high %v1022_v32, %v1026_v3  ;;  %v1029_v38 = vld [vmem:[%s6108_s26 + $0x710] sm:$0xff]  ;;  %v1074_v32 = vld [vmem:[%s6108_s26 + $0x878] sm:$0xff]  ;;  %v5184_v3 = vcombine.low %v1062_v24, %v1066_v13 }
 0x2aa   : > { %4460 = vmatprep.subr.bf16.mxu1 %v5097_v39  ;;  %v1033_v39 = vld [vmem:[%s6108_s26 + $0x730] sm:$0xff] }
 0x2ab   : > { %v5150_v57 = vcombine.low %v1029_v38, %v1033_v39 }
 0x2ac   : > { %4297 = vmatpush1.bf16.msra.mxu0 %v5094_v15  ;;  %v5151_v15 = vcombine.high %v1029_v38, %v1033_v39  ;;  %v1078_v38 = vld [vmem:[%s6108_s26 + $0x898] sm:$0xff] }
 0x2ad   : > { %4461 = vmatpush1.bf16.msra.mxu1 %v5096_v51  ;;  %4298 = vmatprep.subr.bf16.mxu0 %v5103_v52  ;;  %v5153_v51 = vcombine.high %v1030_v5, %v1034_v41  ;;  %v1037_v52 = vld [vmem:[%s6108_s26 + $0x750] sm:$0xff]  ;;  %v1082_v39 = vld [vmem:[%s6108_s26 + $0x8b8] sm:$0xff]  ;;  %v5192_v41 = vcombine.low %v1070_v31, %v1074_v32 }
 0x2ae   : > { %4462 = vmatprep.subr.bf16.mxu1 %v5105_v53  ;;  %v1041_v53 = vld [vmem:[%s6108_s26 + $0x770] sm:$0xff] }
 0x2af   : > { %v5158_v8 = vcombine.low %v1037_v52, %v1041_v53 }
 0x2b0   : > { %4299 = vmatpush1.bf16.msra.mxu0 %v5102_v62  ;;  %v5159_v62 = vcombine.high %v1037_v52, %v1041_v53  ;;  %v1086_v52 = vld [vmem:[%s6108_s26 + $0x8d8] sm:$0xff] }
 0x2b1   : > { %4463 = vmatpush1.bf16.msra.mxu1 %v5104_v63  ;;  %4300 = vmatprep.subr.bf16.mxu0 %v5111_v1  ;;  %v5161_v63 = vcombine.high %v1038_v55, %v1042_v56  ;;  %v1045_v1 = vld [vmem:[%s6108_s26 + $0x790] sm:$0xff]  ;;  %v5200_v55 = vcombine.low %v1078_v38, %v1082_v39 }
 0x2b2   : > { %4464 = vmatprep.subr.bf16.mxu1 %v5113_v2  ;;  %v1049_v2 = vld [vmem:[%s6108_s26 + $0x7b0] sm:$0xff] }
 0x2b3   : > { %v5166_v19 = vcombine.low %v1045_v1, %v1049_v2 }
 0x2b4   : > { %4301 = vmatpush1.bf16.msra.mxu0 %v5110_v10  ;;  %v5167_v10 = vcombine.high %v1045_v1, %v1049_v2 }
 0x2b5   : > { %4465 = vmatpush1.bf16.msra.mxu1 %v5112_v11  ;;  %4302 = vmatprep.subr.bf16.mxu0 %v5119_v16  ;;  %v5169_v11 = vcombine.high %v1046_v4, %v1050_v7  ;;  %v1053_v16 = vld [vmem:[%s6108_s26 + $0x7d0] sm:$0xff] }
 0x2b6   : > { %4466 = vmatprep.subr.bf16.mxu1 %v5121_v17  ;;  %v1057_v17 = vld [vmem:[%s6108_s26 + $0x7f0] sm:$0xff] }
 0x2b7   : > { %v5174_v14 = vcombine.low %v1053_v16, %v1057_v17 }
 0x2b8   : > { %4303 = vmatpush1.bf16.msra.mxu0 %v5118_v21  ;;  %v5175_v21 = vcombine.high %v1053_v16, %v1057_v17 }
 0x2b9   : > { %4467 = vmatpush1.bf16.msra.mxu1 %v5120_v6  ;;  %4304 = vmatprep.subr.bf16.mxu0 %v5127_v22  ;;  %v5177_v6 = vcombine.high %v1054_v61, %v1058_v18  ;;  %v1061_v22 = vld [vmem:[%s6108_s26 + $0x810] sm:$0xff] }
 0x2ba   : > { %4468 = vmatprep.subr.bf16.mxu1 %v5129_v23  ;;  %v1065_v23 = vld [vmem:[%s6108_s26 + $0x830] sm:$0xff] }
 0x2bb   : > { %v5182_v30 = vcombine.low %v1061_v22, %v1065_v23 }
 0x2bc   : > { %4305 = vmatpush1.bf16.msra.mxu0 %v5126_v26  ;;  %v5183_v26 = vcombine.high %v1061_v22, %v1065_v23 }
 0x2bd   : > { %4469 = vmatpush1.bf16.msra.mxu1 %v5128_v27  ;;  %4306 = vmatprep.subr.bf16.mxu0 %v5135_v28  ;;  %v5185_v27 = vcombine.high %v1062_v24, %v1066_v13  ;;  %v1069_v28 = vld [vmem:[%s6108_s26 + $0x850] sm:$0xff] }
 0x2be   : > { %4470 = vmatprep.subr.bf16.mxu1 %v5137_v29  ;;  %v1073_v29 = vld [vmem:[%s6108_s26 + $0x870] sm:$0xff] }
 0x2bf   : > { %v5190_v5 = vcombine.low %v1069_v28, %v1073_v29 }
 0x2c0   : > { %4307 = vmatpush1.bf16.msra.mxu0 %v5134_v34  ;;  %v5191_v34 = vcombine.high %v1069_v28, %v1073_v29 }
 0x2c1   : > { %4471 = vmatpush1.bf16.msra.mxu1 %v5136_v36  ;;  %4308 = vmatprep.subr.bf16.mxu0 %v5143_v54  ;;  %v1077_v36 = vld [vmem:[%s6108_s26 + $0x890] sm:$0xff] }
 0x2c2   : > { %4472 = vmatprep.subr.bf16.mxu1 %v5145_v37  ;;  %v1081_v54 = vld [vmem:[%s6108_s26 + $0x8b0] sm:$0xff]  ;;  %v5193_v37 = vcombine.high %v1070_v31, %v1074_v32 }
 0x2c3   : > { %v5198_v53 = vcombine.low %v1077_v36, %v1081_v54  ;;  %v1125_v32 = vld [vmem:[%s6108_s26 + $0xa10] sm:$0xff] }
 0x2c4   : > { %4309 = vmatpush1.bf16.msra.mxu0 %v5142_v42  ;;  %v5199_v42 = vcombine.high %v1077_v36, %v1081_v54  ;;  %v1130_v36 = vld [vmem:[%s6108_s26 + $0xa38] sm:$0xff] }
 0x2c5   : > { %4473 = vmatpush1.bf16.msra.mxu1 %v5144_v49  ;;  %4310 = vmatprep.subr.bf16.mxu0 %v5151_v15  ;;  %v5201_v49 = vcombine.high %v1078_v38, %v1082_v39  ;;  %v1085_v15 = vld [vmem:[%s6108_s26 + $0x8d0] sm:$0xff] }
 0x2c6   : > { %4474 = vmatprep.subr.bf16.mxu1 %v5153_v51  ;;  %v1089_v51 = vld [vmem:[%s6108_s26 + $0x8f0] sm:$0xff] }
 0x2c7   : > { %v5207_v56 = vcombine.high %v1085_v15, %v1089_v51  ;;  %v5206_v1 = vcombine.low %v1085_v15, %v1089_v51 }
 0x2c8   : > { %4311 = vmatpush1.bf16.msra.mxu0 %v5150_v57  ;;  %v1093_v57 = vld [vmem:[%s6108_s26 + $0x910] sm:$0xff] }
 0x2c9   : > { %4475 = vmatpush1.bf16.msra.mxu1 %v5152_v60  ;;  %4312 = vmatprep.subr.bf16.mxu0 %v5159_v62  ;;  %v1097_v60 = vld [vmem:[%s6108_s26 + $0x930] sm:$0xff]  ;;  %v1094_v62 = vld [vmem:[%s6108_s26 + $0x918] sm:$0xff] }
 0x2ca   : > { %4476 = vmatprep.subr.bf16.mxu1 %v5161_v63  ;;  %v1098_v63 = vld [vmem:[%s6108_s26 + $0x938] sm:$0xff]  ;;  %v5215_v4 = vcombine.high %v1093_v57, %v1097_v60  ;;  %v5214_v16 = vcombine.low %v1093_v57, %v1097_v60 }
 0x2cb   : > { %v5217_v7 = vcombine.high %v1094_v62, %v1098_v63  ;;  %v5216_v17 = vcombine.low %v1094_v62, %v1098_v63 }
 0x2cc   : > { %4313 = vmatpush1.bf16.msra.mxu0 %v5158_v8  ;;  %v1101_v8 = vld [vmem:[%s6108_s26 + $0x950] sm:$0xff] }
 0x2cd   : > { %4477 = vmatpush1.bf16.msra.mxu1 %v5160_v9  ;;  %4314 = vmatprep.subr.bf16.mxu0 %v5167_v10  ;;  %v1105_v9 = vld [vmem:[%s6108_s26 + $0x970] sm:$0xff]  ;;  %v1102_v10 = vld [vmem:[%s6108_s26 + $0x958] sm:$0xff] }
 0x2ce   : > { %4478 = vmatprep.subr.bf16.mxu1 %v5169_v11  ;;  %v1106_v11 = vld [vmem:[%s6108_s26 + $0x978] sm:$0xff]  ;;  %v5223_v61 = vcombine.high %v1101_v8, %v1105_v9  ;;  %v5222_v22 = vcombine.low %v1101_v8, %v1105_v9 }
 0x2cf   : > { %v5225_v18 = vcombine.high %v1102_v10, %v1106_v11  ;;  %v5224_v23 = vcombine.low %v1102_v10, %v1106_v11 }
 0x2d0   : > { %4315 = vmatpush1.bf16.msra.mxu0 %v5166_v19  ;;  %v1109_v19 = vld [vmem:[%s6108_s26 + $0x990] sm:$0xff] }
 0x2d1   : > { %4479 = vmatpush1.bf16.msra.mxu1 %v5168_v20  ;;  %4316 = vmatprep.subr.bf16.mxu0 %v5175_v21  ;;  %v1113_v20 = vld [vmem:[%s6108_s26 + $0x9b0] sm:$0xff]  ;;  %v1110_v21 = vld [vmem:[%s6108_s26 + $0x998] sm:$0xff] }
 0x2d2   : > { %4480 = vmatprep.subr.bf16.mxu1 %v5177_v6  ;;  %v1114_v6 = vld [vmem:[%s6108_s26 + $0x9b8] sm:$0xff]  ;;  %v5231_v24 = vcombine.high %v1109_v19, %v1113_v20  ;;  %v5230_v28 = vcombine.low %v1109_v19, %v1113_v20 }
 0x2d3   : > { %v5233_v13 = vcombine.high %v1110_v21, %v1114_v6  ;;  %v5232_v29 = vcombine.low %v1110_v21, %v1114_v6 }
 0x2d4   : > { %4317 = vmatpush1.bf16.msra.mxu0 %v5174_v14  ;;  %v1117_v14 = vld [vmem:[%s6108_s26 + $0x9d0] sm:$0xff] }
 0x2d5   : > { %4481 = vmatpush1.bf16.msra.mxu1 %v5176_v25  ;;  %4327 = vmatprep.subr.bf16.mxu0 %v5183_v26  ;;  %v1121_v25 = vld [vmem:[%s6108_s26 + $0x9f0] sm:$0xff]  ;;  %v1118_v26 = vld [vmem:[%s6108_s26 + $0x9d8] sm:$0xff] }
 0x2d6   : > { %4491 = vmatprep.subr.bf16.mxu1 %v5185_v27  ;;  %v1122_v27 = vld [vmem:[%s6108_s26 + $0x9f8] sm:$0xff]  ;;  %v5238_v54 = vcombine.low %v1117_v14, %v1121_v25 }
 0x2d7   : > { %4319 = vmatmul.mubr.bf16.vlgmr.msra.gmra.mrb[12].mxu0 %v6325_v50  ;;  %v5241_v31 = vcombine.high %v1118_v26, %v1122_v27 }
 0x2d8   : > { %4483 = vmatmul.mubr.bf16.vlgmr.msra.gmra.mrb[12].mxu1 %v6325_v50  ;;  %4328 = vmatpush1.bf16.msra.mxu0 %v5182_v30  ;;  %v1090_v50 = vld [vmem:[%s6108_s26 + $0x8f8] sm:$0xff]  ;;  %v5239_v30 = vcombine.high %v1117_v14, %v1121_v25 }
 0x2d9   : > { %4359 = vmatprep.mubr.bf16.mxu0 %v6331_v59  ;;  %4492 = vmatpush1.bf16.msra.mxu1 %v5184_v3  ;;  %v5208_v2 = vcombine.low %v1086_v52, %v1090_v50  ;;  %v1129_v3 = vld [vmem:[%s6108_s26 + $0xa30] sm:$0xff] }
 0x2da   : > { %4523 = vmatprep.mubr.bf16.mxu1 %v6331_v59  ;;  %4329 = vmatprep.subr.bf16.mxu0 %v5191_v34  ;;  %v5209_v59 = vcombine.high %v1086_v52, %v1090_v50  ;;  %v1126_v34 = vld [vmem:[%s6108_s26 + $0xa18] sm:$0xff]  ;;  %v5247_v38 = vcombine.high %v1125_v32, %v1129_v3  ;;  %v5246_v15 = vcombine.low %v1125_v32, %v1129_v3 }
 0x2db   : > { %4493 = vmatprep.subr.bf16.mxu1 %v5193_v37  ;;  %v5240_v37 = vcombine.low %v1118_v26, %v1122_v27  ;;  %v5249_v39 = vcombine.high %v1126_v34, %v1130_v36  ;;  %v5248_v51 = vcombine.low %v1126_v34, %v1130_v36 }
 0x2dc   : > { %4330 = vmatpush1.bf16.msra.mxu0 %v5190_v5  ;;  %v1133_v5 = vld [vmem:[%s6108_s26 + $0xa50] sm:$0xff] }
 0x2dd   : > { %4494 = vmatpush1.bf16.msra.mxu1 %v5192_v41  ;;  %4331 = vmatprep.subr.bf16.mxu0 %v5199_v42  ;;  %v1137_v41 = vld [vmem:[%s6108_s26 + $0xa70] sm:$0xff]  ;;  %v1134_v42 = vld [vmem:[%s6108_s26 + $0xa58] sm:$0xff] }
 0x2de   : > { %4495 = vmatprep.subr.bf16.mxu1 %v5201_v49  ;;  %v1138_v49 = vld [vmem:[%s6108_s26 + $0xa78] sm:$0xff]  ;;  %v5255_v52 = vcombine.high %v1133_v5, %v1137_v41  ;;  %v5254_v57 = vcombine.low %v1133_v5, %v1137_v41 }
 0x2df   : > { %v5257_v50 = vcombine.high %v1134_v42, %v1138_v49  ;;  %v5256_v60 = vcombine.low %v1134_v42, %v1138_v49 }
 0x2e0   : > { %4332 = vmatpush1.bf16.msra.mxu0 %v5198_v53  ;;  %v1141_v53 = vld [vmem:[%s6108_s26 + $0xa90] sm:$0xff] }
 0x2e1   : > { %4496 = vmatpush1.bf16.msra.mxu1 %v5200_v55  ;;  %4333 = vmatprep.subr.bf16.mxu0 %v5207_v56  ;;  %v1145_v55 = vld [vmem:[%s6108_s26 + $0xab0] sm:$0xff]  ;;  %v1142_v56 = vld [vmem:[%s6108_s26 + $0xa98] sm:$0xff] }
 0x2e2   : > { %4497 = vmatprep.subr.bf16.mxu1 %v5209_v59  ;;  %v1146_v59 = vld [vmem:[%s6108_s26 + $0xab8] sm:$0xff]  ;;  %v5263_v62 = vcombine.high %v1141_v53, %v1145_v55  ;;  %v5262_v8 = vcombine.low %v1141_v53, %v1145_v55 }
 0x2e3   : > { %v5265_v63 = vcombine.high %v1142_v56, %v1146_v59  ;;  %v5264_v9 = vcombine.low %v1142_v56, %v1146_v59 }
 0x2e4   : > { %4334 = vmatpush1.bf16.msra.mxu0 %v5206_v1  ;;  %v1149_v1 = vld [vmem:[%s6108_s26 + $0xad0] sm:$0xff] }
 0x2e5   : > { %4498 = vmatpush1.bf16.msra.mxu1 %v5208_v2  ;;  %4335 = vmatprep.subr.bf16.mxu0 %v5215_v4  ;;  %v1153_v2 = vld [vmem:[%s6108_s26 + $0xaf0] sm:$0xff]  ;;  %v1150_v4 = vld [vmem:[%s6108_s26 + $0xad8] sm:$0xff] }
 0x2e6   : > { %4499 = vmatprep.subr.bf16.mxu1 %v5217_v7  ;;  %v1154_v7 = vld [vmem:[%s6108_s26 + $0xaf8] sm:$0xff]  ;;  %v5271_v10 = vcombine.high %v1149_v1, %v1153_v2  ;;  %v5270_v19 = vcombine.low %v1149_v1, %v1153_v2 }
 0x2e7   : > { %v5273_v11 = vcombine.high %v1150_v4, %v1154_v7  ;;  %v5272_v20 = vcombine.low %v1150_v4, %v1154_v7  ;;  %v1202_v1 = vld [vmem:[%s6108_s26 + $0xc78] sm:$0xff]  ;;  %v1205_v7 = vld [vmem:[%s6108_s26 + $0xc90] sm:$0xff] }
 0x2e8   : > { %4336 = vmatpush1.bf16.msra.mxu0 %v5214_v16  ;;  %v1157_v16 = vld [vmem:[%s6108_s26 + $0xb10] sm:$0xff] }
 0x2e9   : > { %4500 = vmatpush1.bf16.msra.mxu1 %v5216_v17  ;;  %4337 = vmatprep.subr.bf16.mxu0 %v5223_v61  ;;  %v1161_v17 = vld [vmem:[%s6108_s26 + $0xb30] sm:$0xff]  ;;  %v1158_v61 = vld [vmem:[%s6108_s26 + $0xb18] sm:$0xff] }
 0x2ea   : > { %4501 = vmatprep.subr.bf16.mxu1 %v5225_v18  ;;  %v1162_v18 = vld [vmem:[%s6108_s26 + $0xb38] sm:$0xff]  ;;  %v5279_v21 = vcombine.high %v1157_v16, %v1161_v17  ;;  %v5278_v14 = vcombine.low %v1157_v16, %v1161_v17 }
 0x2eb   : > { %v5281_v6 = vcombine.high %v1158_v61, %v1162_v18  ;;  %v5280_v25 = vcombine.low %v1158_v61, %v1162_v18 }
 0x2ec   : > { %4338 = vmatpush1.bf16.msra.mxu0 %v5222_v22  ;;  %v1165_v22 = vld [vmem:[%s6108_s26 + $0xb50] sm:$0xff] }
 0x2ed   : > { %4502 = vmatpush1.bf16.msra.mxu1 %v5224_v23  ;;  %4339 = vmatprep.subr.bf16.mxu0 %v5231_v24  ;;  %v1169_v23 = vld [vmem:[%s6108_s26 + $0xb70] sm:$0xff]  ;;  %v1166_v24 = vld [vmem:[%s6108_s26 + $0xb58] sm:$0xff] }
 0x2ee   : > { %4503 = vmatprep.subr.bf16.mxu1 %v5233_v13  ;;  %v1170_v13 = vld [vmem:[%s6108_s26 + $0xb78] sm:$0xff]  ;;  %v5287_v26 = vcombine.high %v1165_v22, %v1169_v23  ;;  %v5286_v32 = vcombine.low %v1165_v22, %v1169_v23 }
 0x2ef   : > { %v5289_v27 = vcombine.high %v1166_v24, %v1170_v13  ;;  %v5288_v3 = vcombine.low %v1166_v24, %v1170_v13  ;;  %v1221_v24 = vld [vmem:[%s6108_s26 + $0xd10] sm:$0xff] }
 0x2f0   : > { %4340 = vmatpush1.bf16.msra.mxu0 %v5230_v28  ;;  %v1173_v28 = vld [vmem:[%s6108_s26 + $0xb90] sm:$0xff] }
 0x2f1   : > { %4504 = vmatpush1.bf16.msra.mxu1 %v5232_v29  ;;  %4341 = vmatprep.subr.bf16.mxu0 %v5239_v30  ;;  %v1177_v29 = vld [vmem:[%s6108_s26 + $0xbb0] sm:$0xff]  ;;  %v1174_v30 = vld [vmem:[%s6108_s26 + $0xb98] sm:$0xff] }
 0x2f2   : > { %4505 = vmatprep.subr.bf16.mxu1 %v5241_v31  ;;  %v1178_v31 = vld [vmem:[%s6108_s26 + $0xbb8] sm:$0xff]  ;;  %v5295_v34 = vcombine.high %v1173_v28, %v1177_v29  ;;  %v5294_v5 = vcombine.low %v1173_v28, %v1177_v29  ;;  %v1225_v13 = vld [vmem:[%s6108_s26 + $0xd30] sm:$0xff] }
 0x2f3   : > { %v5297_v36 = vcombine.high %v1174_v30, %v1178_v31  ;;  %v5296_v41 = vcombine.low %v1174_v30, %v1178_v31  ;;  %v5343_v29 = vcombine.high %v1221_v24, %v1225_v13 }
 0x2f4   : > { %4342 = vmatpush1.bf16.msra.mxu0 %v5238_v54  ;;  %v1181_v54 = vld [vmem:[%s6108_s26 + $0xbd0] sm:$0xff] }
 0x2f5   : > { %4506 = vmatpush1.bf16.msra.mxu1 %v5240_v37  ;;  %4343 = vmatprep.subr.bf16.mxu0 %v5247_v38  ;;  %v1185_v37 = vld [vmem:[%s6108_s26 + $0xbf0] sm:$0xff]  ;;  %v1182_v38 = vld [vmem:[%s6108_s26 + $0xbd8] sm:$0xff] }
 0x2f6   : > { %4507 = vmatprep.subr.bf16.mxu1 %v5249_v39  ;;  %v1186_v39 = vld [vmem:[%s6108_s26 + $0xbf8] sm:$0xff]  ;;  %v5303_v42 = vcombine.high %v1181_v54, %v1185_v37  ;;  %v5302_v53 = vcombine.low %v1181_v54, %v1185_v37  ;;  %v5342_v54 = vcombine.low %v1221_v24, %v1225_v13  ;;  %v6727_v37 = vld [vmem:[%s409_s8] sm:$0xff] }
 0x2f7   : > { %v5305_v49 = vcombine.high %v1182_v38, %v1186_v39  ;;  %v5304_v55 = vcombine.low %v1182_v38, %v1186_v39 }
 0x2f8   : > { %4344 = vmatpush1.bf16.msra.mxu0 %v5246_v15  ;;  %v1189_v15 = vld [vmem:[%s6108_s26 + $0xc10] sm:$0xff] }
 0x2f9   : > { %4508 = vmatpush1.bf16.msra.mxu1 %v5248_v51  ;;  %4345 = vmatprep.subr.bf16.mxu0 %v5255_v52  ;;  %v1193_v51 = vld [vmem:[%s6108_s26 + $0xc30] sm:$0xff]  ;;  %v1190_v52 = vld [vmem:[%s6108_s26 + $0xc18] sm:$0xff] }
 0x2fa   : > { %4509 = vmatprep.subr.bf16.mxu1 %v5257_v50  ;;  %v1194_v50 = vld [vmem:[%s6108_s26 + $0xc38] sm:$0xff]  ;;  %v5311_v56 = vcombine.high %v1189_v15, %v1193_v51 }
 0x2fb   : > { %v5313_v59 = vcombine.high %v1190_v52, %v1194_v50  ;;  %v5312_v2 = vcombine.low %v1190_v52, %v1194_v50  ;;  %v1238_v50 = vld [vmem:[%s6108_s26 + $0xd98] sm:$0xff] }
 0x2fc   : > { %4346 = vmatpush1.bf16.msra.mxu0 %v5254_v57  ;;  %v1197_v57 = vld [vmem:[%s6108_s26 + $0xc50] sm:$0xff] }
 0x2fd   : > { %4510 = vmatpush1.bf16.msra.mxu1 %v5256_v60  ;;  %4347 = vmatprep.subr.bf16.mxu0 %v5263_v62  ;;  %v1201_v60 = vld [vmem:[%s6108_s26 + $0xc70] sm:$0xff]  ;;  %v5310_v62 = vcombine.low %v1189_v15, %v1193_v51  ;;  %v1320_v15 = vrot.slane %v6727_v37, %v6209_v44  ;;  %v1328_v51 = vrot.slane %v6727_v37, %v6299_v0 }
 0x2fe   : > { %4511 = vmatprep.subr.bf16.mxu1 %v5265_v63  ;;  %v1198_v63 = vld [vmem:[%s6108_s26 + $0xc58] sm:$0xff]  ;;  %v5319_v4 = vcombine.high %v1197_v57, %v1201_v60  ;;  %v5318_v16 = vcombine.low %v1197_v57, %v1201_v60 }
 0x2ff   : > { %v5320_v17 = vcombine.low %v1198_v63, %v1202_v1 }
 0x300   : > { %4348 = vmatpush1.bf16.msra.mxu0 %v5262_v8  ;;  %v1209_v8 = vld [vmem:[%s6108_s26 + $0xcb0] sm:$0xff] }
 0x301   : > { %4512 = vmatpush1.bf16.msra.mxu1 %v5264_v9  ;;  %4349 = vmatprep.subr.bf16.mxu0 %v5271_v10  ;;  %v5321_v9 = vcombine.high %v1198_v63, %v1202_v1  ;;  %v1206_v10 = vld [vmem:[%s6108_s26 + $0xc98] sm:$0xff]  ;;  %v5327_v61 = vcombine.high %v1205_v7, %v1209_v8 }
 0x302   : > { %4513 = vmatprep.subr.bf16.mxu1 %v5273_v11  ;;  %v1210_v11 = vld [vmem:[%s6108_s26 + $0xcb8] sm:$0xff] }
 0x303   : > { %v5329_v18 = vcombine.high %v1206_v10, %v1210_v11 }
 0x304   : > { %4350 = vmatpush1.bf16.msra.mxu0 %v5270_v19  ;;  %v1213_v19 = vld [vmem:[%s6108_s26 + $0xcd0] sm:$0xff] }
 0x305   : > { %4514 = vmatpush1.bf16.msra.mxu1 %v5272_v20  ;;  %4351 = vmatprep.subr.bf16.mxu0 %v5279_v21  ;;  %v1217_v20 = vld [vmem:[%s6108_s26 + $0xcf0] sm:$0xff]  ;;  %v1218_v21 = vld [vmem:[%s6108_s26 + $0xcf8] sm:$0xff] }
 0x306   : > { %4515 = vmatprep.subr.bf16.mxu1 %v5281_v6  ;;  %v5326_v6 = vcombine.low %v1205_v7, %v1209_v8  ;;  %v5335_v22 = vcombine.high %v1213_v19, %v1217_v20  ;;  %v1245_v7 = vld [vmem:[%s6108_s26 + $0xdd0] sm:$0xff] }
 0x307   : > { %v1249_v8 = vld [vmem:[%s6108_s26 + $0xdf0] sm:$0xff] }
 0x308   : > { %4352 = vmatpush1.bf16.msra.mxu0 %v5278_v14  ;;  %v1222_v14 = vld [vmem:[%s6108_s26 + $0xd18] sm:$0xff] }
 0x309   : > { %4516 = vmatpush1.bf16.msra.mxu1 %v5280_v25  ;;  %4353 = vmatprep.subr.bf16.mxu0 %v5287_v26  ;;  %v1226_v25 = vld [vmem:[%s6108_s26 + $0xd38] sm:$0xff]  ;;  %v6716_v26 = vld [vmem:[%s467_s24] sm:$0xff] }
 0x30a   : > { %4517 = vmatprep.subr.bf16.mxu1 %v5289_v27  ;;  %v5334_v27 = vcombine.low %v1213_v19, %v1217_v20  ;;  %v5345_v30 = vcombine.high %v1222_v14, %v1226_v25  ;;  %v6719_v31 = vunpack.c.l.bf16 %v6716_v26  ;;  %v5344_v38 = vcombine.low %v1222_v14, %v1226_v25 }
 0x30b   : > { %v5367_v14 = vcombine.high %v1245_v7, %v1249_v8 }
 0x30c   : > { %4354 = vmatpush1.bf16.msra.mxu0 %v5286_v32  ;;  %v1229_v32 = vld [vmem:[%s6108_s26 + $0xd50] sm:$0xff]  ;;  %v4597_v52 = vrot.slane %v6719_v31, %v6382_v48 }
 0x30d   : > { %4518 = vmatpush1.bf16.msra.mxu1 %v5288_v3  ;;  %4355 = vmatprep.subr.bf16.mxu0 %v5295_v34  ;;  %v1233_v3 = vld [vmem:[%s6108_s26 + $0xd70] sm:$0xff]  ;;  %v1230_v34 = vld [vmem:[%s6108_s26 + $0xd58] sm:$0xff] }
 0x30e   : > { %4519 = vmatprep.subr.bf16.mxu1 %v5297_v36  ;;  %v1234_v36 = vld [vmem:[%s6108_s26 + $0xd78] sm:$0xff]  ;;  %v5351_v39 = vcombine.high %v1229_v32, %v1233_v3  ;;  %v5350_v57 = vcombine.low %v1229_v32, %v1233_v3 }
 0x30f   : > { %v5352_v60 = vcombine.low %v1230_v34, %v1234_v36  ;;  %v1254_v3 = vld [vmem:[%s6108_s26 + $0xe18] sm:$0xff] }
 0x310   : > { %4356 = vmatpush1.bf16.msra.mxu0 %v5294_v5  ;;  %v4589_v5 = vrot.slane %v6719_v31, %v6209_v44 }
 0x311   : > { %4520 = vmatpush1.bf16.msra.mxu1 %v5296_v41  ;;  %4357 = vmatprep.subr.bf16.mxu0 %v5303_v42  ;;  %v5353_v41 = vcombine.high %v1230_v34, %v1234_v36  ;;  %v1237_v42 = vld [vmem:[%s6108_s26 + $0xd90] sm:$0xff]  ;;  %v1258_v34 = vld [vmem:[%s6108_s26 + $0xe38] sm:$0xff] }
 0x312   : > { %4521 = vmatprep.subr.bf16.mxu1 %v5305_v49  ;;  %v1241_v49 = vld [vmem:[%s6108_s26 + $0xdb0] sm:$0xff]  ;;  %v4629_v1 = vrot.slane %v4589_v5, %v6209_v44 }
 0x314   : > { %4358 = vmatpush1.bf16.msra.mxu0 %v5302_v53  ;;  %v1242_v53 = vld [vmem:[%s6108_s26 + $0xdb8] sm:$0xff] }
 0x315   : > { %4522 = vmatpush1.bf16.msra.mxu1 %v5304_v55  ;;  %4368 = vmatprep.subr.bf16.mxu0 %v5311_v56  ;;  %v1324_v55 = vrot.slane %v6727_v37, %v500_v46  ;;  %v4593_v56 = vrot.slane %v6719_v31, %v6299_v0  ;;  %v4601_v46 = vrot.slane %v6719_v31, %v6465_v35  ;;  %v1257_v31 = vld [vmem:[%s6108_s26 + $0xe30] sm:$0xff] }
 0x316   : > { %4532 = vmatprep.subr.bf16.mxu1 %v5313_v59  ;;  %v1332_v59 = vrot.slane %v6727_v37, %v508_v47  ;;  %v5360_v13 = vcombine.low %v1238_v50, %v1242_v53 }
 0x317   : > { %4360 = vmatmul.mubr.bf16.vlgmr.msra.gmra.mrb[12].mxu0 %v6408_v33  ;;  %v4633_v19 = vrot.slane %v4593_v56, %v6209_v44 }
 0x318   : > { %4524 = vmatmul.mubr.bf16.vlgmr.msra.gmra.mrb[12].mxu1 %v6408_v33  ;;  %4369 = vmatpush1.bf16.msra.mxu0 %v5310_v62  ;;  %v1214_v33 = vld [vmem:[%s6108_s26 + $0xcd8] sm:$0xff]  ;;  %v5359_v62 = vcombine.high %v1237_v42, %v1241_v49 }
 0x319   : > { %4400 = vmatprep.mubr.bf16.mxu0 %v6414_v40  ;;  %4533 = vmatpush1.bf16.msra.mxu1 %v5312_v2  ;;  %v5337_v23 = vcombine.high %v1214_v33, %v1218_v21  ;;  %v5336_v28 = vcombine.low %v1214_v33, %v1218_v21 }
 0x31a   : > { %4564 = vmatprep.mubr.bf16.mxu1 %v6414_v40  ;;  %4370 = vmatprep.subr.bf16.mxu0 %v5319_v4  ;;  %v5328_v40 = vcombine.low %v1206_v10, %v1210_v11  ;;  %v5361_v4 = vcombine.high %v1238_v50, %v1242_v53  ;;  %v4637_v10 = vrot.slane %v4597_v52, %v6209_v44  ;;  %v1265_v52 = vld [vmem:[%s6108_s26 + $0xe70] sm:$0xff]  ;;  %v1262_v53 = vld [vmem:[%s6108_s26 + $0xe58] sm:$0xff] }
 0x31b   : > { %4534 = vmatprep.subr.bf16.mxu1 %v5321_v9 }
 0x31c   : > { %4371 = vmatpush1.bf16.msra.mxu0 %v5318_v16 }
 0x31d   : > { %4535 = vmatpush1.bf16.msra.mxu1 %v5320_v17  ;;  %4372 = vmatprep.subr.bf16.mxu0 %v5327_v61  ;;  %v1246_v17 = vld [vmem:[%s6108_s26 + $0xdd8] sm:$0xff] }
 0x31e   : > { %4536 = vmatprep.subr.bf16.mxu1 %v5329_v18  ;;  %v1250_v61 = vld [vmem:[%s6108_s26 + $0xdf8] sm:$0xff] }
 0x31f   : > { %v5368_v5 = vcombine.low %v1246_v17, %v1250_v61 }
 0x320   : > { %4373 = vmatpush1.bf16.msra.mxu0 %v5326_v6  ;;  %v5358_v6 = vcombine.low %v1237_v42, %v1241_v49 }
 0x321   : > { %4537 = vmatpush1.bf16.msra.mxu1 %v5328_v40  ;;  %4374 = vmatprep.subr.bf16.mxu0 %v5335_v22 }
 0x322   : > { %4538 = vmatprep.subr.bf16.mxu1 %v5337_v23 }
 0x324   : > { %4375 = vmatpush1.bf16.msra.mxu0 %v5334_v27 }
 0x325   : > { %4539 = vmatpush1.bf16.msra.mxu1 %v5336_v28  ;;  %4376 = vmatprep.subr.bf16.mxu0 %v5343_v29  ;;  %v4641_v28 = vrot.slane %v4601_v46, %v6209_v44  ;;  %v5369_v29 = vcombine.high %v1246_v17, %v1250_v61  ;;  %v1273_v46 = vld [vmem:[%s6108_s26 + $0xeb0] sm:$0xff]  ;;  %v1278_v61 = vld [vmem:[%s6108_s26 + $0xed8] sm:$0xff] }
 0x326   : > { %4540 = vmatprep.subr.bf16.mxu1 %v5345_v30  ;;  %v1253_v30 = vld [vmem:[%s6108_s26 + $0xe10] sm:$0xff] }
 0x327   : > { %v1281_v17 = vld [vmem:[%s6108_s26 + $0xef0] sm:$0xff] }
 0x328   : > { %4377 = vmatpush1.bf16.msra.mxu0 %v5342_v54 }
 0x329   : > { %4541 = vmatpush1.bf16.msra.mxu1 %v5344_v38  ;;  %4378 = vmatprep.subr.bf16.mxu0 %v5351_v39  ;;  %v5366_v38 = vcombine.low %v1245_v7, %v1249_v8  ;;  %v1270_v7 = vld [vmem:[%s6108_s26 + $0xe98] sm:$0xff] }
 0x32a   : > { %v4074_v63 = vpop.f32.mrb[8].mxu0  ;;  %v4238_v2 = vpop.f32.mrb[8].mxu1  ;;  %4542 = vmatprep.subr.bf16.mxu1 %v5353_v41  ;;  %v5375_v41 = vcombine.high %v1253_v30, %v1257_v31  ;;  %v1274_v8 = vld [vmem:[%s6108_s26 + $0xeb8] sm:$0xff] }
 0x32b   : > { %v5440_v9 = vadd.f32 %v4074_v63, %v1320_v15  ;;  %v5442_v47 = vadd.f32 %v4238_v2, %v1328_v51  ;;  %v4076_v11 = vpop.f32.mrb[9].mxu0  ;;  %v4240_v16 = vpop.f32.mrb[9].mxu1  ;;  %v5377_v15 = vcombine.high %v1254_v3, %v1258_v34  ;;  %v1261_v51 = vld [vmem:[%s6108_s26 + $0xe50] sm:$0xff] }
 0x32c   : > { %v5441_v18 = vadd.f32 %v4076_v11, %v1324_v55  ;;  %v5443_v20 = vadd.f32 %v4240_v16, %v1332_v59  ;;  %v4078_v33 = vpop.f32.mrb[10].mxu0  ;;  %v4242_v21 = vpop.f32.mrb[10].mxu1  ;;  %4379 = vmatpush1.bf16.msra.mxu0 %v5350_v57  ;;  %v1266_v55 = vld [vmem:[%s6108_s26 + $0xe78] sm:$0xff]  ;;  %v5374_v59 = vcombine.low %v1253_v30, %v1257_v31  ;;  %v1269_v2 = vld [vmem:[%s6108_s26 + $0xe90] sm:$0xff]  ;;  %v5393_v11 = vcombine.high %v1270_v7, %v1274_v8 }
 0x32d   : > { %v4573_v40 = vmax.f32 %v5440_v9, 0.0  ;;  %v4575_v22 = vmax.f32 %v5442_v47, 0.0  ;;  %4543 = vmatpush1.bf16.msra.mxu1 %v5352_v60  ;;  %v4079_v23 = vpop.f32.mrb[11].mxu0  ;;  %v4243_v24 = vpop.f32.mrb[11].mxu1  ;;  %4380 = vmatprep.subr.bf16.mxu0 %v5359_v62  ;;  %v5376_v60 = vcombine.low %v1254_v3, %v1258_v34  ;;  %v5383_v62 = vcombine.high %v1261_v51, %v1265_v52  ;;  %v1277_v16 = vld [vmem:[%s6108_s26 + $0xed0] sm:$0xff]  ;;  %v1298_v30 = vld [vmem:[%s6108_s26 + $0xf78] sm:$0xff] }
 0x32e   : > { %v4574_v25 = vmax.f32 %v5441_v18, 0.0  ;;  %v4576_v27 = vmax.f32 %v5443_v20, 0.0  ;;  %4544 = vmatprep.subr.bf16.mxu1 %v5361_v4  ;;  %v5382_v9 = vcombine.low %v1261_v51, %v1265_v52  ;;  %v5384_v47 = vcombine.low %v1262_v53, %v1266_v55  ;;  %v1282_v18 = vld [vmem:[%s6108_s26 + $0xef8] sm:$0xff]  ;;  %v1313_v51 = vld [vmem:[%s6108_s26 + $0xff0] sm:$0xff] }
 0x32f   : > { %v4658_v32 = vmul.f32 %v4629_v1, %v4573_v40  ;;  %v4660_v36 = vmul.f32 %v4637_v10, %v4575_v22  ;;  %v5385_v1 = vcombine.high %v1262_v53, %v1266_v55  ;;  %v5391_v10 = vcombine.high %v1269_v2, %v1273_v46  ;;  %v1289_v40 = vld [vmem:[%s6108_s26 + $0xf30] sm:$0xff]  ;;  %v1286_v22 = vld [vmem:[%s6108_s26 + $0xf18] sm:$0xff] }
 0x330   : > { %v4659_v54 = vmul.f32 %v4633_v19, %v4574_v25  ;;  %4381 = vmatpush1.bf16.msra.mxu0 %v5358_v6  ;;  %v4661_v49 = vmul.f32 %v4641_v28, %v4576_v27  ;;  %v5390_v19 = vcombine.low %v1269_v2, %v1273_v46  ;;  %v5392_v20 = vcombine.low %v1270_v7, %v1274_v8  ;;  %v1285_v6 = vld [vmem:[%s6108_s26 + $0xf10] sm:$0xff]  ;;  %v1290_v23 = vld [vmem:[%s6108_s26 + $0xf38] sm:$0xff] }
 0x331   : > { %v4667_v39 = vsel %vm4666_vm2, %v4658_v32, 0.0  ;;  %4545 = vmatpush1.bf16.msra.mxu1 %v5360_v13  ;;  %4382 = vmatprep.subr.bf16.mxu0 %v5367_v14  ;;  %v4670_v56 = vsel %vm4666_vm2, %v4660_v36, 0.0  ;;  %v5399_v33 = vcombine.high %v1277_v16, %v1281_v17  ;;  %v5401_v21 = vcombine.high %v1278_v61, %v1282_v18  ;;  %v1293_v27 = vld [vmem:[%s6108_s26 + $0xf50] sm:$0xff]  ;;  %v1310_v52 = vld [vmem:[%s6108_s26 + $0xfd8] sm:$0xff] }
 0x332   : > { %v4668_v42 = vsel %vm4666_vm2, %v4659_v54, 0.0  ;;  %4546 = vmatprep.subr.bf16.mxu1 %v5369_v29  ;;  %v4672_v63 = vsel %vm4666_vm2, %v4661_v49, 0.0  ;;  %v5398_v24 = vcombine.low %v1277_v16, %v1281_v17  ;;  %v5400_v13 = vcombine.low %v1278_v61, %v1282_v18  ;;  %v1297_v28 = vld [vmem:[%s6108_s26 + $0xf70] sm:$0xff]  ;;  %v1294_v29 = vld [vmem:[%s6108_s26 + $0xf58] sm:$0xff] }
 0x333   : > { %v4669_v50 = vadd.f32 %v4668_v42, %v4667_v39  ;;  %v5407_v14 = vcombine.high %v1285_v6, %v1289_v40  ;;  %v5409_v25 = vcombine.high %v1286_v22, %v1290_v23  ;;  %v5406_v31 = vcombine.low %v1285_v6, %v1289_v40  ;;  %v1301_v36 = vld [vmem:[%s6108_s26 + $0xf90] sm:$0xff]  ;;  %v1306_v39 = vld [vmem:[%s6108_s26 + $0xfb8] sm:$0xff] }
 0x334   : > { %4383 = vmatpush1.bf16.msra.mxu0 %v5366_v38  ;;  %v5408_v32 = vcombine.low %v1286_v22, %v1290_v23  ;;  %v5415_v3 = vcombine.high %v1293_v27, %v1297_v28  ;;  %v5417_v34 = vcombine.high %v1294_v29, %v1298_v30  ;;  %v1305_v54 = vld [vmem:[%s6108_s26 + $0xfb0] sm:$0xff]  ;;  %v1302_v38 = vld [vmem:[%s6108_s26 + $0xf98] sm:$0xff]  ;;  %v1344_v2 = vrot.slane %v6727_v37, %v6465_v35 }
 0x335   : > { %v4671_v57 = vadd.f32 %v4670_v56, %v4669_v50  ;;  %4547 = vmatpush1.bf16.msra.mxu1 %v5368_v5  ;;  %4384 = vmatprep.subr.bf16.mxu0 %v5375_v41  ;;  %v5414_v5 = vcombine.low %v1293_v27, %v1297_v28  ;;  %v5416_v41 = vcombine.low %v1294_v29, %v1298_v30  ;;  %v1314_v50 = vld [vmem:[%s6108_s26 + $0xff8] sm:$0xff] }
 0x336   : > { %4548 = vmatprep.subr.bf16.mxu1 %v5377_v15  ;;  %v5423_v42 = vcombine.high %v1301_v36, %v1305_v54  ;;  %v5425_v49 = vcombine.high %v1302_v38, %v1306_v39  ;;  %v1309_v15 = vld [vmem:[%s6108_s26 + $0xfd0] sm:$0xff]  ;;  %v5422_v53 = vcombine.low %v1301_v36, %v1305_v54  ;;  %v5424_v55 = vcombine.low %v1302_v38, %v1306_v39 }
 0x337   : > { %v6773_v4 = vadd.f32 %v4672_v63, %v4671_v57  ;;  %v5431_v56 = vcombine.high %v1309_v15, %v1313_v51  ;;  %v5430_v57 = vcombine.low %v1309_v15, %v1313_v51  ;;  %v1336_v63 = vrot.slane %v6727_v37, %v6382_v48 }
 0x338   : > { %4385 = vmatpush1.bf16.msra.mxu0 %v5374_v59  ;;  %v5433_v59 = vcombine.high %v1310_v52, %v1314_v50  ;;  %v1340_v46 = vrot.slane %v6727_v37, %v516_v12 }
 0x339   : > { %4549 = vmatpush1.bf16.msra.mxu1 %v5376_v60  ;;  %4386 = vmatprep.subr.bf16.mxu0 %v5383_v62  ;;  %v5432_v60 = vcombine.low %v1310_v52, %v1314_v50  ;;  %v4583_v62 = vunpack.c.h.bf16 %v6716_v26 }
 0x33a   : > { %4550 = vmatprep.subr.bf16.mxu1 %v5385_v1 }
 0x33b   : > { %v4605_v1 = vrot.slane %v4583_v62, %v6209_v44  ;;  %v4609_v7 = vrot.slane %v4583_v62, %v6299_v0  ;;  %v4613_v8 = vrot.slane %v4583_v62, %v6382_v48  ;;  %v4617_v16 = vrot.slane %v4583_v62, %v6465_v35 }
 0x33c   : > { %4387 = vmatpush1.bf16.msra.mxu0 %v5382_v9 }
 0x33d   : > { %4551 = vmatpush1.bf16.msra.mxu1 %v5384_v47  ;;  %4388 = vmatprep.subr.bf16.mxu0 %v5391_v10  ;;  %v4645_v47 = vrot.slane %v4605_v1, %v6209_v44  ;;  %v4649_v12 = vrot.slane %v4609_v7, %v6209_v44  ;;  %v4653_v48 = vrot.slane %v4613_v8, %v6209_v44 }
 0x33e   : > { %4552 = vmatprep.subr.bf16.mxu1 %v5393_v11  ;;  %v4657_v35 = vrot.slane %v4617_v16, %v6209_v44  ;;  %v5434_v44 = vld [vmem:[%s470_s10] ss:$0 sm:$0xff] }
 0x340   : > { %4389 = vmatpush1.bf16.msra.mxu0 %v5390_v19 }
 0x341   : > { %4553 = vmatpush1.bf16.msra.mxu1 %v5392_v20  ;;  %4390 = vmatprep.subr.bf16.mxu0 %v5399_v33 }
 0x342   : > { %4554 = vmatprep.subr.bf16.mxu1 %v5401_v21 }
 0x344   : > { %4391 = vmatpush1.bf16.msra.mxu0 %v5398_v24 }
 0x345   : > { %4555 = vmatpush1.bf16.msra.mxu1 %v5400_v13  ;;  %4392 = vmatprep.subr.bf16.mxu0 %v5407_v14 }
 0x346   : > { %4556 = vmatprep.subr.bf16.mxu1 %v5409_v25 }
 0x348   : > { %4393 = vmatpush1.bf16.msra.mxu0 %v5406_v31 }
 0x349   : > { %4557 = vmatpush1.bf16.msra.mxu1 %v5408_v32  ;;  %4394 = vmatprep.subr.bf16.mxu0 %v5415_v3 }
 0x34a   : > { %4558 = vmatprep.subr.bf16.mxu1 %v5417_v34 }
 0x34c   : > { %4395 = vmatpush1.bf16.msra.mxu0 %v5414_v5 }
 0x34d   : > { %4559 = vmatpush1.bf16.msra.mxu1 %v5416_v41  ;;  %4396 = vmatprep.subr.bf16.mxu0 %v5423_v42 }
 0x34e   : > { %4560 = vmatprep.subr.bf16.mxu1 %v5425_v49 }
 0x350   : > { %4397 = vmatpush1.bf16.msra.mxu0 %v5422_v53 }
 0x351   : > { %4561 = vmatpush1.bf16.msra.mxu1 %v5424_v55  ;;  %4398 = vmatprep.subr.bf16.mxu0 %v5431_v56 }
 0x352   : > { %4562 = vmatprep.subr.bf16.mxu1 %v5433_v59 }
 0x354   : > { %4399 = vmatpush1.bf16.msra.mxu0 %v5430_v57 }
 0x355   : > { %4563 = vmatpush1.bf16.msra.mxu1 %v5432_v60 }
 0x357   : > { %4401 = vmatmul.mubr.bf16.vlgmr.msra.gmra.mrb[12].mxu0 %v6486_v45 }
 0x358   : > { %4565 = vmatmul.mubr.bf16.vlgmr.msra.gmra.mrb[12].mxu1 %v6486_v45  ;;  %v1348_v45 = vrot.slane %v6727_v37, %v524_v58 }
 0x42a   : > { %v4402_v26 = vpop.f32.mrb[12].mxu0 }
 0x42b   : > { %v5444_v9 = vadd.f32 %v4402_v26, %v1336_v63  ;;  %v4566_v10 = vpop.f32.mrb[12].mxu1  ;;  %v4404_v11 = vpop.f32.mrb[13].mxu0 }
 0x42c   : > { %v5446_v17 = vadd.f32 %v4566_v10, %v1344_v2  ;;  %v5445_v61 = vadd.f32 %v4404_v11, %v1340_v46  ;;  %v4568_v18 = vpop.f32.mrb[13].mxu1  ;;  %v4406_v0 = vpop.f32.mrb[14].mxu0 }
 0x42d   : > { %v4577_v19 = vmax.f32 %v5444_v9, 0.0  ;;  %v5447_v43 = vadd.f32 %v4568_v18, %v1348_v45  ;;  %v4570_v20 = vpop.f32.mrb[14].mxu1  ;;  %v4407_v58 = vpop.f32.mrb[15].mxu0 }
 0x42e   : > { %v4579_v37 = vmax.f32 %v5446_v17, 0.0  ;;  %v4578_v33 = vmax.f32 %v5445_v61, 0.0  ;;  %v4571_v21 = vpop.f32.mrb[15].mxu1 }
 0x42f   : > { %v4662_v6 = vmul.f32 %v4645_v47, %v4577_v19  ;;  %v4580_v40 = vmax.f32 %v5447_v43, 0.0 }
 0x430   : > { %v4663_v22 = vmul.f32 %v4649_v12, %v4578_v33  ;;  %v4664_v24 = vmul.f32 %v4653_v48, %v4579_v37 }
 0x431   : > { %v4674_v23 = vsel %vm4666_vm2, %v4662_v6, 0.0  ;;  %v4665_v25 = vmul.f32 %v4657_v35, %v4580_v40 }
 0x432   : > { %v4675_v13 = vadd.f32 %v4674_v23, %v6773_v4  ;;  %v4676_v14 = vsel %vm4666_vm2, %v4663_v22, 0.0  ;;  %v4678_v28 = vsel %vm4666_vm2, %v4664_v24, 0.0 }
 0x433   : > { %v4680_v30 = vsel %vm4666_vm2, %v4665_v25, 0.0 }
 0x434   : > { %v4677_v27 = vadd.f32 %v4676_v14, %v4675_v13 }
 0x436   : > { %v4679_v29 = vadd.f32 %v4678_v28, %v4677_v27 }
 0x438   : > { %v4681_v31 = vadd.f32 %v4680_v30, %v4679_v29 }
 0x43a   : > { %4682 = vadd.xlane.f32.xlu0 %v4681_v31 }
 0x4c7   : > { %v4683_v32 = vpop.xlane.xlu0 %4682 }
 0x4c8   : > { %v4691_v3 = vadd.f32 %v5434_v44, %v4683_v32 }
 0x4ca   : > { %v4692_v4 = vmax.f32 %v4691_v3, 0.0 }
 0x4cc   : > { %4694 = vst.msk [vmem:[%s477_s23] sm:$0x3] %vm4693_vm3, %v4692_v4 }
 0x4cd PF: > { %s24_s29 = sadd.s32 1, %s5798_s29   ;;  %s6896_s9 = sld [smem:[#allocation13_spill]] }
 0x4ce   : > { %p21_p4 = scmp.ge.s32.totalorder %s24_s29, 4   ;;  %s6897_s26 = sld [smem:[#allocation16_spill]] }
 0x4cf   : > { %s6898_s27 = sld [smem:[#allocation14_spill]]  ;;  %s6899_s28 = sld [smem:[#allocation15_spill]] }
 0x4d0   : > { %s6900_s24 = smov %s5782_s25  ;;  %23 = sbr.rel (!%p21_p4) target bundleno = 11 (0xb), region = 135 }
 0x4d3   : > { %s6901_s25 = smov %s6896_s9 }
 0x4d7   :  { %4720 = vsyncpa [#allocation3], 1 }
 0x4d8   :  { %4722 = vsyncpa [#allocation3 + $0x1], 1 }
 0x4d9   :  { %4723 = vsyncpa [#allocation5], 1 }
 0x4da   :  { %4725 = vsyncpa [#allocation5 + $0x1], 1 }
 0x4db   :  { %4726 = vsyncpa [#allocation8], 1 }
 0x4dc   :  { %4728 = vsyncpa [#allocation8 + $0x1], 1 }

</bundles_post_ra>
